<compile_context>
chip_gen: v6e
topology: v6e:2x2x1
jax: 0.10.0
libtpu: 0.0.40
codegen_flags: <defaults>
</compile_context>

<pallas_src>
import functools

import jax
import jax.numpy as jnp
from jax.experimental import pallas as pl
from jax.experimental.pallas import tpu as pltpu

_VMEM_LIMIT = 48 * 1024 * 1024  # fits v5e/v6e (128 MiB) and v7x (64 MiB)


# ----------------------------------------------------------------------------
# helpers
# ----------------------------------------------------------------------------
def _ceil_to(x, m):
    return ((x + m - 1) // m) * m


def _pick_tile(dim, candidates):
    """Largest candidate tile that strictly subdivides `dim`; else the full dim
    (full-dim blocks are always legal and give the single-block path for the tiny
    deep layers)."""
    for t in candidates:
        if dim > t and dim % t == 0:
            return t
    return dim


def _apply_act(x, kind):
    # Applied ONCE to x before patch extraction (act(0)=0 commutes with zero pad).
    # Plain-JAX: XLA fuses it into the patch gather, so no extra HBM pass.
    if kind == "lrelu":
        return jnp.where(x >= 0, x, 0.2 * x)
    if kind == "relu":
        return jnp.maximum(x, 0.0)
    return x


# ----------------------------------------------------------------------------
# Pallas kernel 1: tiled matmul with K accumulation + fused bias / tanh epilogue
# ----------------------------------------------------------------------------
def _mm_kernel(a_ref, b_ref, bias_ref, o_ref, acc_ref, *, post_act):
    @pl.when(pl.program_id(3) == 0)
    def _():
        acc_ref[...] = jnp.zeros_like(acc_ref)

    acc_ref[...] += jnp.dot(a_ref[...], b_ref[...],
                            preferred_element_type=jnp.float32)

    @pl.when(pl.program_id(3) == pl.num_programs(3) - 1)
    def _():
        out = acc_ref[...] + bias_ref[...]          # bias hoisted out of K loop
        if post_act == "tanh":
            out = jnp.tanh(out)
        o_ref[...] = out.astype(o_ref.dtype)


def pallas_matmul(a, b, bias, post_act="none", out_dtype=jnp.bfloat16):
    """a: (P, M, K) bf16, b: (P, K, N) bf16, bias: (1, N) f32.  K, N already
    padded to multiples of 128 by the callers.  Returns (P, M, N) in out_dtype."""
    P, M, K = a.shape
    N = b.shape[2]
    tm = _pick_tile(M, (512, 256, 128, 64, 32, 16, 8))
    tn = _pick_tile(N, (256,))
    tk = _pick_tile(K, (512, 256))
    grid = (P, M // tm, N // tn, K // tk)

    cost = pl.CostEstimate(
        flops=2 * P * M * N * K,
        transcendentals=P * M * N if post_act == "tanh" else 0,
        bytes_accessed=int(a.size * a.dtype.itemsize + b.size * b.dtype.itemsize
                           + bias.size * 4
                           + P * M * N * jnp.dtype(out_dtype).itemsize),
    )

    return pl.pallas_call(
        functools.partial(_mm_kernel, post_act=post_act),
        out_shape=jax.ShapeDtypeStruct((P, M, N), out_dtype),
        grid=grid,
        in_specs=[
            pl.BlockSpec((None, tm, tk), lambda p, i, j, k: (p, i, k)),
            pl.BlockSpec((None, tk, tn), lambda p, i, j, k: (p, k, j)),
            pl.BlockSpec((1, tn), lambda p, i, j, k: (0, j)),
        ],
        out_specs=pl.BlockSpec((None, tm, tn), lambda p, i, j, k: (p, i, j)),
        scratch_shapes=[pltpu.VMEM((tm, tn), jnp.float32)],
        compiler_params=pltpu.CompilerParams(
            dimension_semantics=("parallel", "parallel", "parallel", "arbitrary"),
            vmem_limit_bytes=_VMEM_LIMIT),
        cost_estimate=cost,
    )(a, b, bias)


# ----------------------------------------------------------------------------
# Pallas kernels 2/3: tiled BatchNorm (training-mode batch stats) + fused concat
# ----------------------------------------------------------------------------
def _bn_stats_kernel(x_ref, g_ref, b_ref, scale_ref, shift_ref, s_ref, q_ref,
                     *, inv_count):
    @pl.when(pl.program_id(0) == 0)
    def _():
        s_ref[...] = jnp.zeros_like(s_ref)
        q_ref[...] = jnp.zeros_like(q_ref)

    x = x_ref[...].astype(jnp.float32)
    s_ref[...] += jnp.sum(x, axis=0, keepdims=True)
    q_ref[...] += jnp.sum(x * x, axis=0, keepdims=True)

    @pl.when(pl.program_id(0) == pl.num_programs(0) - 1)
    def _():
        mean = s_ref[...] * inv_count
        var = jnp.maximum(q_ref[...] * inv_count - mean * mean, 0.0)  # biased var
        scale = g_ref[...] * jax.lax.rsqrt(var + 1e-5)
        scale_ref[...] = scale
        shift_ref[...] = b_ref[...] - mean * scale


def _bn_apply_kernel(h_ref, scale_ref, shift_ref, o_ref):
    o_ref[...] = (h_ref[...].astype(jnp.float32) * scale_ref[...]
                  + shift_ref[...]).astype(o_ref.dtype)


def _bn_apply_concat_kernel(h_ref, scale_ref, shift_ref, x_ref, o_ref):
    hn = h_ref[...].astype(jnp.float32) * scale_ref[...] + shift_ref[...]
    o_ref[...] = jnp.concatenate(
        [hn, x_ref[...].astype(jnp.float32)], axis=-1).astype(o_ref.dtype)


def pallas_batchnorm(x, gamma, beta, skip=None, out_dtype=jnp.bfloat16):
    """Training-mode BatchNorm over (N*H*W, C).  If `skip` is given, the normalize
    pass also writes the skip-connection concat [BN(x), skip] in one store."""
    n, h, w, c = x.shape
    rows = n * h * w
    x2 = x.reshape(rows, c)
    tr = _pick_tile(rows, (2048, 1024, 512, 256))
    grid = (rows // tr,)
    g2 = gamma.reshape(1, c).astype(jnp.float32)
    b2 = beta.reshape(1, c).astype(jnp.float32)

    scale, shift = pl.pallas_call(
        functools.partial(_bn_stats_kernel, inv_count=1.0 / rows),
        out_shape=[jax.ShapeDtypeStruct((1, c), jnp.float32),
                   jax.ShapeDtypeStruct((1, c), jnp.float32)],
        grid=grid,
        in_specs=[pl.BlockSpec((tr, c), lambda i: (i, 0)),
                  pl.BlockSpec((1, c), lambda i: (0, 0)),
                  pl.BlockSpec((1, c), lambda i: (0, 0))],
        out_specs=[pl.BlockSpec((1, c), lambda i: (0, 0)),
                   pl.BlockSpec((1, c), lambda i: (0, 0))],
        scratch_shapes=[pltpu.VMEM((1, c), jnp.float32),
                        pltpu.VMEM((1, c), jnp.float32)],
        compiler_params=pltpu.CompilerParams(
            dimension_semantics=("arbitrary",), vmem_limit_bytes=_VMEM_LIMIT),
    )(x2, g2, b2)

    if skip is None:
        out = pl.pallas_call(
            _bn_apply_kernel,
            out_shape=jax.ShapeDtypeStruct((rows, c), out_dtype),
            grid=grid,
            in_specs=[pl.BlockSpec((tr, c), lambda i: (i, 0)),
                      pl.BlockSpec((1, c), lambda i: (0, 0)),
                      pl.BlockSpec((1, c), lambda i: (0, 0))],
            out_specs=pl.BlockSpec((tr, c), lambda i: (i, 0)),
            compiler_params=pltpu.CompilerParams(
                dimension_semantics=("parallel",), vmem_limit_bytes=_VMEM_LIMIT),
        )(x2, scale, shift)
        return out.reshape(n, h, w, c)

    cs = skip.shape[-1]
    s2 = skip.reshape(rows, cs)
    out = pl.pallas_call(
        _bn_apply_concat_kernel,
        out_shape=jax.ShapeDtypeStruct((rows, c + cs), out_dtype),
        grid=grid,
        in_specs=[pl.BlockSpec((tr, c), lambda i: (i, 0)),
                  pl.BlockSpec((1, c), lambda i: (0, 0)),
                  pl.BlockSpec((1, c), lambda i: (0, 0)),
                  pl.BlockSpec((tr, cs), lambda i: (i, 0))],
        out_specs=pl.BlockSpec((tr, c + cs), lambda i: (i, 0)),
        compiler_params=pltpu.CompilerParams(
            dimension_semantics=("parallel",), vmem_limit_bytes=_VMEM_LIMIT),
    )(x2, scale, shift, s2)
    return out.reshape(n, h, w, c + cs)


# ----------------------------------------------------------------------------
# Conv2d(k=4,s=2,p=1) and ConvTranspose2d(k=4,s=2,p=1) on top of the matmul kernel
# ----------------------------------------------------------------------------
def conv_down(x, w, b, pre_act=None, out_dtype=jnp.bfloat16):
    """Conv2d(kernel=4, stride=2, pad=1).  x: NHWC, w: (4,4,Cin,Cout)."""
    n, h, wd, c = x.shape
    cout = w.shape[-1]
    ho, wo = h // 2, wd // 2
    x = _apply_act(x, pre_act)                      # once on x, not 16x on A
    cp = _ceil_to(c, 8)                             # 16*cp is a multiple of 128
    npad = _ceil_to(cout, 128)                      # lane-dense output
    xp = jnp.pad(x, ((0, 0), (1, 1), (1, 1), (0, cp - c))).astype(jnp.bfloat16)
    patches = [xp[:, kh:kh + 2 * ho:2, kw:kw + 2 * wo:2, :]
               for kh in range(4) for kw in range(4)]
    a = jnp.concatenate(patches, -1).reshape(1, n * ho * wo, 16 * cp)
    wp = jnp.pad(w, ((0, 0), (0, 0), (0, cp - c), (0, npad - cout))
                 ).astype(jnp.bfloat16).reshape(1, 16 * cp, npad)
    bias = jnp.pad(b, (0, npad - cout)).reshape(1, npad).astype(jnp.float32)
    out = pallas_matmul(a, wp, bias, post_act="none", out_dtype=out_dtype)
    return out[0, :, :cout].reshape(n, ho, wo, cout)


def conv_up(x, w, b, pre_act=None, post_act="none", out_dtype=jnp.bfloat16):
    """ConvTranspose2d(kernel=4, stride=2, pad=1) via polyphase decomposition:
    one 2x2-tap stride-1 conv per output-pixel parity (p, q) on the pad-1 input.
    w is stored in the equivalent stride-1-conv HWIO form (4,4,Cin,Cout)."""
    n, h, wd, c = x.shape
    cout = w.shape[-1]
    x = _apply_act(x, pre_act)
    cp = _ceil_to(c, 32)                            # 4*cp is a multiple of 128
    npad = _ceil_to(cout, 128)
    xp = jnp.pad(x, ((0, 0), (1, 1), (1, 1), (0, cp - c))).astype(jnp.bfloat16)
    wp = jnp.pad(w, ((0, 0), (0, 0), (0, cp - c), (0, npad - cout))
                 ).astype(jnp.bfloat16)
    a_list, b_list = [], []
    for p in range(2):
        for q in range(2):
            taps = [xp[:, p + da:p + da + h, q + db:q + db + wd, :]
                    for da in range(2) for db in range(2)]
            a_list.append(jnp.concatenate(taps, -1).reshape(n * h * wd, 4 * cp))
            b_list.append(wp[p::2, q::2].reshape(4 * cp, npad))
    A = jnp.stack(a_list)                           # (4, M, 4*cp)
    B = jnp.stack(b_list)                           # (4, 4*cp, npad)
    bias = jnp.pad(b, (0, npad - cout)).reshape(1, npad).astype(jnp.float32)
    out = pallas_matmul(A, B, bias, post_act=post_act, out_dtype=out_dtype)
    out = out[..., :cout].reshape(2, 2, n, h, wd, cout)
    # interleave parities: y[n, 2u+p, 2v+q, c] = out[p, q, n, u, v, c]
    return out.transpose(2, 3, 0, 4, 1, 5).reshape(n, 2 * h, 2 * wd, cout)


# ----------------------------------------------------------------------------
# U-Net parameter init + forward (mirrors UnetSkipConnectionBlock / UnetGenerator)
# ----------------------------------------------------------------------------
def _init_conv(key, cin, cout):
    k1, k2 = jax.random.split(key)
    w = jax.random.normal(k1, (4, 4, cin, cout), jnp.float32) * 0.05
    b = jax.random.normal(k2, (cout,), jnp.float32) * 0.05
    return w, b


def init_unet_block(key, outer_nc, inner_nc, submodule=None, outermost=False,
                    innermost=False, outermost_input_nc=-1):
    k_down, k_up = jax.random.split(key)
    down_in = outermost_input_nc if (outermost and outermost_input_nc > 0) else outer_nc
    p = {"outermost": outermost, "innermost": innermost, "submodule": submodule}
    p["down_w"], p["down_b"] = _init_conv(k_down, down_in, inner_nc)
    if outermost:
        p["up_w"], p["up_b"] = _init_conv(k_up, inner_nc * 2, outer_nc)
    elif innermost:
        p["up_w"], p["up_b"] = _init_conv(k_up, inner_nc, outer_nc)
        p["up_bn_g"] = jnp.ones((outer_nc,), jnp.float32)
        p["up_bn_b"] = jnp.zeros((outer_nc,), jnp.float32)
    else:
        p["up_w"], p["up_b"] = _init_conv(k_up, inner_nc * 2, outer_nc)
        p["down_bn_g"] = jnp.ones((inner_nc,), jnp.float32)
        p["down_bn_b"] = jnp.zeros((inner_nc,), jnp.float32)
        p["up_bn_g"] = jnp.ones((outer_nc,), jnp.float32)
        p["up_bn_b"] = jnp.zeros((outer_nc,), jnp.float32)
    return p


def init_unet_generator(key, input_nc, output_nc, num_downs, ngf):
    keys = jax.random.split(key, num_downs)
    block = init_unet_block(keys[0], ngf * 8, ngf * 8, innermost=True)
    ki = 1
    for _ in range(num_downs - 5):
        block = init_unet_block(keys[ki], ngf * 8, ngf * 8, submodule=block)
        ki += 1
    block = init_unet_block(keys[ki], ngf * 4, ngf * 8, submodule=block); ki += 1
    block = init_unet_block(keys[ki], ngf * 2, ngf * 4, submodule=block); ki += 1
    block = init_unet_block(keys[ki], ngf, ngf * 2, submodule=block); ki += 1
    block = init_unet_block(keys[ki], output_nc, ngf, submodule=block,
                            outermost=True, outermost_input_nc=input_nc)
    return block


def unet_block_forward(p, x):
    # NOTE: the F.pad size-matching in the reference is a no-op for even spatial dims.
    if p["outermost"]:
        h = conv_down(x, p["down_w"], p["down_b"], pre_act=None)
        h = unet_block_forward(p["submodule"], h)
        return conv_up(h, p["up_w"], p["up_b"], pre_act="relu", post_act="tanh",
                       out_dtype=jnp.float32)
    if p["innermost"]:
        h = conv_down(x, p["down_w"], p["down_b"], pre_act="lrelu")
        h = conv_up(h, p["up_w"], p["up_b"], pre_act="relu")
        return pallas_batchnorm(h, p["up_bn_g"], p["up_bn_b"], skip=x)   # fused BN+concat
    h = conv_down(x, p["down_w"], p["down_b"], pre_act="lrelu")
    h = pallas_batchnorm(h, p["down_bn_g"], p["down_bn_b"])
    h = unet_block_forward(p["submodule"], h)
    h = conv_up(h, p["up_w"], p["up_b"], pre_act="relu")
    return pallas_batchnorm(h, p["up_bn_g"], p["up_bn_b"], skip=x)       # fused BN+concat


# ----------------------------------------------------------------------------
# Generator_cascade
# ----------------------------------------------------------------------------
def init_generator_cascade(key, input_nc, output_nc, ns, ngf, iteration=0):
    k1, k2, k3 = jax.random.split(key, 3)
    params = {
        "iteration": iteration,
        "model1": init_unet_generator(k1, input_nc, output_nc, ns[0], ngf),
        "model2": init_unet_generator(k2, input_nc * 2, output_nc, ns[1], ngf),
    }
    if iteration > 0:
        params["model3"] = init_unet_generator(k3, input_nc * 2, output_nc, ns[2], ngf)
    return params


def generator_cascade_forward(params, inp):
    x = unet_block_forward(params["model1"], inp)
    res = [x]
    z = None
    for i in range(params["iteration"] + 1):
        if i % 2 == 0:
            # channel concat (NHWC last axis); plain-JAX glue, fused by XLA into
            # the following conv's patch gather.
            xy = jnp.concatenate([x, inp], axis=-1)
            z = unet_block_forward(params["model2"], xy)
            res.append(z)
        else:
            zy = jnp.concatenate([z, inp], axis=-1)
            x = unet_block_forward(params["model3"], zy)
            res.append(x)
    return res


# ----------------------------------------------------------------------------
if __name__ == "__main__":
    key = jax.random.PRNGKey(0)
    k_param, k_input = jax.random.split(key)

    # small config: input_nc=3, output_nc=3, ngf=8, ns=[5,5], iteration=0
    input_nc, output_nc, ngf = 3, 3, 8
    ns = [5, 5]
    N, H, W = 2, 32, 32   # spatial must support 5 stride-2 downsamples (32 -> 1)

    params = init_generator_cascade(k_param, input_nc, output_nc, ns, ngf, iteration=0)

    # layout: NHWC (the PyTorch-equivalent input would be NCHW [2, 3, 32, 32])
    x = jax.random.normal(k_input, (N, H, W, input_nc), jnp.float32)

    fwd = jax.jit(lambda inp: generator_cascade_forward(params, inp))
    outputs = fwd(x)
    outputs = [jax.block_until_ready(o) for o in outputs]

    assert len(outputs) == 2
    assert outputs[0].shape == (N, H, W, output_nc)
    assert outputs[1].shape == (N, H, W, output_nc)
    assert all(bool(jnp.all(jnp.isfinite(o))) for o in outputs)

    print("KERNEL_OK")
</pallas_src>

<mosaic_0001>
module attributes {stable_mosaic.version = 11 : i64} {
  func.func @_mm_kernel(%arg0: i32, %arg1: i32, %arg2: i32, %arg3: i32, %arg4: memref<1x256x128xbf16, #tpu.memory_space<vmem>>, %arg5: memref<1x128x128xbf16, #tpu.memory_space<vmem>>, %arg6: memref<1x128xf32, #tpu.memory_space<vmem>>, %arg7: memref<1x256x128xbf16, #tpu.memory_space<vmem>>, %arg8: memref<256x128xf32, #tpu.memory_space<vmem>>) attributes {dimension_semantics = [#tpu.dimension_semantics<parallel>, #tpu.dimension_semantics<parallel>, #tpu.dimension_semantics<parallel>, #tpu.dimension_semantics<arbitrary>], iteration_bounds = array<i64: 1, 2, 1, 1>, scalar_prefetch = 0 : i64, scratch_operands = 1 : i64, tpu.core_type = #tpu.core_type<tc>, window_params = [{transform_indices = @transform_0, window_bounds = array<i64: 1, 256, 128>}, {transform_indices = @transform_1, window_bounds = array<i64: 1, 128, 128>}, {transform_indices = @transform_2, window_bounds = array<i64: 1, 128>}, {transform_indices = @transform_3, window_bounds = array<i64: 1, 256, 128>}]} {
    %c0_i32 = arith.constant 0 : i32
    %0 = arith.cmpi eq, %arg3, %c0_i32 : i32
    %1 = arith.extui %0 : i1 to i32
    %c0_i32_0 = arith.constant 0 : i32
    %2 = arith.cmpi ne, %1, %c0_i32_0 : i32
    scf.if %2 {
      %cst_12 = arith.constant 0.000000e+00 : f32
      %14 = vector.broadcast %cst_12 : f32 to vector<256x128xf32>
      %c0_13 = arith.constant 0 : index
      %c0_14 = arith.constant 0 : index
      %15 = vector.load %arg8[%c0_13, %c0_14] : memref<256x128xf32, #tpu.memory_space<vmem>>, vector<256x128xf32>
      tpu.vector_store %arg8[%c0_13, %c0_14], %14 {strides = array<i32>} : memref<256x128xf32, #tpu.memory_space<vmem>>, vector<256x128xf32>,
    } else {
    }
    %c0 = arith.constant 0 : index
    %c0_1 = arith.constant 0 : index
    %3 = vector.load %arg8[%c0, %c0_1] : memref<256x128xf32, #tpu.memory_space<vmem>>, vector<256x128xf32>
    %c0_2 = arith.constant 0 : index
    %c0_3 = arith.constant 0 : index
    %c0_4 = arith.constant 0 : index
    %4 = vector.load %arg4[%c0_2, %c0_3, %c0_4] : memref<1x256x128xbf16, #tpu.memory_space<vmem>>, vector<1x256x128xbf16>
    %5 = vector.shape_cast %4 : vector<1x256x128xbf16> to vector<256x128xbf16>
    %c0_5 = arith.constant 0 : index
    %c0_6 = arith.constant 0 : index
    %c0_7 = arith.constant 0 : index
    %6 = vector.load %arg5[%c0_5, %c0_6, %c0_7] : memref<1x128x128xbf16, #tpu.memory_space<vmem>>, vector<1x128x128xbf16>
    %7 = vector.shape_cast %6 : vector<1x128x128xbf16> to vector<128x128xbf16>
    %cst = arith.constant dense<0.000000e+00> : vector<256x128xf32>
    %8 = tpu.matmul %5, %7, %cst {dimension_numbers = #tpu.dot_dimension_numbers<[1], [0], [0], [1], [0, 0, 1, 1], [], []>} : vector<256x128xbf16>, vector<128x128xbf16>, vector<256x128xf32> -> vector<256x128xf32>
    %9 = arith.addf %3, %8 : vector<256x128xf32>
    %c0_8 = arith.constant 0 : index
    %c0_9 = arith.constant 0 : index
    %10 = vector.load %arg8[%c0_8, %c0_9] : memref<256x128xf32, #tpu.memory_space<vmem>>, vector<256x128xf32>
    tpu.vector_store %arg8[%c0_8, %c0_9], %9 {strides = array<i32>} : memref<256x128xf32, #tpu.memory_space<vmem>>, vector<256x128xf32>,
    %c0_i32_10 = arith.constant 0 : i32
    %11 = arith.cmpi eq, %arg3, %c0_i32_10 : i32
    %12 = arith.extui %11 : i1 to i32
    %c0_i32_11 = arith.constant 0 : i32
    %13 = arith.cmpi ne, %12, %c0_i32_11 : i32
    scf.if %13 {
      %c0_12 = arith.constant 0 : index
      %c0_13 = arith.constant 0 : index
      %14 = vector.load %arg8[%c0_12, %c0_13] : memref<256x128xf32, #tpu.memory_space<vmem>>, vector<256x128xf32>
      %c0_14 = arith.constant 0 : index
      %c0_15 = arith.constant 0 : index
      %15 = vector.load %arg6[%c0_14, %c0_15] : memref<1x128xf32, #tpu.memory_space<vmem>>, vector<1x128xf32>
      %16 = vector.broadcast %15 : vector<1x128xf32> to vector<256x128xf32>
      %17 = arith.addf %14, %16 : vector<256x128xf32>
      %18 = arith.truncf %17 : vector<256x128xf32> to vector<256x128xbf16>
      %c0_16 = arith.constant 0 : index
      %c0_17 = arith.constant 0 : index
      %c0_18 = arith.constant 0 : index
      %19 = vector.load %arg7[%c0_16, %c0_17, %c0_18] : memref<1x256x128xbf16, #tpu.memory_space<vmem>>, vector<1x256x128xbf16>
      %20 = vector.shape_cast %19 : vector<1x256x128xbf16> to vector<256x128xbf16>
      %21 = vector.shape_cast %18 : vector<256x128xbf16> to vector<1x256x128xbf16>
      tpu.vector_store %arg7[%c0_16, %c0_17, %c0_18], %21 {strides = array<i32>} : memref<1x256x128xbf16, #tpu.memory_space<vmem>>, vector<1x256x128xbf16>,
    } else {
    }
    return
  }
  func.func @transform_0(%arg0: i32, %arg1: i32, %arg2: i32, %arg3: i32) -> (i32, i32, i32) {
    %c0_i32 = arith.constant 0 : i32
    return %arg0, %arg1, %arg3 : i32, i32, i32
  }
  func.func @transform_1(%arg0: i32, %arg1: i32, %arg2: i32, %arg3: i32) -> (i32, i32, i32) {
    %c0_i32 = arith.constant 0 : i32
    return %arg0, %arg3, %arg2 : i32, i32, i32
  }
  func.func @transform_2(%arg0: i32, %arg1: i32, %arg2: i32, %arg3: i32) -> (i32, i32) {
    %c0_i32 = arith.constant 0 : i32
    %c0_i32_0 = arith.constant 0 : i32
    return %c0_i32, %arg2 : i32, i32
  }
  func.func @transform_3(%arg0: i32, %arg1: i32, %arg2: i32, %arg3: i32) -> (i32, i32, i32) {
    %c0_i32 = arith.constant 0 : i32
    return %arg0, %arg1, %arg2 : i32, i32, i32
  }
}

module attributes {stable_mosaic.version = 11 : i64} {
  func.func @_mm_kernel(%arg0: i32, %arg1: i32, %arg2: i32, %arg3: i32, %arg4: memref<1x64x128xbf16, #tpu.memory_space<vmem>>, %arg5: memref<1x128x128xbf16, #tpu.memory_space<vmem>>, %arg6: memref<1x128xf32, #tpu.memory_space<vmem>>, %arg7: memref<1x64x128xbf16, #tpu.memory_space<vmem>>, %arg8: memref<64x128xf32, #tpu.memory_space<vmem>>) attributes {dimension_semantics = [#tpu.dimension_semantics<parallel>, #tpu.dimension_semantics<parallel>, #tpu.dimension_semantics<parallel>, #tpu.dimension_semantics<arbitrary>], iteration_bounds = array<i64: 1, 2, 1, 1>, scalar_prefetch = 0 : i64, scratch_operands = 1 : i64, tpu.core_type = #tpu.core_type<tc>, window_params = [{transform_indices = @transform_0, window_bounds = array<i64: 1, 64, 128>}, {transform_indices = @transform_1, window_bounds = array<i64: 1, 128, 128>}, {transform_indices = @transform_2, window_bounds = array<i64: 1, 128>}, {transform_indices = @transform_3, window_bounds = array<i64: 1, 64, 128>}]} {
    %c0_i32 = arith.constant 0 : i32
    %0 = arith.cmpi eq, %arg3, %c0_i32 : i32
    %1 = arith.extui %0 : i1 to i32
    %c0_i32_0 = arith.constant 0 : i32
    %2 = arith.cmpi ne, %1, %c0_i32_0 : i32
    scf.if %2 {
      %cst_12 = arith.constant 0.000000e+00 : f32
      %14 = vector.broadcast %cst_12 : f32 to vector<64x128xf32>
      %c0_13 = arith.constant 0 : index
      %c0_14 = arith.constant 0 : index
      %15 = vector.load %arg8[%c0_13, %c0_14] : memref<64x128xf32, #tpu.memory_space<vmem>>, vector<64x128xf32>
      tpu.vector_store %arg8[%c0_13, %c0_14], %14 {strides = array<i32>} : memref<64x128xf32, #tpu.memory_space<vmem>>, vector<64x128xf32>,
    } else {
    }
    %c0 = arith.constant 0 : index
    %c0_1 = arith.constant 0 : index
    %3 = vector.load %arg8[%c0, %c0_1] : memref<64x128xf32, #tpu.memory_space<vmem>>, vector<64x128xf32>
    %c0_2 = arith.constant 0 : index
    %c0_3 = arith.constant 0 : index
    %c0_4 = arith.constant 0 : index
    %4 = vector.load %arg4[%c0_2, %c0_3, %c0_4] : memref<1x64x128xbf16, #tpu.memory_space<vmem>>, vector<1x64x128xbf16>
    %5 = vector.shape_cast %4 : vector<1x64x128xbf16> to vector<64x128xbf16>
    %c0_5 = arith.constant 0 : index
    %c0_6 = arith.constant 0 : index
    %c0_7 = arith.constant 0 : index
    %6 = vector.load %arg5[%c0_5, %c0_6, %c0_7] : memref<1x128x128xbf16, #tpu.memory_space<vmem>>, vector<1x128x128xbf16>
    %7 = vector.shape_cast %6 : vector<1x128x128xbf16> to vector<128x128xbf16>
    %cst = arith.constant dense<0.000000e+00> : vector<64x128xf32>
    %8 = tpu.matmul %5, %7, %cst {dimension_numbers = #tpu.dot_dimension_numbers<[1], [0], [0], [1], [0, 0, 1, 1], [], []>} : vector<64x128xbf16>, vector<128x128xbf16>, vector<64x128xf32> -> vector<64x128xf32>
    %9 = arith.addf %3, %8 : vector<64x128xf32>
    %c0_8 = arith.constant 0 : index
    %c0_9 = arith.constant 0 : index
    %10 = vector.load %arg8[%c0_8, %c0_9] : memref<64x128xf32, #tpu.memory_space<vmem>>, vector<64x128xf32>
    tpu.vector_store %arg8[%c0_8, %c0_9], %9 {strides = array<i32>} : memref<64x128xf32, #tpu.memory_space<vmem>>, vector<64x128xf32>,
    %c0_i32_10 = arith.constant 0 : i32
    %11 = arith.cmpi eq, %arg3, %c0_i32_10 : i32
    %12 = arith.extui %11 : i1 to i32
    %c0_i32_11 = arith.constant 0 : i32
    %13 = arith.cmpi ne, %12, %c0_i32_11 : i32
    scf.if %13 {
      %c0_12 = arith.constant 0 : index
      %c0_13 = arith.constant 0 : index
      %14 = vector.load %arg8[%c0_12, %c0_13] : memref<64x128xf32, #tpu.memory_space<vmem>>, vector<64x128xf32>
      %c0_14 = arith.constant 0 : index
      %c0_15 = arith.constant 0 : index
      %15 = vector.load %arg6[%c0_14, %c0_15] : memref<1x128xf32, #tpu.memory_space<vmem>>, vector<1x128xf32>
      %16 = vector.broadcast %15 : vector<1x128xf32> to vector<64x128xf32>
      %17 = arith.addf %14, %16 : vector<64x128xf32>
      %18 = arith.truncf %17 : vector<64x128xf32> to vector<64x128xbf16>
      %c0_16 = arith.constant 0 : index
      %c0_17 = arith.constant 0 : index
      %c0_18 = arith.constant 0 : index
      %19 = vector.load %arg7[%c0_16, %c0_17, %c0_18] : memref<1x64x128xbf16, #tpu.memory_space<vmem>>, vector<1x64x128xbf16>
      %20 = vector.shape_cast %19 : vector<1x64x128xbf16> to vector<64x128xbf16>
      %21 = vector.shape_cast %18 : vector<64x128xbf16> to vector<1x64x128xbf16>
      tpu.vector_store %arg7[%c0_16, %c0_17, %c0_18], %21 {strides = array<i32>} : memref<1x64x128xbf16, #tpu.memory_space<vmem>>, vector<1x64x128xbf16>,
    } else {
    }
    return
  }
  func.func @transform_0(%arg0: i32, %arg1: i32, %arg2: i32, %arg3: i32) -> (i32, i32, i32) {
    %c0_i32 = arith.constant 0 : i32
    return %arg0, %arg1, %arg3 : i32, i32, i32
  }
  func.func @transform_1(%arg0: i32, %arg1: i32, %arg2: i32, %arg3: i32) -> (i32, i32, i32) {
    %c0_i32 = arith.constant 0 : i32
    return %arg0, %arg3, %arg2 : i32, i32, i32
  }
  func.func @transform_2(%arg0: i32, %arg1: i32, %arg2: i32, %arg3: i32) -> (i32, i32) {
    %c0_i32 = arith.constant 0 : i32
    %c0_i32_0 = arith.constant 0 : i32
    return %c0_i32, %arg2 : i32, i32
  }
  func.func @transform_3(%arg0: i32, %arg1: i32, %arg2: i32, %arg3: i32) -> (i32, i32, i32) {
    %c0_i32 = arith.constant 0 : i32
    return %arg0, %arg1, %arg2 : i32, i32, i32
  }
}

module attributes {stable_mosaic.version = 11 : i64} {
  func.func @_bn_apply_kernel(%arg0: i32, %arg1: memref<128x16xbf16, #tpu.memory_space<vmem>>, %arg2: memref<1x16xf32, #tpu.memory_space<vmem>>, %arg3: memref<1x16xf32, #tpu.memory_space<vmem>>, %arg4: memref<128x16xbf16, #tpu.memory_space<vmem>>) attributes {dimension_semantics = [#tpu.dimension_semantics<parallel>], iteration_bounds = array<i64: 1>, scalar_prefetch = 0 : i64, scratch_operands = 0 : i64, tpu.core_type = #tpu.core_type<tc>, window_params = [{transform_indices = @transform_0, window_bounds = array<i64: 128, 16>}, {pipeline_mode = #tpu.pipeline_mode<synchronous>, transform_indices = @transform_1, window_bounds = array<i64: 1, 16>}, {pipeline_mode = #tpu.pipeline_mode<synchronous>, transform_indices = @transform_2, window_bounds = array<i64: 1, 16>}, {transform_indices = @transform_3, window_bounds = array<i64: 128, 16>}]} {
    %c0 = arith.constant 0 : index
    %c0_0 = arith.constant 0 : index
    %0 = vector.load %arg1[%c0, %c0_0] : memref<128x16xbf16, #tpu.memory_space<vmem>>, vector<128x16xbf16>
    %1 = arith.extf %0 : vector<128x16xbf16> to vector<128x16xf32>
    %c0_1 = arith.constant 0 : index
    %c0_2 = arith.constant 0 : index
    %2 = vector.load %arg2[%c0_1, %c0_2] : memref<1x16xf32, #tpu.memory_space<vmem>>, vector<1x16xf32>
    %3 = vector.broadcast %2 : vector<1x16xf32> to vector<128x16xf32>
    %4 = arith.mulf %1, %3 : vector<128x16xf32>
    %c0_3 = arith.constant 0 : index
    %c0_4 = arith.constant 0 : index
    %5 = vector.load %arg3[%c0_3, %c0_4] : memref<1x16xf32, #tpu.memory_space<vmem>>, vector<1x16xf32>
    %6 = vector.broadcast %5 : vector<1x16xf32> to vector<128x16xf32>
    %7 = arith.addf %4, %6 : vector<128x16xf32>
    %8 = arith.truncf %7 : vector<128x16xf32> to vector<128x16xbf16>
    %c0_5 = arith.constant 0 : index
    %c0_6 = arith.constant 0 : index
    %9 = vector.load %arg4[%c0_5, %c0_6] : memref<128x16xbf16, #tpu.memory_space<vmem>>, vector<128x16xbf16>
    tpu.vector_store %arg4[%c0_5, %c0_6], %8 {strides = array<i32>} : memref<128x16xbf16, #tpu.memory_space<vmem>>, vector<128x16xbf16>,
    return
  }
  func.func @transform_0(%arg0: i32) -> (i32, i32) {
    %c0_i32 = arith.constant 0 : i32
    %c0_i32_0 = arith.constant 0 : i32
    return %arg0, %c0_i32 : i32, i32
  }
  func.func @transform_1(%arg0: i32) -> (i32, i32) {
    %c0_i32 = arith.constant 0 : i32
    %c0_i32_0 = arith.constant 0 : i32
    %c0_i32_1 = arith.constant 0 : i32
    return %c0_i32, %c0_i32_0 : i32, i32
  }
  func.func @transform_2(%arg0: i32) -> (i32, i32) {
    %c0_i32 = arith.constant 0 : i32
    %c0_i32_0 = arith.constant 0 : i32
    %c0_i32_1 = arith.constant 0 : i32
    return %c0_i32, %c0_i32_0 : i32, i32
  }
  func.func @transform_3(%arg0: i32) -> (i32, i32) {
    %c0_i32 = arith.constant 0 : i32
    %c0_i32_0 = arith.constant 0 : i32
    return %arg0, %c0_i32 : i32, i32
  }
}

module attributes {stable_mosaic.version = 11 : i64} {
  func.func @_bn_stats_kernel(%arg0: i32, %arg1: memref<128x16xbf16, #tpu.memory_space<vmem>>, %arg2: memref<1x16xf32, #tpu.memory_space<vmem>>, %arg3: memref<1x16xf32, #tpu.memory_space<vmem>>, %arg4: memref<1x16xf32, #tpu.memory_space<vmem>>, %arg5: memref<1x16xf32, #tpu.memory_space<vmem>>, %arg6: memref<1x16xf32, #tpu.memory_space<vmem>>, %arg7: memref<1x16xf32, #tpu.memory_space<vmem>>) attributes {dimension_semantics = [#tpu.dimension_semantics<arbitrary>], iteration_bounds = array<i64: 1>, scalar_prefetch = 0 : i64, scratch_operands = 2 : i64, tpu.core_type = #tpu.core_type<tc>, window_params = [{transform_indices = @transform_0, window_bounds = array<i64: 128, 16>}, {pipeline_mode = #tpu.pipeline_mode<synchronous>, transform_indices = @transform_1, window_bounds = array<i64: 1, 16>}, {pipeline_mode = #tpu.pipeline_mode<synchronous>, transform_indices = @transform_2, window_bounds = array<i64: 1, 16>}, {pipeline_mode = #tpu.pipeline_mode<synchronous>, transform_indices = @transform_3, window_bounds = array<i64: 1, 16>}, {pipeline_mode = #tpu.pipeline_mode<synchronous>, transform_indices = @transform_4, window_bounds = array<i64: 1, 16>}]} {
    %c0_i32 = arith.constant 0 : i32
    %0 = arith.cmpi eq, %arg0, %c0_i32 : i32
    %1 = arith.extui %0 : i1 to i32
    %c0_i32_0 = arith.constant 0 : i32
    %2 = arith.cmpi ne, %1, %c0_i32_0 : i32
    scf.if %2 {
      %cst_13 = arith.constant 0.000000e+00 : f32
      %19 = vector.broadcast %cst_13 : f32 to vector<1x16xf32>
      %c0_14 = arith.constant 0 : index
      %c0_15 = arith.constant 0 : index
      %20 = vector.load %arg6[%c0_14, %c0_15] : memref<1x16xf32, #tpu.memory_space<vmem>>, vector<1x16xf32>
      tpu.vector_store %arg6[%c0_14, %c0_15], %19 {strides = array<i32>} : memref<1x16xf32, #tpu.memory_space<vmem>>, vector<1x16xf32>,
      %cst_16 = arith.constant 0.000000e+00 : f32
      %21 = vector.broadcast %cst_16 : f32 to vector<1x16xf32>
      %c0_17 = arith.constant 0 : index
      %c0_18 = arith.constant 0 : index
      %22 = vector.load %arg7[%c0_17, %c0_18] : memref<1x16xf32, #tpu.memory_space<vmem>>, vector<1x16xf32>
      tpu.vector_store %arg7[%c0_17, %c0_18], %21 {strides = array<i32>} : memref<1x16xf32, #tpu.memory_space<vmem>>, vector<1x16xf32>,
    } else {
    }
    %c0 = arith.constant 0 : index
    %c0_1 = arith.constant 0 : index
    %3 = vector.load %arg1[%c0, %c0_1] : memref<128x16xbf16, #tpu.memory_space<vmem>>, vector<128x16xbf16>
    %4 = arith.extf %3 : vector<128x16xbf16> to vector<128x16xf32>
    %c0_2 = arith.constant 0 : index
    %c0_3 = arith.constant 0 : index
    %5 = vector.load %arg6[%c0_2, %c0_3] : memref<1x16xf32, #tpu.memory_space<vmem>>, vector<1x16xf32>
    %cst = arith.constant dense<0.000000e+00> : vector<16xf32>
    %6 = vector.multi_reduction <add>, %4, %cst [0] : vector<128x16xf32> to vector<16xf32>
    %7 = vector.shape_cast %6 : vector<16xf32> to vector<1x16xf32>
    %8 = arith.addf %5, %7 : vector<1x16xf32>
    %c0_4 = arith.constant 0 : index
    %c0_5 = arith.constant 0 : index
    %9 = vector.load %arg6[%c0_4, %c0_5] : memref<1x16xf32, #tpu.memory_space<vmem>>, vector<1x16xf32>
    tpu.vector_store %arg6[%c0_4, %c0_5], %8 {strides = array<i32>} : memref<1x16xf32, #tpu.memory_space<vmem>>, vector<1x16xf32>,
    %c0_6 = arith.constant 0 : index
    %c0_7 = arith.constant 0 : index
    %10 = vector.load %arg7[%c0_6, %c0_7] : memref<1x16xf32, #tpu.memory_space<vmem>>, vector<1x16xf32>
    %11 = arith.mulf %4, %4 : vector<128x16xf32>
    %cst_8 = arith.constant dense<0.000000e+00> : vector<16xf32>
    %12 = vector.multi_reduction <add>, %11, %cst_8 [0] : vector<128x16xf32> to vector<16xf32>
    %13 = vector.shape_cast %12 : vector<16xf32> to vector<1x16xf32>
    %14 = arith.addf %10, %13 : vector<1x16xf32>
    %c0_9 = arith.constant 0 : index
    %c0_10 = arith.constant 0 : index
    %15 = vector.load %arg7[%c0_9, %c0_10] : memref<1x16xf32, #tpu.memory_space<vmem>>, vector<1x16xf32>
    tpu.vector_store %arg7[%c0_9, %c0_10], %14 {strides = array<i32>} : memref<1x16xf32, #tpu.memory_space<vmem>>, vector<1x16xf32>,
    %c0_i32_11 = arith.constant 0 : i32
    %16 = arith.cmpi eq, %arg0, %c0_i32_11 : i32
    %17 = arith.extui %16 : i1 to i32
    %c0_i32_12 = arith.constant 0 : i32
    %18 = arith.cmpi ne, %17, %c0_i32_12 : i32
    scf.if %18 {
      %c0_13 = arith.constant 0 : index
      %c0_14 = arith.constant 0 : index
      %19 = vector.load %arg6[%c0_13, %c0_14] : memref<1x16xf32, #tpu.memory_space<vmem>>, vector<1x16xf32>
      %cst_15 = arith.constant 7.812500e-03 : f32
      %20 = vector.broadcast %cst_15 : f32 to vector<1x16xf32>
      %21 = arith.mulf %19, %20 : vector<1x16xf32>
      %c0_16 = arith.constant 0 : index
      %c0_17 = arith.constant 0 : index
      %22 = vector.load %arg7[%c0_16, %c0_17] : memref<1x16xf32, #tpu.memory_space<vmem>>, vector<1x16xf32>
      %cst_18 = arith.constant 7.812500e-03 : f32
      %23 = vector.broadcast %cst_18 : f32 to vector<1x16xf32>
      %24 = arith.mulf %22, %23 : vector<1x16xf32>
      %25 = arith.mulf %21, %21 : vector<1x16xf32>
      %26 = arith.subf %24, %25 : vector<1x16xf32>
      %cst_19 = arith.constant 0.000000e+00 : f32
      %27 = vector.broadcast %cst_19 : f32 to vector<1x16xf32>
      %28 = arith.maximumf %26, %27 : vector<1x16xf32>
      %c0_20 = arith.constant 0 : index
      %c0_21 = arith.constant 0 : index
      %29 = vector.load %arg2[%c0_20, %c0_21] : memref<1x16xf32, #tpu.memory_space<vmem>>, vector<1x16xf32>
      %cst_22 = arith.constant 9.99999974E-6 : f32
      %30 = vector.broadcast %cst_22 : f32 to vector<1x16xf32>
      %31 = arith.addf %28, %30 : vector<1x16xf32>
      %32 = math.rsqrt %31 : vector<1x16xf32>
      %33 = arith.mulf %29, %32 : vector<1x16xf32>
      %c0_23 = arith.constant 0 : index
      %c0_24 = arith.constant 0 : index
      %34 = vector.load %arg4[%c0_23, %c0_24] : memref<1x16xf32, #tpu.memory_space<vmem>>, vector<1x16xf32>
      tpu.vector_store %arg4[%c0_23, %c0_24], %33 {strides = array<i32>} : memref<1x16xf32, #tpu.memory_space<vmem>>, vector<1x16xf32>,
      %c0_25 = arith.constant 0 : index
      %c0_26 = arith.constant 0 : index
      %35 = vector.load %arg3[%c0_25, %c0_26] : memref<1x16xf32, #tpu.memory_space<vmem>>, vector<1x16xf32>
      %36 = arith.mulf %21, %33 : vector<1x16xf32>
      %37 = arith.subf %35, %36 : vector<1x16xf32>
      %c0_27 = arith.constant 0 : index
      %c0_28 = arith.constant 0 : index
      %38 = vector.load %arg5[%c0_27, %c0_28] : memref<1x16xf32, #tpu.memory_space<vmem>>, vector<1x16xf32>
      tpu.vector_store %arg5[%c0_27, %c0_28], %37 {strides = array<i32>} : memref<1x16xf32, #tpu.memory_space<vmem>>, vector<1x16xf32>,
    } else {
    }
    return
  }
  func.func @transform_0(%arg0: i32) -> (i32, i32) {
    %c0_i32 = arith.constant 0 : i32
    %c0_i32_0 = arith.constant 0 : i32
    return %arg0, %c0_i32 : i32, i32
  }
  func.func @transform_1(%arg0: i32) -> (i32, i32) {
    %c0_i32 = arith.constant 0 : i32
    %c0_i32_0 = arith.constant 0 : i32
    %c0_i32_1 = arith.constant 0 : i32
    return %c0_i32, %c0_i32_0 : i32, i32
  }
  func.func @transform_2(%arg0: i32) -> (i32, i32) {
    %c0_i32 = arith.constant 0 : i32
    %c0_i32_0 = arith.constant 0 : i32
    %c0_i32_1 = arith.constant 0 : i32
    return %c0_i32, %c0_i32_0 : i32, i32
  }
  func.func @transform_3(%arg0: i32) -> (i32, i32) {
    %c0_i32 = arith.constant 0 : i32
    %c0_i32_0 = arith.constant 0 : i32
    %c0_i32_1 = arith.constant 0 : i32
    return %c0_i32, %c0_i32_0 : i32, i32
  }
  func.func @transform_4(%arg0: i32) -> (i32, i32) {
    %c0_i32 = arith.constant 0 : i32
    %c0_i32_0 = arith.constant 0 : i32
    %c0_i32_1 = arith.constant 0 : i32
    return %c0_i32, %c0_i32_0 : i32, i32
  }
}

module attributes {stable_mosaic.version = 11 : i64} {
  func.func @_bn_apply_kernel(%arg0: i32, %arg1: memref<32x32xbf16, #tpu.memory_space<vmem>>, %arg2: memref<1x32xf32, #tpu.memory_space<vmem>>, %arg3: memref<1x32xf32, #tpu.memory_space<vmem>>, %arg4: memref<32x32xbf16, #tpu.memory_space<vmem>>) attributes {dimension_semantics = [#tpu.dimension_semantics<parallel>], iteration_bounds = array<i64: 1>, scalar_prefetch = 0 : i64, scratch_operands = 0 : i64, tpu.core_type = #tpu.core_type<tc>, window_params = [{transform_indices = @transform_0, window_bounds = array<i64: 32, 32>}, {pipeline_mode = #tpu.pipeline_mode<synchronous>, transform_indices = @transform_1, window_bounds = array<i64: 1, 32>}, {pipeline_mode = #tpu.pipeline_mode<synchronous>, transform_indices = @transform_2, window_bounds = array<i64: 1, 32>}, {transform_indices = @transform_3, window_bounds = array<i64: 32, 32>}]} {
    %c0 = arith.constant 0 : index
    %c0_0 = arith.constant 0 : index
    %0 = vector.load %arg1[%c0, %c0_0] : memref<32x32xbf16, #tpu.memory_space<vmem>>, vector<32x32xbf16>
    %1 = arith.extf %0 : vector<32x32xbf16> to vector<32x32xf32>
    %c0_1 = arith.constant 0 : index
    %c0_2 = arith.constant 0 : index
    %2 = vector.load %arg2[%c0_1, %c0_2] : memref<1x32xf32, #tpu.memory_space<vmem>>, vector<1x32xf32>
    %3 = vector.broadcast %2 : vector<1x32xf32> to vector<32x32xf32>
    %4 = arith.mulf %1, %3 : vector<32x32xf32>
    %c0_3 = arith.constant 0 : index
    %c0_4 = arith.constant 0 : index
    %5 = vector.load %arg3[%c0_3, %c0_4] : memref<1x32xf32, #tpu.memory_space<vmem>>, vector<1x32xf32>
    %6 = vector.broadcast %5 : vector<1x32xf32> to vector<32x32xf32>
    %7 = arith.addf %4, %6 : vector<32x32xf32>
    %8 = arith.truncf %7 : vector<32x32xf32> to vector<32x32xbf16>
    %c0_5 = arith.constant 0 : index
    %c0_6 = arith.constant 0 : index
    %9 = vector.load %arg4[%c0_5, %c0_6] : memref<32x32xbf16, #tpu.memory_space<vmem>>, vector<32x32xbf16>
    tpu.vector_store %arg4[%c0_5, %c0_6], %8 {strides = array<i32>} : memref<32x32xbf16, #tpu.memory_space<vmem>>, vector<32x32xbf16>,
    return
  }
  func.func @transform_0(%arg0: i32) -> (i32, i32) {
    %c0_i32 = arith.constant 0 : i32
    %c0_i32_0 = arith.constant 0 : i32
    return %arg0, %c0_i32 : i32, i32
  }
  func.func @transform_1(%arg0: i32) -> (i32, i32) {
    %c0_i32 = arith.constant 0 : i32
    %c0_i32_0 = arith.constant 0 : i32
    %c0_i32_1 = arith.constant 0 : i32
    return %c0_i32, %c0_i32_0 : i32, i32
  }
  func.func @transform_2(%arg0: i32) -> (i32, i32) {
    %c0_i32 = arith.constant 0 : i32
    %c0_i32_0 = arith.constant 0 : i32
    %c0_i32_1 = arith.constant 0 : i32
    return %c0_i32, %c0_i32_0 : i32, i32
  }
  func.func @transform_3(%arg0: i32) -> (i32, i32) {
    %c0_i32 = arith.constant 0 : i32
    %c0_i32_0 = arith.constant 0 : i32
    return %arg0, %c0_i32 : i32, i32
  }
}

module attributes {stable_mosaic.version = 11 : i64} {
  func.func @_bn_stats_kernel(%arg0: i32, %arg1: memref<32x32xbf16, #tpu.memory_space<vmem>>, %arg2: memref<1x32xf32, #tpu.memory_space<vmem>>, %arg3: memref<1x32xf32, #tpu.memory_space<vmem>>, %arg4: memref<1x32xf32, #tpu.memory_space<vmem>>, %arg5: memref<1x32xf32, #tpu.memory_space<vmem>>, %arg6: memref<1x32xf32, #tpu.memory_space<vmem>>, %arg7: memref<1x32xf32, #tpu.memory_space<vmem>>) attributes {dimension_semantics = [#tpu.dimension_semantics<arbitrary>], iteration_bounds = array<i64: 1>, scalar_prefetch = 0 : i64, scratch_operands = 2 : i64, tpu.core_type = #tpu.core_type<tc>, window_params = [{transform_indices = @transform_0, window_bounds = array<i64: 32, 32>}, {pipeline_mode = #tpu.pipeline_mode<synchronous>, transform_indices = @transform_1, window_bounds = array<i64: 1, 32>}, {pipeline_mode = #tpu.pipeline_mode<synchronous>, transform_indices = @transform_2, window_bounds = array<i64: 1, 32>}, {pipeline_mode = #tpu.pipeline_mode<synchronous>, transform_indices = @transform_3, window_bounds = array<i64: 1, 32>}, {pipeline_mode = #tpu.pipeline_mode<synchronous>, transform_indices = @transform_4, window_bounds = array<i64: 1, 32>}]} {
    %c0_i32 = arith.constant 0 : i32
    %0 = arith.cmpi eq, %arg0, %c0_i32 : i32
    %1 = arith.extui %0 : i1 to i32
    %c0_i32_0 = arith.constant 0 : i32
    %2 = arith.cmpi ne, %1, %c0_i32_0 : i32
    scf.if %2 {
      %cst_13 = arith.constant 0.000000e+00 : f32
      %19 = vector.broadcast %cst_13 : f32 to vector<1x32xf32>
      %c0_14 = arith.constant 0 : index
      %c0_15 = arith.constant 0 : index
      %20 = vector.load %arg6[%c0_14, %c0_15] : memref<1x32xf32, #tpu.memory_space<vmem>>, vector<1x32xf32>
      tpu.vector_store %arg6[%c0_14, %c0_15], %19 {strides = array<i32>} : memref<1x32xf32, #tpu.memory_space<vmem>>, vector<1x32xf32>,
      %cst_16 = arith.constant 0.000000e+00 : f32
      %21 = vector.broadcast %cst_16 : f32 to vector<1x32xf32>
      %c0_17 = arith.constant 0 : index
      %c0_18 = arith.constant 0 : index
      %22 = vector.load %arg7[%c0_17, %c0_18] : memref<1x32xf32, #tpu.memory_space<vmem>>, vector<1x32xf32>
      tpu.vector_store %arg7[%c0_17, %c0_18], %21 {strides = array<i32>} : memref<1x32xf32, #tpu.memory_space<vmem>>, vector<1x32xf32>,
    } else {
    }
    %c0 = arith.constant 0 : index
    %c0_1 = arith.constant 0 : index
    %3 = vector.load %arg1[%c0, %c0_1] : memref<32x32xbf16, #tpu.memory_space<vmem>>, vector<32x32xbf16>
    %4 = arith.extf %3 : vector<32x32xbf16> to vector<32x32xf32>
    %c0_2 = arith.constant 0 : index
    %c0_3 = arith.constant 0 : index
    %5 = vector.load %arg6[%c0_2, %c0_3] : memref<1x32xf32, #tpu.memory_space<vmem>>, vector<1x32xf32>
    %cst = arith.constant dense<0.000000e+00> : vector<32xf32>
    %6 = vector.multi_reduction <add>, %4, %cst [0] : vector<32x32xf32> to vector<32xf32>
    %7 = vector.shape_cast %6 : vector<32xf32> to vector<1x32xf32>
    %8 = arith.addf %5, %7 : vector<1x32xf32>
    %c0_4 = arith.constant 0 : index
    %c0_5 = arith.constant 0 : index
    %9 = vector.load %arg6[%c0_4, %c0_5] : memref<1x32xf32, #tpu.memory_space<vmem>>, vector<1x32xf32>
    tpu.vector_store %arg6[%c0_4, %c0_5], %8 {strides = array<i32>} : memref<1x32xf32, #tpu.memory_space<vmem>>, vector<1x32xf32>,
    %c0_6 = arith.constant 0 : index
    %c0_7 = arith.constant 0 : index
    %10 = vector.load %arg7[%c0_6, %c0_7] : memref<1x32xf32, #tpu.memory_space<vmem>>, vector<1x32xf32>
    %11 = arith.mulf %4, %4 : vector<32x32xf32>
    %cst_8 = arith.constant dense<0.000000e+00> : vector<32xf32>
    %12 = vector.multi_reduction <add>, %11, %cst_8 [0] : vector<32x32xf32> to vector<32xf32>
    %13 = vector.shape_cast %12 : vector<32xf32> to vector<1x32xf32>
    %14 = arith.addf %10, %13 : vector<1x32xf32>
    %c0_9 = arith.constant 0 : index
    %c0_10 = arith.constant 0 : index
    %15 = vector.load %arg7[%c0_9, %c0_10] : memref<1x32xf32, #tpu.memory_space<vmem>>, vector<1x32xf32>
    tpu.vector_store %arg7[%c0_9, %c0_10], %14 {strides = array<i32>} : memref<1x32xf32, #tpu.memory_space<vmem>>, vector<1x32xf32>,
    %c0_i32_11 = arith.constant 0 : i32
    %16 = arith.cmpi eq, %arg0, %c0_i32_11 : i32
    %17 = arith.extui %16 : i1 to i32
    %c0_i32_12 = arith.constant 0 : i32
    %18 = arith.cmpi ne, %17, %c0_i32_12 : i32
    scf.if %18 {
      %c0_13 = arith.constant 0 : index
      %c0_14 = arith.constant 0 : index
      %19 = vector.load %arg6[%c0_13, %c0_14] : memref<1x32xf32, #tpu.memory_space<vmem>>, vector<1x32xf32>
      %cst_15 = arith.constant 3.125000e-02 : f32
      %20 = vector.broadcast %cst_15 : f32 to vector<1x32xf32>
      %21 = arith.mulf %19, %20 : vector<1x32xf32>
      %c0_16 = arith.constant 0 : index
      %c0_17 = arith.constant 0 : index
      %22 = vector.load %arg7[%c0_16, %c0_17] : memref<1x32xf32, #tpu.memory_space<vmem>>, vector<1x32xf32>
      %cst_18 = arith.constant 3.125000e-02 : f32
      %23 = vector.broadcast %cst_18 : f32 to vector<1x32xf32>
      %24 = arith.mulf %22, %23 : vector<1x32xf32>
      %25 = arith.mulf %21, %21 : vector<1x32xf32>
      %26 = arith.subf %24, %25 : vector<1x32xf32>
      %cst_19 = arith.constant 0.000000e+00 : f32
      %27 = vector.broadcast %cst_19 : f32 to vector<1x32xf32>
      %28 = arith.maximumf %26, %27 : vector<1x32xf32>
      %c0_20 = arith.constant 0 : index
      %c0_21 = arith.constant 0 : index
      %29 = vector.load %arg2[%c0_20, %c0_21] : memref<1x32xf32, #tpu.memory_space<vmem>>, vector<1x32xf32>
      %cst_22 = arith.constant 9.99999974E-6 : f32
      %30 = vector.broadcast %cst_22 : f32 to vector<1x32xf32>
      %31 = arith.addf %28, %30 : vector<1x32xf32>
      %32 = math.rsqrt %31 : vector<1x32xf32>
      %33 = arith.mulf %29, %32 : vector<1x32xf32>
      %c0_23 = arith.constant 0 : index
      %c0_24 = arith.constant 0 : index
      %34 = vector.load %arg4[%c0_23, %c0_24] : memref<1x32xf32, #tpu.memory_space<vmem>>, vector<1x32xf32>
      tpu.vector_store %arg4[%c0_23, %c0_24], %33 {strides = array<i32>} : memref<1x32xf32, #tpu.memory_space<vmem>>, vector<1x32xf32>,
      %c0_25 = arith.constant 0 : index
      %c0_26 = arith.constant 0 : index
      %35 = vector.load %arg3[%c0_25, %c0_26] : memref<1x32xf32, #tpu.memory_space<vmem>>, vector<1x32xf32>
      %36 = arith.mulf %21, %33 : vector<1x32xf32>
      %37 = arith.subf %35, %36 : vector<1x32xf32>
      %c0_27 = arith.constant 0 : index
      %c0_28 = arith.constant 0 : index
      %38 = vector.load %arg5[%c0_27, %c0_28] : memref<1x32xf32, #tpu.memory_space<vmem>>, vector<1x32xf32>
      tpu.vector_store %arg5[%c0_27, %c0_28], %37 {strides = array<i32>} : memref<1x32xf32, #tpu.memory_space<vmem>>, vector<1x32xf32>,
    } else {
    }
    return
  }
  func.func @transform_0(%arg0: i32) -> (i32, i32) {
    %c0_i32 = arith.constant 0 : i32
    %c0_i32_0 = arith.constant 0 : i32
    return %arg0, %c0_i32 : i32, i32
  }
  func.func @transform_1(%arg0: i32) -> (i32, i32) {
    %c0_i32 = arith.constant 0 : i32
    %c0_i32_0 = arith.constant 0 : i32
    %c0_i32_1 = arith.constant 0 : i32
    return %c0_i32, %c0_i32_0 : i32, i32
  }
  func.func @transform_2(%arg0: i32) -> (i32, i32) {
    %c0_i32 = arith.constant 0 : i32
    %c0_i32_0 = arith.constant 0 : i32
    %c0_i32_1 = arith.constant 0 : i32
    return %c0_i32, %c0_i32_0 : i32, i32
  }
  func.func @transform_3(%arg0: i32) -> (i32, i32) {
    %c0_i32 = arith.constant 0 : i32
    %c0_i32_0 = arith.constant 0 : i32
    %c0_i32_1 = arith.constant 0 : i32
    return %c0_i32, %c0_i32_0 : i32, i32
  }
  func.func @transform_4(%arg0: i32) -> (i32, i32) {
    %c0_i32 = arith.constant 0 : i32
    %c0_i32_0 = arith.constant 0 : i32
    %c0_i32_1 = arith.constant 0 : i32
    return %c0_i32, %c0_i32_0 : i32, i32
  }
}

module attributes {stable_mosaic.version = 11 : i64} {
  func.func @_mm_kernel(%arg0: i32, %arg1: i32, %arg2: i32, %arg3: i32, %arg4: memref<1x16x256xbf16, #tpu.memory_space<vmem>>, %arg5: memref<1x256x128xbf16, #tpu.memory_space<vmem>>, %arg6: memref<1x128xf32, #tpu.memory_space<vmem>>, %arg7: memref<1x16x128xbf16, #tpu.memory_space<vmem>>, %arg8: memref<16x128xf32, #tpu.memory_space<vmem>>) attributes {dimension_semantics = [#tpu.dimension_semantics<parallel>, #tpu.dimension_semantics<parallel>, #tpu.dimension_semantics<parallel>, #tpu.dimension_semantics<arbitrary>], iteration_bounds = array<i64: 1, 2, 1, 1>, scalar_prefetch = 0 : i64, scratch_operands = 1 : i64, tpu.core_type = #tpu.core_type<tc>, window_params = [{transform_indices = @transform_0, window_bounds = array<i64: 1, 16, 256>}, {transform_indices = @transform_1, window_bounds = array<i64: 1, 256, 128>}, {transform_indices = @transform_2, window_bounds = array<i64: 1, 128>}, {transform_indices = @transform_3, window_bounds = array<i64: 1, 16, 128>}]} {
    %c0_i32 = arith.constant 0 : i32
    %0 = arith.cmpi eq, %arg3, %c0_i32 : i32
    %1 = arith.extui %0 : i1 to i32
    %c0_i32_0 = arith.constant 0 : i32
    %2 = arith.cmpi ne, %1, %c0_i32_0 : i32
    scf.if %2 {
      %cst_12 = arith.constant 0.000000e+00 : f32
      %14 = vector.broadcast %cst_12 : f32 to vector<16x128xf32>
      %c0_13 = arith.constant 0 : index
      %c0_14 = arith.constant 0 : index
      %15 = vector.load %arg8[%c0_13, %c0_14] : memref<16x128xf32, #tpu.memory_space<vmem>>, vector<16x128xf32>
      tpu.vector_store %arg8[%c0_13, %c0_14], %14 {strides = array<i32>} : memref<16x128xf32, #tpu.memory_space<vmem>>, vector<16x128xf32>,
    } else {
    }
    %c0 = arith.constant 0 : index
    %c0_1 = arith.constant 0 : index
    %3 = vector.load %arg8[%c0, %c0_1] : memref<16x128xf32, #tpu.memory_space<vmem>>, vector<16x128xf32>
    %c0_2 = arith.constant 0 : index
    %c0_3 = arith.constant 0 : index
    %c0_4 = arith.constant 0 : index
    %4 = vector.load %arg4[%c0_2, %c0_3, %c0_4] : memref<1x16x256xbf16, #tpu.memory_space<vmem>>, vector<1x16x256xbf16>
    %5 = vector.shape_cast %4 : vector<1x16x256xbf16> to vector<16x256xbf16>
    %c0_5 = arith.constant 0 : index
    %c0_6 = arith.constant 0 : index
    %c0_7 = arith.constant 0 : index
    %6 = vector.load %arg5[%c0_5, %c0_6, %c0_7] : memref<1x256x128xbf16, #tpu.memory_space<vmem>>, vector<1x256x128xbf16>
    %7 = vector.shape_cast %6 : vector<1x256x128xbf16> to vector<256x128xbf16>
    %cst = arith.constant dense<0.000000e+00> : vector<16x128xf32>
    %8 = tpu.matmul %5, %7, %cst {dimension_numbers = #tpu.dot_dimension_numbers<[1], [0], [0], [1], [0, 0, 1, 1], [], []>} : vector<16x256xbf16>, vector<256x128xbf16>, vector<16x128xf32> -> vector<16x128xf32>
    %9 = arith.addf %3, %8 : vector<16x128xf32>
    %c0_8 = arith.constant 0 : index
    %c0_9 = arith.constant 0 : index
    %10 = vector.load %arg8[%c0_8, %c0_9] : memref<16x128xf32, #tpu.memory_space<vmem>>, vector<16x128xf32>
    tpu.vector_store %arg8[%c0_8, %c0_9], %9 {strides = array<i32>} : memref<16x128xf32, #tpu.memory_space<vmem>>, vector<16x128xf32>,
    %c0_i32_10 = arith.constant 0 : i32
    %11 = arith.cmpi eq, %arg3, %c0_i32_10 : i32
    %12 = arith.extui %11 : i1 to i32
    %c0_i32_11 = arith.constant 0 : i32
    %13 = arith.cmpi ne, %12, %c0_i32_11 : i32
    scf.if %13 {
      %c0_12 = arith.constant 0 : index
      %c0_13 = arith.constant 0 : index
      %14 = vector.load %arg8[%c0_12, %c0_13] : memref<16x128xf32, #tpu.memory_space<vmem>>, vector<16x128xf32>
      %c0_14 = arith.constant 0 : index
      %c0_15 = arith.constant 0 : index
      %15 = vector.load %arg6[%c0_14, %c0_15] : memref<1x128xf32, #tpu.memory_space<vmem>>, vector<1x128xf32>
      %16 = vector.broadcast %15 : vector<1x128xf32> to vector<16x128xf32>
      %17 = arith.addf %14, %16 : vector<16x128xf32>
      %18 = arith.truncf %17 : vector<16x128xf32> to vector<16x128xbf16>
      %c0_16 = arith.constant 0 : index
      %c0_17 = arith.constant 0 : index
      %c0_18 = arith.constant 0 : index
      %19 = vector.load %arg7[%c0_16, %c0_17, %c0_18] : memref<1x16x128xbf16, #tpu.memory_space<vmem>>, vector<1x16x128xbf16>
      %20 = vector.shape_cast %19 : vector<1x16x128xbf16> to vector<16x128xbf16>
      %21 = vector.shape_cast %18 : vector<16x128xbf16> to vector<1x16x128xbf16>
      tpu.vector_store %arg7[%c0_16, %c0_17, %c0_18], %21 {strides = array<i32>} : memref<1x16x128xbf16, #tpu.memory_space<vmem>>, vector<1x16x128xbf16>,
    } else {
    }
    return
  }
  func.func @transform_0(%arg0: i32, %arg1: i32, %arg2: i32, %arg3: i32) -> (i32, i32, i32) {
    %c0_i32 = arith.constant 0 : i32
    return %arg0, %arg1, %arg3 : i32, i32, i32
  }
  func.func @transform_1(%arg0: i32, %arg1: i32, %arg2: i32, %arg3: i32) -> (i32, i32, i32) {
    %c0_i32 = arith.constant 0 : i32
    return %arg0, %arg3, %arg2 : i32, i32, i32
  }
  func.func @transform_2(%arg0: i32, %arg1: i32, %arg2: i32, %arg3: i32) -> (i32, i32) {
    %c0_i32 = arith.constant 0 : i32
    %c0_i32_0 = arith.constant 0 : i32
    return %c0_i32, %arg2 : i32, i32
  }
  func.func @transform_3(%arg0: i32, %arg1: i32, %arg2: i32, %arg3: i32) -> (i32, i32, i32) {
    %c0_i32 = arith.constant 0 : i32
    return %arg0, %arg1, %arg2 : i32, i32, i32
  }
}

module attributes {stable_mosaic.version = 11 : i64} {
  func.func @_mm_kernel(%arg0: i32, %arg1: i32, %arg2: i32, %arg3: i32, %arg4: memref<1x8x256xbf16, #tpu.memory_space<vmem>>, %arg5: memref<1x256x128xbf16, #tpu.memory_space<vmem>>, %arg6: memref<1x128xf32, #tpu.memory_space<vmem>>, %arg7: memref<1x8x128xbf16, #tpu.memory_space<vmem>>, %arg8: memref<8x128xf32, #tpu.memory_space<vmem>>) attributes {dimension_semantics = [#tpu.dimension_semantics<parallel>, #tpu.dimension_semantics<parallel>, #tpu.dimension_semantics<parallel>, #tpu.dimension_semantics<arbitrary>], iteration_bounds = array<i64: 1, 1, 1, 2>, scalar_prefetch = 0 : i64, scratch_operands = 1 : i64, tpu.core_type = #tpu.core_type<tc>, window_params = [{transform_indices = @transform_0, window_bounds = array<i64: 1, 8, 256>}, {transform_indices = @transform_1, window_bounds = array<i64: 1, 256, 128>}, {transform_indices = @transform_2, window_bounds = array<i64: 1, 128>}, {transform_indices = @transform_3, window_bounds = array<i64: 1, 8, 128>}]} {
    %c0_i32 = arith.constant 0 : i32
    %0 = arith.cmpi eq, %arg3, %c0_i32 : i32
    %1 = arith.extui %0 : i1 to i32
    %c0_i32_0 = arith.constant 0 : i32
    %2 = arith.cmpi ne, %1, %c0_i32_0 : i32
    scf.if %2 {
      %cst_11 = arith.constant 0.000000e+00 : f32
      %14 = vector.broadcast %cst_11 : f32 to vector<8x128xf32>
      %c0_12 = arith.constant 0 : index
      %c0_13 = arith.constant 0 : index
      %15 = vector.load %arg8[%c0_12, %c0_13] : memref<8x128xf32, #tpu.memory_space<vmem>>, vector<8x128xf32>
      tpu.vector_store %arg8[%c0_12, %c0_13], %14 {strides = array<i32>} : memref<8x128xf32, #tpu.memory_space<vmem>>, vector<8x128xf32>,
    } else {
    }
    %c0 = arith.constant 0 : index
    %c0_1 = arith.constant 0 : index
    %3 = vector.load %arg8[%c0, %c0_1] : memref<8x128xf32, #tpu.memory_space<vmem>>, vector<8x128xf32>
    %c0_2 = arith.constant 0 : index
    %c0_3 = arith.constant 0 : index
    %c0_4 = arith.constant 0 : index
    %4 = vector.load %arg4[%c0_2, %c0_3, %c0_4] : memref<1x8x256xbf16, #tpu.memory_space<vmem>>, vector<1x8x256xbf16>
    %5 = vector.shape_cast %4 : vector<1x8x256xbf16> to vector<8x256xbf16>
    %c0_5 = arith.constant 0 : index
    %c0_6 = arith.constant 0 : index
    %c0_7 = arith.constant 0 : index
    %6 = vector.load %arg5[%c0_5, %c0_6, %c0_7] : memref<1x256x128xbf16, #tpu.memory_space<vmem>>, vector<1x256x128xbf16>
    %7 = vector.shape_cast %6 : vector<1x256x128xbf16> to vector<256x128xbf16>
    %cst = arith.constant dense<0.000000e+00> : vector<8x128xf32>
    %8 = tpu.matmul %5, %7, %cst {dimension_numbers = #tpu.dot_dimension_numbers<[1], [0], [0], [1], [0, 0, 1, 1], [], []>} : vector<8x256xbf16>, vector<256x128xbf16>, vector<8x128xf32> -> vector<8x128xf32>
    %9 = arith.addf %3, %8 : vector<8x128xf32>
    %c0_8 = arith.constant 0 : index
    %c0_9 = arith.constant 0 : index
    %10 = vector.load %arg8[%c0_8, %c0_9] : memref<8x128xf32, #tpu.memory_space<vmem>>, vector<8x128xf32>
    tpu.vector_store %arg8[%c0_8, %c0_9], %9 {strides = array<i32>} : memref<8x128xf32, #tpu.memory_space<vmem>>, vector<8x128xf32>,
    %c1_i32 = arith.constant 1 : i32
    %11 = arith.cmpi eq, %arg3, %c1_i32 : i32
    %12 = arith.extui %11 : i1 to i32
    %c0_i32_10 = arith.constant 0 : i32
    %13 = arith.cmpi ne, %12, %c0_i32_10 : i32
    scf.if %13 {
      %c0_11 = arith.constant 0 : index
      %c0_12 = arith.constant 0 : index
      %14 = vector.load %arg8[%c0_11, %c0_12] : memref<8x128xf32, #tpu.memory_space<vmem>>, vector<8x128xf32>
      %c0_13 = arith.constant 0 : index
      %c0_14 = arith.constant 0 : index
      %15 = vector.load %arg6[%c0_13, %c0_14] : memref<1x128xf32, #tpu.memory_space<vmem>>, vector<1x128xf32>
      %16 = vector.broadcast %15 : vector<1x128xf32> to vector<8x128xf32>
      %17 = arith.addf %14, %16 : vector<8x128xf32>
      %18 = arith.truncf %17 : vector<8x128xf32> to vector<8x128xbf16>
      %c0_15 = arith.constant 0 : index
      %c0_16 = arith.constant 0 : index
      %c0_17 = arith.constant 0 : index
      %19 = vector.load %arg7[%c0_15, %c0_16, %c0_17] : memref<1x8x128xbf16, #tpu.memory_space<vmem>>, vector<1x8x128xbf16>
      %20 = vector.shape_cast %19 : vector<1x8x128xbf16> to vector<8x128xbf16>
      %21 = vector.shape_cast %18 : vector<8x128xbf16> to vector<1x8x128xbf16>
      tpu.vector_store %arg7[%c0_15, %c0_16, %c0_17], %21 {strides = array<i32>} : memref<1x8x128xbf16, #tpu.memory_space<vmem>>, vector<1x8x128xbf16>,
    } else {
    }
    return
  }
  func.func @transform_0(%arg0: i32, %arg1: i32, %arg2: i32, %arg3: i32) -> (i32, i32, i32) {
    %c0_i32 = arith.constant 0 : i32
    return %arg0, %arg1, %arg3 : i32, i32, i32
  }
  func.func @transform_1(%arg0: i32, %arg1: i32, %arg2: i32, %arg3: i32) -> (i32, i32, i32) {
    %c0_i32 = arith.constant 0 : i32
    return %arg0, %arg3, %arg2 : i32, i32, i32
  }
  func.func @transform_2(%arg0: i32, %arg1: i32, %arg2: i32, %arg3: i32) -> (i32, i32) {
    %c0_i32 = arith.constant 0 : i32
    %c0_i32_0 = arith.constant 0 : i32
    return %c0_i32, %arg2 : i32, i32
  }
  func.func @transform_3(%arg0: i32, %arg1: i32, %arg2: i32, %arg3: i32) -> (i32, i32, i32) {
    %c0_i32 = arith.constant 0 : i32
    return %arg0, %arg1, %arg2 : i32, i32, i32
  }
}

module attributes {stable_mosaic.version = 11 : i64} {
  func.func @_bn_stats_kernel(%arg0: i32, %arg1: memref<8x64xbf16, #tpu.memory_space<vmem>>, %arg2: memref<1x64xf32, #tpu.memory_space<vmem>>, %arg3: memref<1x64xf32, #tpu.memory_space<vmem>>, %arg4: memref<1x64xf32, #tpu.memory_space<vmem>>, %arg5: memref<1x64xf32, #tpu.memory_space<vmem>>, %arg6: memref<1x64xf32, #tpu.memory_space<vmem>>, %arg7: memref<1x64xf32, #tpu.memory_space<vmem>>) attributes {dimension_semantics = [#tpu.dimension_semantics<arbitrary>], iteration_bounds = array<i64: 1>, scalar_prefetch = 0 : i64, scratch_operands = 2 : i64, tpu.core_type = #tpu.core_type<tc>, window_params = [{transform_indices = @transform_0, window_bounds = array<i64: 8, 64>}, {pipeline_mode = #tpu.pipeline_mode<synchronous>, transform_indices = @transform_1, window_bounds = array<i64: 1, 64>}, {pipeline_mode = #tpu.pipeline_mode<synchronous>, transform_indices = @transform_2, window_bounds = array<i64: 1, 64>}, {pipeline_mode = #tpu.pipeline_mode<synchronous>, transform_indices = @transform_3, window_bounds = array<i64: 1, 64>}, {pipeline_mode = #tpu.pipeline_mode<synchronous>, transform_indices = @transform_4, window_bounds = array<i64: 1, 64>}]} {
    %c0_i32 = arith.constant 0 : i32
    %0 = arith.cmpi eq, %arg0, %c0_i32 : i32
    %1 = arith.extui %0 : i1 to i32
    %c0_i32_0 = arith.constant 0 : i32
    %2 = arith.cmpi ne, %1, %c0_i32_0 : i32
    scf.if %2 {
      %cst_13 = arith.constant 0.000000e+00 : f32
      %19 = vector.broadcast %cst_13 : f32 to vector<1x64xf32>
      %c0_14 = arith.constant 0 : index
      %c0_15 = arith.constant 0 : index
      %20 = vector.load %arg6[%c0_14, %c0_15] : memref<1x64xf32, #tpu.memory_space<vmem>>, vector<1x64xf32>
      tpu.vector_store %arg6[%c0_14, %c0_15], %19 {strides = array<i32>} : memref<1x64xf32, #tpu.memory_space<vmem>>, vector<1x64xf32>,
      %cst_16 = arith.constant 0.000000e+00 : f32
      %21 = vector.broadcast %cst_16 : f32 to vector<1x64xf32>
      %c0_17 = arith.constant 0 : index
      %c0_18 = arith.constant 0 : index
      %22 = vector.load %arg7[%c0_17, %c0_18] : memref<1x64xf32, #tpu.memory_space<vmem>>, vector<1x64xf32>
      tpu.vector_store %arg7[%c0_17, %c0_18], %21 {strides = array<i32>} : memref<1x64xf32, #tpu.memory_space<vmem>>, vector<1x64xf32>,
    } else {
    }
    %c0 = arith.constant 0 : index
    %c0_1 = arith.constant 0 : index
    %3 = vector.load %arg1[%c0, %c0_1] : memref<8x64xbf16, #tpu.memory_space<vmem>>, vector<8x64xbf16>
    %4 = arith.extf %3 : vector<8x64xbf16> to vector<8x64xf32>
    %c0_2 = arith.constant 0 : index
    %c0_3 = arith.constant 0 : index
    %5 = vector.load %arg6[%c0_2, %c0_3] : memref<1x64xf32, #tpu.memory_space<vmem>>, vector<1x64xf32>
    %cst = arith.constant dense<0.000000e+00> : vector<64xf32>
    %6 = vector.multi_reduction <add>, %4, %cst [0] : vector<8x64xf32> to vector<64xf32>
    %7 = vector.shape_cast %6 : vector<64xf32> to vector<1x64xf32>
    %8 = arith.addf %5, %7 : vector<1x64xf32>
    %c0_4 = arith.constant 0 : index
    %c0_5 = arith.constant 0 : index
    %9 = vector.load %arg6[%c0_4, %c0_5] : memref<1x64xf32, #tpu.memory_space<vmem>>, vector<1x64xf32>
    tpu.vector_store %arg6[%c0_4, %c0_5], %8 {strides = array<i32>} : memref<1x64xf32, #tpu.memory_space<vmem>>, vector<1x64xf32>,
    %c0_6 = arith.constant 0 : index
    %c0_7 = arith.constant 0 : index
    %10 = vector.load %arg7[%c0_6, %c0_7] : memref<1x64xf32, #tpu.memory_space<vmem>>, vector<1x64xf32>
    %11 = arith.mulf %4, %4 : vector<8x64xf32>
    %cst_8 = arith.constant dense<0.000000e+00> : vector<64xf32>
    %12 = vector.multi_reduction <add>, %11, %cst_8 [0] : vector<8x64xf32> to vector<64xf32>
    %13 = vector.shape_cast %12 : vector<64xf32> to vector<1x64xf32>
    %14 = arith.addf %10, %13 : vector<1x64xf32>
    %c0_9 = arith.constant 0 : index
    %c0_10 = arith.constant 0 : index
    %15 = vector.load %arg7[%c0_9, %c0_10] : memref<1x64xf32, #tpu.memory_space<vmem>>, vector<1x64xf32>
    tpu.vector_store %arg7[%c0_9, %c0_10], %14 {strides = array<i32>} : memref<1x64xf32, #tpu.memory_space<vmem>>, vector<1x64xf32>,
    %c0_i32_11 = arith.constant 0 : i32
    %16 = arith.cmpi eq, %arg0, %c0_i32_11 : i32
    %17 = arith.extui %16 : i1 to i32
    %c0_i32_12 = arith.constant 0 : i32
    %18 = arith.cmpi ne, %17, %c0_i32_12 : i32
    scf.if %18 {
      %c0_13 = arith.constant 0 : index
      %c0_14 = arith.constant 0 : index
      %19 = vector.load %arg6[%c0_13, %c0_14] : memref<1x64xf32, #tpu.memory_space<vmem>>, vector<1x64xf32>
      %cst_15 = arith.constant 1.250000e-01 : f32
      %20 = vector.broadcast %cst_15 : f32 to vector<1x64xf32>
      %21 = arith.mulf %19, %20 : vector<1x64xf32>
      %c0_16 = arith.constant 0 : index
      %c0_17 = arith.constant 0 : index
      %22 = vector.load %arg7[%c0_16, %c0_17] : memref<1x64xf32, #tpu.memory_space<vmem>>, vector<1x64xf32>
      %cst_18 = arith.constant 1.250000e-01 : f32
      %23 = vector.broadcast %cst_18 : f32 to vector<1x64xf32>
      %24 = arith.mulf %22, %23 : vector<1x64xf32>
      %25 = arith.mulf %21, %21 : vector<1x64xf32>
      %26 = arith.subf %24, %25 : vector<1x64xf32>
      %cst_19 = arith.constant 0.000000e+00 : f32
      %27 = vector.broadcast %cst_19 : f32 to vector<1x64xf32>
      %28 = arith.maximumf %26, %27 : vector<1x64xf32>
      %c0_20 = arith.constant 0 : index
      %c0_21 = arith.constant 0 : index
      %29 = vector.load %arg2[%c0_20, %c0_21] : memref<1x64xf32, #tpu.memory_space<vmem>>, vector<1x64xf32>
      %cst_22 = arith.constant 9.99999974E-6 : f32
      %30 = vector.broadcast %cst_22 : f32 to vector<1x64xf32>
      %31 = arith.addf %28, %30 : vector<1x64xf32>
      %32 = math.rsqrt %31 : vector<1x64xf32>
      %33 = arith.mulf %29, %32 : vector<1x64xf32>
      %c0_23 = arith.constant 0 : index
      %c0_24 = arith.constant 0 : index
      %34 = vector.load %arg4[%c0_23, %c0_24] : memref<1x64xf32, #tpu.memory_space<vmem>>, vector<1x64xf32>
      tpu.vector_store %arg4[%c0_23, %c0_24], %33 {strides = array<i32>} : memref<1x64xf32, #tpu.memory_space<vmem>>, vector<1x64xf32>,
      %c0_25 = arith.constant 0 : index
      %c0_26 = arith.constant 0 : index
      %35 = vector.load %arg3[%c0_25, %c0_26] : memref<1x64xf32, #tpu.memory_space<vmem>>, vector<1x64xf32>
      %36 = arith.mulf %21, %33 : vector<1x64xf32>
      %37 = arith.subf %35, %36 : vector<1x64xf32>
      %c0_27 = arith.constant 0 : index
      %c0_28 = arith.constant 0 : index
      %38 = vector.load %arg5[%c0_27, %c0_28] : memref<1x64xf32, #tpu.memory_space<vmem>>, vector<1x64xf32>
      tpu.vector_store %arg5[%c0_27, %c0_28], %37 {strides = array<i32>} : memref<1x64xf32, #tpu.memory_space<vmem>>, vector<1x64xf32>,
    } else {
    }
    return
  }
  func.func @transform_0(%arg0: i32) -> (i32, i32) {
    %c0_i32 = arith.constant 0 : i32
    %c0_i32_0 = arith.constant 0 : i32
    return %arg0, %c0_i32 : i32, i32
  }
  func.func @transform_1(%arg0: i32) -> (i32, i32) {
    %c0_i32 = arith.constant 0 : i32
    %c0_i32_0 = arith.constant 0 : i32
    %c0_i32_1 = arith.constant 0 : i32
    return %c0_i32, %c0_i32_0 : i32, i32
  }
  func.func @transform_2(%arg0: i32) -> (i32, i32) {
    %c0_i32 = arith.constant 0 : i32
    %c0_i32_0 = arith.constant 0 : i32
    %c0_i32_1 = arith.constant 0 : i32
    return %c0_i32, %c0_i32_0 : i32, i32
  }
  func.func @transform_3(%arg0: i32) -> (i32, i32) {
    %c0_i32 = arith.constant 0 : i32
    %c0_i32_0 = arith.constant 0 : i32
    %c0_i32_1 = arith.constant 0 : i32
    return %c0_i32, %c0_i32_0 : i32, i32
  }
  func.func @transform_4(%arg0: i32) -> (i32, i32) {
    %c0_i32 = arith.constant 0 : i32
    %c0_i32_0 = arith.constant 0 : i32
    %c0_i32_1 = arith.constant 0 : i32
    return %c0_i32, %c0_i32_0 : i32, i32
  }
}

module attributes {stable_mosaic.version = 11 : i64} {
  func.func @_bn_apply_kernel(%arg0: i32, %arg1: memref<8x64xbf16, #tpu.memory_space<vmem>>, %arg2: memref<1x64xf32, #tpu.memory_space<vmem>>, %arg3: memref<1x64xf32, #tpu.memory_space<vmem>>, %arg4: memref<8x64xbf16, #tpu.memory_space<vmem>>) attributes {dimension_semantics = [#tpu.dimension_semantics<parallel>], iteration_bounds = array<i64: 1>, scalar_prefetch = 0 : i64, scratch_operands = 0 : i64, tpu.core_type = #tpu.core_type<tc>, window_params = [{transform_indices = @transform_0, window_bounds = array<i64: 8, 64>}, {pipeline_mode = #tpu.pipeline_mode<synchronous>, transform_indices = @transform_1, window_bounds = array<i64: 1, 64>}, {pipeline_mode = #tpu.pipeline_mode<synchronous>, transform_indices = @transform_2, window_bounds = array<i64: 1, 64>}, {transform_indices = @transform_3, window_bounds = array<i64: 8, 64>}]} {
    %c0 = arith.constant 0 : index
    %c0_0 = arith.constant 0 : index
    %0 = vector.load %arg1[%c0, %c0_0] : memref<8x64xbf16, #tpu.memory_space<vmem>>, vector<8x64xbf16>
    %1 = arith.extf %0 : vector<8x64xbf16> to vector<8x64xf32>
    %c0_1 = arith.constant 0 : index
    %c0_2 = arith.constant 0 : index
    %2 = vector.load %arg2[%c0_1, %c0_2] : memref<1x64xf32, #tpu.memory_space<vmem>>, vector<1x64xf32>
    %3 = vector.broadcast %2 : vector<1x64xf32> to vector<8x64xf32>
    %4 = arith.mulf %1, %3 : vector<8x64xf32>
    %c0_3 = arith.constant 0 : index
    %c0_4 = arith.constant 0 : index
    %5 = vector.load %arg3[%c0_3, %c0_4] : memref<1x64xf32, #tpu.memory_space<vmem>>, vector<1x64xf32>
    %6 = vector.broadcast %5 : vector<1x64xf32> to vector<8x64xf32>
    %7 = arith.addf %4, %6 : vector<8x64xf32>
    %8 = arith.truncf %7 : vector<8x64xf32> to vector<8x64xbf16>
    %c0_5 = arith.constant 0 : index
    %c0_6 = arith.constant 0 : index
    %9 = vector.load %arg4[%c0_5, %c0_6] : memref<8x64xbf16, #tpu.memory_space<vmem>>, vector<8x64xbf16>
    tpu.vector_store %arg4[%c0_5, %c0_6], %8 {strides = array<i32>} : memref<8x64xbf16, #tpu.memory_space<vmem>>, vector<8x64xbf16>,
    return
  }
  func.func @transform_0(%arg0: i32) -> (i32, i32) {
    %c0_i32 = arith.constant 0 : i32
    %c0_i32_0 = arith.constant 0 : i32
    return %arg0, %c0_i32 : i32, i32
  }
  func.func @transform_1(%arg0: i32) -> (i32, i32) {
    %c0_i32 = arith.constant 0 : i32
    %c0_i32_0 = arith.constant 0 : i32
    %c0_i32_1 = arith.constant 0 : i32
    return %c0_i32, %c0_i32_0 : i32, i32
  }
  func.func @transform_2(%arg0: i32) -> (i32, i32) {
    %c0_i32 = arith.constant 0 : i32
    %c0_i32_0 = arith.constant 0 : i32
    %c0_i32_1 = arith.constant 0 : i32
    return %c0_i32, %c0_i32_0 : i32, i32
  }
  func.func @transform_3(%arg0: i32) -> (i32, i32) {
    %c0_i32 = arith.constant 0 : i32
    %c0_i32_0 = arith.constant 0 : i32
    return %arg0, %c0_i32 : i32, i32
  }
}

module attributes {stable_mosaic.version = 11 : i64} {
  func.func @_mm_kernel(%arg0: i32, %arg1: i32, %arg2: i32, %arg3: i32, %arg4: memref<1x2x512xbf16, #tpu.memory_space<vmem>>, %arg5: memref<1x512x128xbf16, #tpu.memory_space<vmem>>, %arg6: memref<1x128xf32, #tpu.memory_space<vmem>>, %arg7: memref<1x2x128xbf16, #tpu.memory_space<vmem>>, %arg8: memref<2x128xf32, #tpu.memory_space<vmem>>) attributes {dimension_semantics = [#tpu.dimension_semantics<parallel>, #tpu.dimension_semantics<parallel>, #tpu.dimension_semantics<parallel>, #tpu.dimension_semantics<arbitrary>], iteration_bounds = array<i64: 1, 1, 1, 2>, scalar_prefetch = 0 : i64, scratch_operands = 1 : i64, tpu.core_type = #tpu.core_type<tc>, window_params = [{transform_indices = @transform_0, window_bounds = array<i64: 1, 2, 512>}, {transform_indices = @transform_1, window_bounds = array<i64: 1, 512, 128>}, {transform_indices = @transform_2, window_bounds = array<i64: 1, 128>}, {transform_indices = @transform_3, window_bounds = array<i64: 1, 2, 128>}]} {
    %c0_i32 = arith.constant 0 : i32
    %0 = arith.cmpi eq, %arg3, %c0_i32 : i32
    %1 = arith.extui %0 : i1 to i32
    %c0_i32_0 = arith.constant 0 : i32
    %2 = arith.cmpi ne, %1, %c0_i32_0 : i32
    scf.if %2 {
      %cst_11 = arith.constant 0.000000e+00 : f32
      %14 = vector.broadcast %cst_11 : f32 to vector<2x128xf32>
      %c0_12 = arith.constant 0 : index
      %c0_13 = arith.constant 0 : index
      %15 = vector.load %arg8[%c0_12, %c0_13] : memref<2x128xf32, #tpu.memory_space<vmem>>, vector<2x128xf32>
      tpu.vector_store %arg8[%c0_12, %c0_13], %14 {strides = array<i32>} : memref<2x128xf32, #tpu.memory_space<vmem>>, vector<2x128xf32>,
    } else {
    }
    %c0 = arith.constant 0 : index
    %c0_1 = arith.constant 0 : index
    %3 = vector.load %arg8[%c0, %c0_1] : memref<2x128xf32, #tpu.memory_space<vmem>>, vector<2x128xf32>
    %c0_2 = arith.constant 0 : index
    %c0_3 = arith.constant 0 : index
    %c0_4 = arith.constant 0 : index
    %4 = vector.load %arg4[%c0_2, %c0_3, %c0_4] : memref<1x2x512xbf16, #tpu.memory_space<vmem>>, vector<1x2x512xbf16>
    %5 = vector.shape_cast %4 : vector<1x2x512xbf16> to vector<2x512xbf16>
    %c0_5 = arith.constant 0 : index
    %c0_6 = arith.constant 0 : index
    %c0_7 = arith.constant 0 : index
    %6 = vector.load %arg5[%c0_5, %c0_6, %c0_7] : memref<1x512x128xbf16, #tpu.memory_space<vmem>>, vector<1x512x128xbf16>
    %7 = vector.shape_cast %6 : vector<1x512x128xbf16> to vector<512x128xbf16>
    %cst = arith.constant dense<0.000000e+00> : vector<2x128xf32>
    %8 = tpu.matmul %5, %7, %cst {dimension_numbers = #tpu.dot_dimension_numbers<[1], [0], [0], [1], [0, 0, 1, 1], [], []>} : vector<2x512xbf16>, vector<512x128xbf16>, vector<2x128xf32> -> vector<2x128xf32>
    %9 = arith.addf %3, %8 : vector<2x128xf32>
    %c0_8 = arith.constant 0 : index
    %c0_9 = arith.constant 0 : index
    %10 = vector.load %arg8[%c0_8, %c0_9] : memref<2x128xf32, #tpu.memory_space<vmem>>, vector<2x128xf32>
    tpu.vector_store %arg8[%c0_8, %c0_9], %9 {strides = array<i32>} : memref<2x128xf32, #tpu.memory_space<vmem>>, vector<2x128xf32>,
    %c1_i32 = arith.constant 1 : i32
    %11 = arith.cmpi eq, %arg3, %c1_i32 : i32
    %12 = arith.extui %11 : i1 to i32
    %c0_i32_10 = arith.constant 0 : i32
    %13 = arith.cmpi ne, %12, %c0_i32_10 : i32
    scf.if %13 {
      %c0_11 = arith.constant 0 : index
      %c0_12 = arith.constant 0 : index
      %14 = vector.load %arg8[%c0_11, %c0_12] : memref<2x128xf32, #tpu.memory_space<vmem>>, vector<2x128xf32>
      %c0_13 = arith.constant 0 : index
      %c0_14 = arith.constant 0 : index
      %15 = vector.load %arg6[%c0_13, %c0_14] : memref<1x128xf32, #tpu.memory_space<vmem>>, vector<1x128xf32>
      %16 = vector.broadcast %15 : vector<1x128xf32> to vector<2x128xf32>
      %17 = arith.addf %14, %16 : vector<2x128xf32>
      %18 = arith.truncf %17 : vector<2x128xf32> to vector<2x128xbf16>
      %c0_15 = arith.constant 0 : index
      %c0_16 = arith.constant 0 : index
      %c0_17 = arith.constant 0 : index
      %19 = vector.load %arg7[%c0_15, %c0_16, %c0_17] : memref<1x2x128xbf16, #tpu.memory_space<vmem>>, vector<1x2x128xbf16>
      %20 = vector.shape_cast %19 : vector<1x2x128xbf16> to vector<2x128xbf16>
      %21 = vector.shape_cast %18 : vector<2x128xbf16> to vector<1x2x128xbf16>
      tpu.vector_store %arg7[%c0_15, %c0_16, %c0_17], %21 {strides = array<i32>} : memref<1x2x128xbf16, #tpu.memory_space<vmem>>, vector<1x2x128xbf16>,
    } else {
    }
    return
  }
  func.func @transform_0(%arg0: i32, %arg1: i32, %arg2: i32, %arg3: i32) -> (i32, i32, i32) {
    %c0_i32 = arith.constant 0 : i32
    return %arg0, %arg1, %arg3 : i32, i32, i32
  }
  func.func @transform_1(%arg0: i32, %arg1: i32, %arg2: i32, %arg3: i32) -> (i32, i32, i32) {
    %c0_i32 = arith.constant 0 : i32
    return %arg0, %arg3, %arg2 : i32, i32, i32
  }
  func.func @transform_2(%arg0: i32, %arg1: i32, %arg2: i32, %arg3: i32) -> (i32, i32) {
    %c0_i32 = arith.constant 0 : i32
    %c0_i32_0 = arith.constant 0 : i32
    return %c0_i32, %arg2 : i32, i32
  }
  func.func @transform_3(%arg0: i32, %arg1: i32, %arg2: i32, %arg3: i32) -> (i32, i32, i32) {
    %c0_i32 = arith.constant 0 : i32
    return %arg0, %arg1, %arg2 : i32, i32, i32
  }
}

module attributes {stable_mosaic.version = 11 : i64} {
  func.func @_bn_apply_concat_kernel(%arg0: i32, %arg1: memref<8x64xbf16, #tpu.memory_space<vmem>>, %arg2: memref<1x64xf32, #tpu.memory_space<vmem>>, %arg3: memref<1x64xf32, #tpu.memory_space<vmem>>, %arg4: memref<8x64xbf16, #tpu.memory_space<vmem>>, %arg5: memref<8x128xbf16, #tpu.memory_space<vmem>>) attributes {dimension_semantics = [#tpu.dimension_semantics<parallel>], iteration_bounds = array<i64: 1>, scalar_prefetch = 0 : i64, scratch_operands = 0 : i64, tpu.core_type = #tpu.core_type<tc>, window_params = [{transform_indices = @transform_0, window_bounds = array<i64: 8, 64>}, {pipeline_mode = #tpu.pipeline_mode<synchronous>, transform_indices = @transform_1, window_bounds = array<i64: 1, 64>}, {pipeline_mode = #tpu.pipeline_mode<synchronous>, transform_indices = @transform_2, window_bounds = array<i64: 1, 64>}, {transform_indices = @transform_3, window_bounds = array<i64: 8, 64>}, {transform_indices = @transform_4, window_bounds = array<i64: 8, 128>}]} {
    %c0 = arith.constant 0 : index
    %c0_0 = arith.constant 0 : index
    %0 = vector.load %arg1[%c0, %c0_0] : memref<8x64xbf16, #tpu.memory_space<vmem>>, vector<8x64xbf16>
    %1 = arith.extf %0 : vector<8x64xbf16> to vector<8x64xf32>
    %c0_1 = arith.constant 0 : index
    %c0_2 = arith.constant 0 : index
    %2 = vector.load %arg2[%c0_1, %c0_2] : memref<1x64xf32, #tpu.memory_space<vmem>>, vector<1x64xf32>
    %3 = vector.broadcast %2 : vector<1x64xf32> to vector<8x64xf32>
    %4 = arith.mulf %1, %3 : vector<8x64xf32>
    %c0_3 = arith.constant 0 : index
    %c0_4 = arith.constant 0 : index
    %5 = vector.load %arg3[%c0_3, %c0_4] : memref<1x64xf32, #tpu.memory_space<vmem>>, vector<1x64xf32>
    %6 = vector.broadcast %5 : vector<1x64xf32> to vector<8x64xf32>
    %7 = arith.addf %4, %6 : vector<8x64xf32>
    %c0_5 = arith.constant 0 : index
    %c0_6 = arith.constant 0 : index
    %8 = vector.load %arg4[%c0_5, %c0_6] : memref<8x64xbf16, #tpu.memory_space<vmem>>, vector<8x64xbf16>
    %9 = arith.extf %8 : vector<8x64xbf16> to vector<8x64xf32>
    %10 = tpu.concatenate %7, %9 in 1 : vector<8x64xf32>, vector<8x64xf32> -> vector<8x128xf32>
    %11 = arith.truncf %10 : vector<8x128xf32> to vector<8x128xbf16>
    %c0_7 = arith.constant 0 : index
    %c0_8 = arith.constant 0 : index
    %12 = vector.load %arg5[%c0_7, %c0_8] : memref<8x128xbf16, #tpu.memory_space<vmem>>, vector<8x128xbf16>
    tpu.vector_store %arg5[%c0_7, %c0_8], %11 {strides = array<i32>} : memref<8x128xbf16, #tpu.memory_space<vmem>>, vector<8x128xbf16>,
    return
  }
  func.func @transform_0(%arg0: i32) -> (i32, i32) {
    %c0_i32 = arith.constant 0 : i32
    %c0_i32_0 = arith.constant 0 : i32
    return %arg0, %c0_i32 : i32, i32
  }
  func.func @transform_1(%arg0: i32) -> (i32, i32) {
    %c0_i32 = arith.constant 0 : i32
    %c0_i32_0 = arith.constant 0 : i32
    %c0_i32_1 = arith.constant 0 : i32
    return %c0_i32, %c0_i32_0 : i32, i32
  }
  func.func @transform_2(%arg0: i32) -> (i32, i32) {
    %c0_i32 = arith.constant 0 : i32
    %c0_i32_0 = arith.constant 0 : i32
    %c0_i32_1 = arith.constant 0 : i32
    return %c0_i32, %c0_i32_0 : i32, i32
  }
  func.func @transform_3(%arg0: i32) -> (i32, i32) {
    %c0_i32 = arith.constant 0 : i32
    %c0_i32_0 = arith.constant 0 : i32
    return %arg0, %c0_i32 : i32, i32
  }
  func.func @transform_4(%arg0: i32) -> (i32, i32) {
    %c0_i32 = arith.constant 0 : i32
    %c0_i32_0 = arith.constant 0 : i32
    return %arg0, %c0_i32 : i32, i32
  }
}

module attributes {stable_mosaic.version = 11 : i64} {
  func.func @_mm_kernel(%arg0: i32, %arg1: i32, %arg2: i32, %arg3: i32, %arg4: memref<1x2x256xbf16, #tpu.memory_space<vmem>>, %arg5: memref<1x256x128xbf16, #tpu.memory_space<vmem>>, %arg6: memref<1x128xf32, #tpu.memory_space<vmem>>, %arg7: memref<1x2x128xbf16, #tpu.memory_space<vmem>>, %arg8: memref<2x128xf32, #tpu.memory_space<vmem>>) attributes {dimension_semantics = [#tpu.dimension_semantics<parallel>, #tpu.dimension_semantics<parallel>, #tpu.dimension_semantics<parallel>, #tpu.dimension_semantics<arbitrary>], iteration_bounds = array<i64: 4, 1, 1, 1>, scalar_prefetch = 0 : i64, scratch_operands = 1 : i64, tpu.core_type = #tpu.core_type<tc>, window_params = [{transform_indices = @transform_0, window_bounds = array<i64: 1, 2, 256>}, {transform_indices = @transform_1, window_bounds = array<i64: 1, 256, 128>}, {transform_indices = @transform_2, window_bounds = array<i64: 1, 128>}, {transform_indices = @transform_3, window_bounds = array<i64: 1, 2, 128>}]} {
    %c0_i32 = arith.constant 0 : i32
    %0 = arith.cmpi eq, %arg3, %c0_i32 : i32
    %1 = arith.extui %0 : i1 to i32
    %c0_i32_0 = arith.constant 0 : i32
    %2 = arith.cmpi ne, %1, %c0_i32_0 : i32
    scf.if %2 {
      %cst_12 = arith.constant 0.000000e+00 : f32
      %14 = vector.broadcast %cst_12 : f32 to vector<2x128xf32>
      %c0_13 = arith.constant 0 : index
      %c0_14 = arith.constant 0 : index
      %15 = vector.load %arg8[%c0_13, %c0_14] : memref<2x128xf32, #tpu.memory_space<vmem>>, vector<2x128xf32>
      tpu.vector_store %arg8[%c0_13, %c0_14], %14 {strides = array<i32>} : memref<2x128xf32, #tpu.memory_space<vmem>>, vector<2x128xf32>,
    } else {
    }
    %c0 = arith.constant 0 : index
    %c0_1 = arith.constant 0 : index
    %3 = vector.load %arg8[%c0, %c0_1] : memref<2x128xf32, #tpu.memory_space<vmem>>, vector<2x128xf32>
    %c0_2 = arith.constant 0 : index
    %c0_3 = arith.constant 0 : index
    %c0_4 = arith.constant 0 : index
    %4 = vector.load %arg4[%c0_2, %c0_3, %c0_4] : memref<1x2x256xbf16, #tpu.memory_space<vmem>>, vector<1x2x256xbf16>
    %5 = vector.shape_cast %4 : vector<1x2x256xbf16> to vector<2x256xbf16>
    %c0_5 = arith.constant 0 : index
    %c0_6 = arith.constant 0 : index
    %c0_7 = arith.constant 0 : index
    %6 = vector.load %arg5[%c0_5, %c0_6, %c0_7] : memref<1x256x128xbf16, #tpu.memory_space<vmem>>, vector<1x256x128xbf16>
    %7 = vector.shape_cast %6 : vector<1x256x128xbf16> to vector<256x128xbf16>
    %cst = arith.constant dense<0.000000e+00> : vector<2x128xf32>
    %8 = tpu.matmul %5, %7, %cst {dimension_numbers = #tpu.dot_dimension_numbers<[1], [0], [0], [1], [0, 0, 1, 1], [], []>} : vector<2x256xbf16>, vector<256x128xbf16>, vector<2x128xf32> -> vector<2x128xf32>
    %9 = arith.addf %3, %8 : vector<2x128xf32>
    %c0_8 = arith.constant 0 : index
    %c0_9 = arith.constant 0 : index
    %10 = vector.load %arg8[%c0_8, %c0_9] : memref<2x128xf32, #tpu.memory_space<vmem>>, vector<2x128xf32>
    tpu.vector_store %arg8[%c0_8, %c0_9], %9 {strides = array<i32>} : memref<2x128xf32, #tpu.memory_space<vmem>>, vector<2x128xf32>,
    %c0_i32_10 = arith.constant 0 : i32
    %11 = arith.cmpi eq, %arg3, %c0_i32_10 : i32
    %12 = arith.extui %11 : i1 to i32
    %c0_i32_11 = arith.constant 0 : i32
    %13 = arith.cmpi ne, %12, %c0_i32_11 : i32
    scf.if %13 {
      %c0_12 = arith.constant 0 : index
      %c0_13 = arith.constant 0 : index
      %14 = vector.load %arg8[%c0_12, %c0_13] : memref<2x128xf32, #tpu.memory_space<vmem>>, vector<2x128xf32>
      %c0_14 = arith.constant 0 : index
      %c0_15 = arith.constant 0 : index
      %15 = vector.load %arg6[%c0_14, %c0_15] : memref<1x128xf32, #tpu.memory_space<vmem>>, vector<1x128xf32>
      %16 = vector.broadcast %15 : vector<1x128xf32> to vector<2x128xf32>
      %17 = arith.addf %14, %16 : vector<2x128xf32>
      %18 = arith.truncf %17 : vector<2x128xf32> to vector<2x128xbf16>
      %c0_16 = arith.constant 0 : index
      %c0_17 = arith.constant 0 : index
      %c0_18 = arith.constant 0 : index
      %19 = vector.load %arg7[%c0_16, %c0_17, %c0_18] : memref<1x2x128xbf16, #tpu.memory_space<vmem>>, vector<1x2x128xbf16>
      %20 = vector.shape_cast %19 : vector<1x2x128xbf16> to vector<2x128xbf16>
      %21 = vector.shape_cast %18 : vector<2x128xbf16> to vector<1x2x128xbf16>
      tpu.vector_store %arg7[%c0_16, %c0_17, %c0_18], %21 {strides = array<i32>} : memref<1x2x128xbf16, #tpu.memory_space<vmem>>, vector<1x2x128xbf16>,
    } else {
    }
    return
  }
  func.func @transform_0(%arg0: i32, %arg1: i32, %arg2: i32, %arg3: i32) -> (i32, i32, i32) {
    %c0_i32 = arith.constant 0 : i32
    return %arg0, %arg1, %arg3 : i32, i32, i32
  }
  func.func @transform_1(%arg0: i32, %arg1: i32, %arg2: i32, %arg3: i32) -> (i32, i32, i32) {
    %c0_i32 = arith.constant 0 : i32
    return %arg0, %arg3, %arg2 : i32, i32, i32
  }
  func.func @transform_2(%arg0: i32, %arg1: i32, %arg2: i32, %arg3: i32) -> (i32, i32) {
    %c0_i32 = arith.constant 0 : i32
    %c0_i32_0 = arith.constant 0 : i32
    return %c0_i32, %arg2 : i32, i32
  }
  func.func @transform_3(%arg0: i32, %arg1: i32, %arg2: i32, %arg3: i32) -> (i32, i32, i32) {
    %c0_i32 = arith.constant 0 : i32
    return %arg0, %arg1, %arg2 : i32, i32, i32
  }
}

module attributes {stable_mosaic.version = 11 : i64} {
  func.func @_mm_kernel(%arg0: i32, %arg1: i32, %arg2: i32, %arg3: i32, %arg4: memref<1x8x256xbf16, #tpu.memory_space<vmem>>, %arg5: memref<1x256x128xbf16, #tpu.memory_space<vmem>>, %arg6: memref<1x128xf32, #tpu.memory_space<vmem>>, %arg7: memref<1x8x128xbf16, #tpu.memory_space<vmem>>, %arg8: memref<8x128xf32, #tpu.memory_space<vmem>>) attributes {dimension_semantics = [#tpu.dimension_semantics<parallel>, #tpu.dimension_semantics<parallel>, #tpu.dimension_semantics<parallel>, #tpu.dimension_semantics<arbitrary>], iteration_bounds = array<i64: 4, 1, 1, 2>, scalar_prefetch = 0 : i64, scratch_operands = 1 : i64, tpu.core_type = #tpu.core_type<tc>, window_params = [{transform_indices = @transform_0, window_bounds = array<i64: 1, 8, 256>}, {transform_indices = @transform_1, window_bounds = array<i64: 1, 256, 128>}, {transform_indices = @transform_2, window_bounds = array<i64: 1, 128>}, {transform_indices = @transform_3, window_bounds = array<i64: 1, 8, 128>}]} {
    %c0_i32 = arith.constant 0 : i32
    %0 = arith.cmpi eq, %arg3, %c0_i32 : i32
    %1 = arith.extui %0 : i1 to i32
    %c0_i32_0 = arith.constant 0 : i32
    %2 = arith.cmpi ne, %1, %c0_i32_0 : i32
    scf.if %2 {
      %cst_11 = arith.constant 0.000000e+00 : f32
      %14 = vector.broadcast %cst_11 : f32 to vector<8x128xf32>
      %c0_12 = arith.constant 0 : index
      %c0_13 = arith.constant 0 : index
      %15 = vector.load %arg8[%c0_12, %c0_13] : memref<8x128xf32, #tpu.memory_space<vmem>>, vector<8x128xf32>
      tpu.vector_store %arg8[%c0_12, %c0_13], %14 {strides = array<i32>} : memref<8x128xf32, #tpu.memory_space<vmem>>, vector<8x128xf32>,
    } else {
    }
    %c0 = arith.constant 0 : index
    %c0_1 = arith.constant 0 : index
    %3 = vector.load %arg8[%c0, %c0_1] : memref<8x128xf32, #tpu.memory_space<vmem>>, vector<8x128xf32>
    %c0_2 = arith.constant 0 : index
    %c0_3 = arith.constant 0 : index
    %c0_4 = arith.constant 0 : index
    %4 = vector.load %arg4[%c0_2, %c0_3, %c0_4] : memref<1x8x256xbf16, #tpu.memory_space<vmem>>, vector<1x8x256xbf16>
    %5 = vector.shape_cast %4 : vector<1x8x256xbf16> to vector<8x256xbf16>
    %c0_5 = arith.constant 0 : index
    %c0_6 = arith.constant 0 : index
    %c0_7 = arith.constant 0 : index
    %6 = vector.load %arg5[%c0_5, %c0_6, %c0_7] : memref<1x256x128xbf16, #tpu.memory_space<vmem>>, vector<1x256x128xbf16>
    %7 = vector.shape_cast %6 : vector<1x256x128xbf16> to vector<256x128xbf16>
    %cst = arith.constant dense<0.000000e+00> : vector<8x128xf32>
    %8 = tpu.matmul %5, %7, %cst {dimension_numbers = #tpu.dot_dimension_numbers<[1], [0], [0], [1], [0, 0, 1, 1], [], []>} : vector<8x256xbf16>, vector<256x128xbf16>, vector<8x128xf32> -> vector<8x128xf32>
    %9 = arith.addf %3, %8 : vector<8x128xf32>
    %c0_8 = arith.constant 0 : index
    %c0_9 = arith.constant 0 : index
    %10 = vector.load %arg8[%c0_8, %c0_9] : memref<8x128xf32, #tpu.memory_space<vmem>>, vector<8x128xf32>
    tpu.vector_store %arg8[%c0_8, %c0_9], %9 {strides = array<i32>} : memref<8x128xf32, #tpu.memory_space<vmem>>, vector<8x128xf32>,
    %c1_i32 = arith.constant 1 : i32
    %11 = arith.cmpi eq, %arg3, %c1_i32 : i32
    %12 = arith.extui %11 : i1 to i32
    %c0_i32_10 = arith.constant 0 : i32
    %13 = arith.cmpi ne, %12, %c0_i32_10 : i32
    scf.if %13 {
      %c0_11 = arith.constant 0 : index
      %c0_12 = arith.constant 0 : index
      %14 = vector.load %arg8[%c0_11, %c0_12] : memref<8x128xf32, #tpu.memory_space<vmem>>, vector<8x128xf32>
      %c0_13 = arith.constant 0 : index
      %c0_14 = arith.constant 0 : index
      %15 = vector.load %arg6[%c0_13, %c0_14] : memref<1x128xf32, #tpu.memory_space<vmem>>, vector<1x128xf32>
      %16 = vector.broadcast %15 : vector<1x128xf32> to vector<8x128xf32>
      %17 = arith.addf %14, %16 : vector<8x128xf32>
      %18 = arith.truncf %17 : vector<8x128xf32> to vector<8x128xbf16>
      %c0_15 = arith.constant 0 : index
      %c0_16 = arith.constant 0 : index
      %c0_17 = arith.constant 0 : index
      %19 = vector.load %arg7[%c0_15, %c0_16, %c0_17] : memref<1x8x128xbf16, #tpu.memory_space<vmem>>, vector<1x8x128xbf16>
      %20 = vector.shape_cast %19 : vector<1x8x128xbf16> to vector<8x128xbf16>
      %21 = vector.shape_cast %18 : vector<8x128xbf16> to vector<1x8x128xbf16>
      tpu.vector_store %arg7[%c0_15, %c0_16, %c0_17], %21 {strides = array<i32>} : memref<1x8x128xbf16, #tpu.memory_space<vmem>>, vector<1x8x128xbf16>,
    } else {
    }
    return
  }
  func.func @transform_0(%arg0: i32, %arg1: i32, %arg2: i32, %arg3: i32) -> (i32, i32, i32) {
    %c0_i32 = arith.constant 0 : i32
    return %arg0, %arg1, %arg3 : i32, i32, i32
  }
  func.func @transform_1(%arg0: i32, %arg1: i32, %arg2: i32, %arg3: i32) -> (i32, i32, i32) {
    %c0_i32 = arith.constant 0 : i32
    return %arg0, %arg3, %arg2 : i32, i32, i32
  }
  func.func @transform_2(%arg0: i32, %arg1: i32, %arg2: i32, %arg3: i32) -> (i32, i32) {
    %c0_i32 = arith.constant 0 : i32
    %c0_i32_0 = arith.constant 0 : i32
    return %c0_i32, %arg2 : i32, i32
  }
  func.func @transform_3(%arg0: i32, %arg1: i32, %arg2: i32, %arg3: i32) -> (i32, i32, i32) {
    %c0_i32 = arith.constant 0 : i32
    return %arg0, %arg1, %arg2 : i32, i32, i32
  }
}

module attributes {stable_mosaic.version = 11 : i64} {
  func.func @_bn_apply_concat_kernel(%arg0: i32, %arg1: memref<32x32xbf16, #tpu.memory_space<vmem>>, %arg2: memref<1x32xf32, #tpu.memory_space<vmem>>, %arg3: memref<1x32xf32, #tpu.memory_space<vmem>>, %arg4: memref<32x32xbf16, #tpu.memory_space<vmem>>, %arg5: memref<32x64xbf16, #tpu.memory_space<vmem>>) attributes {dimension_semantics = [#tpu.dimension_semantics<parallel>], iteration_bounds = array<i64: 1>, scalar_prefetch = 0 : i64, scratch_operands = 0 : i64, tpu.core_type = #tpu.core_type<tc>, window_params = [{transform_indices = @transform_0, window_bounds = array<i64: 32, 32>}, {pipeline_mode = #tpu.pipeline_mode<synchronous>, transform_indices = @transform_1, window_bounds = array<i64: 1, 32>}, {pipeline_mode = #tpu.pipeline_mode<synchronous>, transform_indices = @transform_2, window_bounds = array<i64: 1, 32>}, {transform_indices = @transform_3, window_bounds = array<i64: 32, 32>}, {transform_indices = @transform_4, window_bounds = array<i64: 32, 64>}]} {
    %c0 = arith.constant 0 : index
    %c0_0 = arith.constant 0 : index
    %0 = vector.load %arg1[%c0, %c0_0] : memref<32x32xbf16, #tpu.memory_space<vmem>>, vector<32x32xbf16>
    %1 = arith.extf %0 : vector<32x32xbf16> to vector<32x32xf32>
    %c0_1 = arith.constant 0 : index
    %c0_2 = arith.constant 0 : index
    %2 = vector.load %arg2[%c0_1, %c0_2] : memref<1x32xf32, #tpu.memory_space<vmem>>, vector<1x32xf32>
    %3 = vector.broadcast %2 : vector<1x32xf32> to vector<32x32xf32>
    %4 = arith.mulf %1, %3 : vector<32x32xf32>
    %c0_3 = arith.constant 0 : index
    %c0_4 = arith.constant 0 : index
    %5 = vector.load %arg3[%c0_3, %c0_4] : memref<1x32xf32, #tpu.memory_space<vmem>>, vector<1x32xf32>
    %6 = vector.broadcast %5 : vector<1x32xf32> to vector<32x32xf32>
    %7 = arith.addf %4, %6 : vector<32x32xf32>
    %c0_5 = arith.constant 0 : index
    %c0_6 = arith.constant 0 : index
    %8 = vector.load %arg4[%c0_5, %c0_6] : memref<32x32xbf16, #tpu.memory_space<vmem>>, vector<32x32xbf16>
    %9 = arith.extf %8 : vector<32x32xbf16> to vector<32x32xf32>
    %10 = tpu.concatenate %7, %9 in 1 : vector<32x32xf32>, vector<32x32xf32> -> vector<32x64xf32>
    %11 = arith.truncf %10 : vector<32x64xf32> to vector<32x64xbf16>
    %c0_7 = arith.constant 0 : index
    %c0_8 = arith.constant 0 : index
    %12 = vector.load %arg5[%c0_7, %c0_8] : memref<32x64xbf16, #tpu.memory_space<vmem>>, vector<32x64xbf16>
    tpu.vector_store %arg5[%c0_7, %c0_8], %11 {strides = array<i32>} : memref<32x64xbf16, #tpu.memory_space<vmem>>, vector<32x64xbf16>,
    return
  }
  func.func @transform_0(%arg0: i32) -> (i32, i32) {
    %c0_i32 = arith.constant 0 : i32
    %c0_i32_0 = arith.constant 0 : i32
    return %arg0, %c0_i32 : i32, i32
  }
  func.func @transform_1(%arg0: i32) -> (i32, i32) {
    %c0_i32 = arith.constant 0 : i32
    %c0_i32_0 = arith.constant 0 : i32
    %c0_i32_1 = arith.constant 0 : i32
    return %c0_i32, %c0_i32_0 : i32, i32
  }
  func.func @transform_2(%arg0: i32) -> (i32, i32) {
    %c0_i32 = arith.constant 0 : i32
    %c0_i32_0 = arith.constant 0 : i32
    %c0_i32_1 = arith.constant 0 : i32
    return %c0_i32, %c0_i32_0 : i32, i32
  }
  func.func @transform_3(%arg0: i32) -> (i32, i32) {
    %c0_i32 = arith.constant 0 : i32
    %c0_i32_0 = arith.constant 0 : i32
    return %arg0, %c0_i32 : i32, i32
  }
  func.func @transform_4(%arg0: i32) -> (i32, i32) {
    %c0_i32 = arith.constant 0 : i32
    %c0_i32_0 = arith.constant 0 : i32
    return %arg0, %c0_i32 : i32, i32
  }
}

module attributes {stable_mosaic.version = 11 : i64} {
  func.func @_mm_kernel(%arg0: i32, %arg1: i32, %arg2: i32, %arg3: i32, %arg4: memref<1x16x256xbf16, #tpu.memory_space<vmem>>, %arg5: memref<1x256x128xbf16, #tpu.memory_space<vmem>>, %arg6: memref<1x128xf32, #tpu.memory_space<vmem>>, %arg7: memref<1x16x128xbf16, #tpu.memory_space<vmem>>, %arg8: memref<16x128xf32, #tpu.memory_space<vmem>>) attributes {dimension_semantics = [#tpu.dimension_semantics<parallel>, #tpu.dimension_semantics<parallel>, #tpu.dimension_semantics<parallel>, #tpu.dimension_semantics<arbitrary>], iteration_bounds = array<i64: 4, 2, 1, 1>, scalar_prefetch = 0 : i64, scratch_operands = 1 : i64, tpu.core_type = #tpu.core_type<tc>, window_params = [{transform_indices = @transform_0, window_bounds = array<i64: 1, 16, 256>}, {transform_indices = @transform_1, window_bounds = array<i64: 1, 256, 128>}, {transform_indices = @transform_2, window_bounds = array<i64: 1, 128>}, {transform_indices = @transform_3, window_bounds = array<i64: 1, 16, 128>}]} {
    %c0_i32 = arith.constant 0 : i32
    %0 = arith.cmpi eq, %arg3, %c0_i32 : i32
    %1 = arith.extui %0 : i1 to i32
    %c0_i32_0 = arith.constant 0 : i32
    %2 = arith.cmpi ne, %1, %c0_i32_0 : i32
    scf.if %2 {
      %cst_12 = arith.constant 0.000000e+00 : f32
      %14 = vector.broadcast %cst_12 : f32 to vector<16x128xf32>
      %c0_13 = arith.constant 0 : index
      %c0_14 = arith.constant 0 : index
      %15 = vector.load %arg8[%c0_13, %c0_14] : memref<16x128xf32, #tpu.memory_space<vmem>>, vector<16x128xf32>
      tpu.vector_store %arg8[%c0_13, %c0_14], %14 {strides = array<i32>} : memref<16x128xf32, #tpu.memory_space<vmem>>, vector<16x128xf32>,
    } else {
    }
    %c0 = arith.constant 0 : index
    %c0_1 = arith.constant 0 : index
    %3 = vector.load %arg8[%c0, %c0_1] : memref<16x128xf32, #tpu.memory_space<vmem>>, vector<16x128xf32>
    %c0_2 = arith.constant 0 : index
    %c0_3 = arith.constant 0 : index
    %c0_4 = arith.constant 0 : index
    %4 = vector.load %arg4[%c0_2, %c0_3, %c0_4] : memref<1x16x256xbf16, #tpu.memory_space<vmem>>, vector<1x16x256xbf16>
    %5 = vector.shape_cast %4 : vector<1x16x256xbf16> to vector<16x256xbf16>
    %c0_5 = arith.constant 0 : index
    %c0_6 = arith.constant 0 : index
    %c0_7 = arith.constant 0 : index
    %6 = vector.load %arg5[%c0_5, %c0_6, %c0_7] : memref<1x256x128xbf16, #tpu.memory_space<vmem>>, vector<1x256x128xbf16>
    %7 = vector.shape_cast %6 : vector<1x256x128xbf16> to vector<256x128xbf16>
    %cst = arith.constant dense<0.000000e+00> : vector<16x128xf32>
    %8 = tpu.matmul %5, %7, %cst {dimension_numbers = #tpu.dot_dimension_numbers<[1], [0], [0], [1], [0, 0, 1, 1], [], []>} : vector<16x256xbf16>, vector<256x128xbf16>, vector<16x128xf32> -> vector<16x128xf32>
    %9 = arith.addf %3, %8 : vector<16x128xf32>
    %c0_8 = arith.constant 0 : index
    %c0_9 = arith.constant 0 : index
    %10 = vector.load %arg8[%c0_8, %c0_9] : memref<16x128xf32, #tpu.memory_space<vmem>>, vector<16x128xf32>
    tpu.vector_store %arg8[%c0_8, %c0_9], %9 {strides = array<i32>} : memref<16x128xf32, #tpu.memory_space<vmem>>, vector<16x128xf32>,
    %c0_i32_10 = arith.constant 0 : i32
    %11 = arith.cmpi eq, %arg3, %c0_i32_10 : i32
    %12 = arith.extui %11 : i1 to i32
    %c0_i32_11 = arith.constant 0 : i32
    %13 = arith.cmpi ne, %12, %c0_i32_11 : i32
    scf.if %13 {
      %c0_12 = arith.constant 0 : index
      %c0_13 = arith.constant 0 : index
      %14 = vector.load %arg8[%c0_12, %c0_13] : memref<16x128xf32, #tpu.memory_space<vmem>>, vector<16x128xf32>
      %c0_14 = arith.constant 0 : index
      %c0_15 = arith.constant 0 : index
      %15 = vector.load %arg6[%c0_14, %c0_15] : memref<1x128xf32, #tpu.memory_space<vmem>>, vector<1x128xf32>
      %16 = vector.broadcast %15 : vector<1x128xf32> to vector<16x128xf32>
      %17 = arith.addf %14, %16 : vector<16x128xf32>
      %18 = arith.truncf %17 : vector<16x128xf32> to vector<16x128xbf16>
      %c0_16 = arith.constant 0 : index
      %c0_17 = arith.constant 0 : index
      %c0_18 = arith.constant 0 : index
      %19 = vector.load %arg7[%c0_16, %c0_17, %c0_18] : memref<1x16x128xbf16, #tpu.memory_space<vmem>>, vector<1x16x128xbf16>
      %20 = vector.shape_cast %19 : vector<1x16x128xbf16> to vector<16x128xbf16>
      %21 = vector.shape_cast %18 : vector<16x128xbf16> to vector<1x16x128xbf16>
      tpu.vector_store %arg7[%c0_16, %c0_17, %c0_18], %21 {strides = array<i32>} : memref<1x16x128xbf16, #tpu.memory_space<vmem>>, vector<1x16x128xbf16>,
    } else {
    }
    return
  }
  func.func @transform_0(%arg0: i32, %arg1: i32, %arg2: i32, %arg3: i32) -> (i32, i32, i32) {
    %c0_i32 = arith.constant 0 : i32
    return %arg0, %arg1, %arg3 : i32, i32, i32
  }
  func.func @transform_1(%arg0: i32, %arg1: i32, %arg2: i32, %arg3: i32) -> (i32, i32, i32) {
    %c0_i32 = arith.constant 0 : i32
    return %arg0, %arg3, %arg2 : i32, i32, i32
  }
  func.func @transform_2(%arg0: i32, %arg1: i32, %arg2: i32, %arg3: i32) -> (i32, i32) {
    %c0_i32 = arith.constant 0 : i32
    %c0_i32_0 = arith.constant 0 : i32
    return %c0_i32, %arg2 : i32, i32
  }
  func.func @transform_3(%arg0: i32, %arg1: i32, %arg2: i32, %arg3: i32) -> (i32, i32, i32) {
    %c0_i32 = arith.constant 0 : i32
    return %arg0, %arg1, %arg2 : i32, i32, i32
  }
}

module attributes {stable_mosaic.version = 11 : i64} {
  func.func @_bn_apply_concat_kernel(%arg0: i32, %arg1: memref<128x16xbf16, #tpu.memory_space<vmem>>, %arg2: memref<1x16xf32, #tpu.memory_space<vmem>>, %arg3: memref<1x16xf32, #tpu.memory_space<vmem>>, %arg4: memref<128x16xbf16, #tpu.memory_space<vmem>>, %arg5: memref<128x32xbf16, #tpu.memory_space<vmem>>) attributes {dimension_semantics = [#tpu.dimension_semantics<parallel>], iteration_bounds = array<i64: 1>, scalar_prefetch = 0 : i64, scratch_operands = 0 : i64, tpu.core_type = #tpu.core_type<tc>, window_params = [{transform_indices = @transform_0, window_bounds = array<i64: 128, 16>}, {pipeline_mode = #tpu.pipeline_mode<synchronous>, transform_indices = @transform_1, window_bounds = array<i64: 1, 16>}, {pipeline_mode = #tpu.pipeline_mode<synchronous>, transform_indices = @transform_2, window_bounds = array<i64: 1, 16>}, {transform_indices = @transform_3, window_bounds = array<i64: 128, 16>}, {transform_indices = @transform_4, window_bounds = array<i64: 128, 32>}]} {
    %c0 = arith.constant 0 : index
    %c0_0 = arith.constant 0 : index
    %0 = vector.load %arg1[%c0, %c0_0] : memref<128x16xbf16, #tpu.memory_space<vmem>>, vector<128x16xbf16>
    %1 = arith.extf %0 : vector<128x16xbf16> to vector<128x16xf32>
    %c0_1 = arith.constant 0 : index
    %c0_2 = arith.constant 0 : index
    %2 = vector.load %arg2[%c0_1, %c0_2] : memref<1x16xf32, #tpu.memory_space<vmem>>, vector<1x16xf32>
    %3 = vector.broadcast %2 : vector<1x16xf32> to vector<128x16xf32>
    %4 = arith.mulf %1, %3 : vector<128x16xf32>
    %c0_3 = arith.constant 0 : index
    %c0_4 = arith.constant 0 : index
    %5 = vector.load %arg3[%c0_3, %c0_4] : memref<1x16xf32, #tpu.memory_space<vmem>>, vector<1x16xf32>
    %6 = vector.broadcast %5 : vector<1x16xf32> to vector<128x16xf32>
    %7 = arith.addf %4, %6 : vector<128x16xf32>
    %c0_5 = arith.constant 0 : index
    %c0_6 = arith.constant 0 : index
    %8 = vector.load %arg4[%c0_5, %c0_6] : memref<128x16xbf16, #tpu.memory_space<vmem>>, vector<128x16xbf16>
    %9 = arith.extf %8 : vector<128x16xbf16> to vector<128x16xf32>
    %10 = tpu.concatenate %7, %9 in 1 : vector<128x16xf32>, vector<128x16xf32> -> vector<128x32xf32>
    %11 = arith.truncf %10 : vector<128x32xf32> to vector<128x32xbf16>
    %c0_7 = arith.constant 0 : index
    %c0_8 = arith.constant 0 : index
    %12 = vector.load %arg5[%c0_7, %c0_8] : memref<128x32xbf16, #tpu.memory_space<vmem>>, vector<128x32xbf16>
    tpu.vector_store %arg5[%c0_7, %c0_8], %11 {strides = array<i32>} : memref<128x32xbf16, #tpu.memory_space<vmem>>, vector<128x32xbf16>,
    return
  }
  func.func @transform_0(%arg0: i32) -> (i32, i32) {
    %c0_i32 = arith.constant 0 : i32
    %c0_i32_0 = arith.constant 0 : i32
    return %arg0, %c0_i32 : i32, i32
  }
  func.func @transform_1(%arg0: i32) -> (i32, i32) {
    %c0_i32 = arith.constant 0 : i32
    %c0_i32_0 = arith.constant 0 : i32
    %c0_i32_1 = arith.constant 0 : i32
    return %c0_i32, %c0_i32_0 : i32, i32
  }
  func.func @transform_2(%arg0: i32) -> (i32, i32) {
    %c0_i32 = arith.constant 0 : i32
    %c0_i32_0 = arith.constant 0 : i32
    %c0_i32_1 = arith.constant 0 : i32
    return %c0_i32, %c0_i32_0 : i32, i32
  }
  func.func @transform_3(%arg0: i32) -> (i32, i32) {
    %c0_i32 = arith.constant 0 : i32
    %c0_i32_0 = arith.constant 0 : i32
    return %arg0, %c0_i32 : i32, i32
  }
  func.func @transform_4(%arg0: i32) -> (i32, i32) {
    %c0_i32 = arith.constant 0 : i32
    %c0_i32_0 = arith.constant 0 : i32
    return %arg0, %c0_i32 : i32, i32
  }
}

module attributes {stable_mosaic.version = 11 : i64} {
  func.func @_mm_kernel(%arg0: i32, %arg1: i32, %arg2: i32, %arg3: i32, %arg4: memref<1x64x128xbf16, #tpu.memory_space<vmem>>, %arg5: memref<1x128x128xbf16, #tpu.memory_space<vmem>>, %arg6: memref<1x128xf32, #tpu.memory_space<vmem>>, %arg7: memref<1x64x128xbf16, #tpu.memory_space<vmem>>, %arg8: memref<64x128xf32, #tpu.memory_space<vmem>>) attributes {dimension_semantics = [#tpu.dimension_semantics<parallel>, #tpu.dimension_semantics<parallel>, #tpu.dimension_semantics<parallel>, #tpu.dimension_semantics<arbitrary>], iteration_bounds = array<i64: 4, 2, 1, 1>, scalar_prefetch = 0 : i64, scratch_operands = 1 : i64, tpu.core_type = #tpu.core_type<tc>, window_params = [{transform_indices = @transform_0, window_bounds = array<i64: 1, 64, 128>}, {transform_indices = @transform_1, window_bounds = array<i64: 1, 128, 128>}, {transform_indices = @transform_2, window_bounds = array<i64: 1, 128>}, {transform_indices = @transform_3, window_bounds = array<i64: 1, 64, 128>}]} {
    %c0_i32 = arith.constant 0 : i32
    %0 = arith.cmpi eq, %arg3, %c0_i32 : i32
    %1 = arith.extui %0 : i1 to i32
    %c0_i32_0 = arith.constant 0 : i32
    %2 = arith.cmpi ne, %1, %c0_i32_0 : i32
    scf.if %2 {
      %cst_12 = arith.constant 0.000000e+00 : f32
      %14 = vector.broadcast %cst_12 : f32 to vector<64x128xf32>
      %c0_13 = arith.constant 0 : index
      %c0_14 = arith.constant 0 : index
      %15 = vector.load %arg8[%c0_13, %c0_14] : memref<64x128xf32, #tpu.memory_space<vmem>>, vector<64x128xf32>
      tpu.vector_store %arg8[%c0_13, %c0_14], %14 {strides = array<i32>} : memref<64x128xf32, #tpu.memory_space<vmem>>, vector<64x128xf32>,
    } else {
    }
    %c0 = arith.constant 0 : index
    %c0_1 = arith.constant 0 : index
    %3 = vector.load %arg8[%c0, %c0_1] : memref<64x128xf32, #tpu.memory_space<vmem>>, vector<64x128xf32>
    %c0_2 = arith.constant 0 : index
    %c0_3 = arith.constant 0 : index
    %c0_4 = arith.constant 0 : index
    %4 = vector.load %arg4[%c0_2, %c0_3, %c0_4] : memref<1x64x128xbf16, #tpu.memory_space<vmem>>, vector<1x64x128xbf16>
    %5 = vector.shape_cast %4 : vector<1x64x128xbf16> to vector<64x128xbf16>
    %c0_5 = arith.constant 0 : index
    %c0_6 = arith.constant 0 : index
    %c0_7 = arith.constant 0 : index
    %6 = vector.load %arg5[%c0_5, %c0_6, %c0_7] : memref<1x128x128xbf16, #tpu.memory_space<vmem>>, vector<1x128x128xbf16>
    %7 = vector.shape_cast %6 : vector<1x128x128xbf16> to vector<128x128xbf16>
    %cst = arith.constant dense<0.000000e+00> : vector<64x128xf32>
    %8 = tpu.matmul %5, %7, %cst {dimension_numbers = #tpu.dot_dimension_numbers<[1], [0], [0], [1], [0, 0, 1, 1], [], []>} : vector<64x128xbf16>, vector<128x128xbf16>, vector<64x128xf32> -> vector<64x128xf32>
    %9 = arith.addf %3, %8 : vector<64x128xf32>
    %c0_8 = arith.constant 0 : index
    %c0_9 = arith.constant 0 : index
    %10 = vector.load %arg8[%c0_8, %c0_9] : memref<64x128xf32, #tpu.memory_space<vmem>>, vector<64x128xf32>
    tpu.vector_store %arg8[%c0_8, %c0_9], %9 {strides = array<i32>} : memref<64x128xf32, #tpu.memory_space<vmem>>, vector<64x128xf32>,
    %c0_i32_10 = arith.constant 0 : i32
    %11 = arith.cmpi eq, %arg3, %c0_i32_10 : i32
    %12 = arith.extui %11 : i1 to i32
    %c0_i32_11 = arith.constant 0 : i32
    %13 = arith.cmpi ne, %12, %c0_i32_11 : i32
    scf.if %13 {
      %c0_12 = arith.constant 0 : index
      %c0_13 = arith.constant 0 : index
      %14 = vector.load %arg8[%c0_12, %c0_13] : memref<64x128xf32, #tpu.memory_space<vmem>>, vector<64x128xf32>
      %c0_14 = arith.constant 0 : index
      %c0_15 = arith.constant 0 : index
      %15 = vector.load %arg6[%c0_14, %c0_15] : memref<1x128xf32, #tpu.memory_space<vmem>>, vector<1x128xf32>
      %16 = vector.broadcast %15 : vector<1x128xf32> to vector<64x128xf32>
      %17 = arith.addf %14, %16 : vector<64x128xf32>
      %18 = arith.truncf %17 : vector<64x128xf32> to vector<64x128xbf16>
      %c0_16 = arith.constant 0 : index
      %c0_17 = arith.constant 0 : index
      %c0_18 = arith.constant 0 : index
      %19 = vector.load %arg7[%c0_16, %c0_17, %c0_18] : memref<1x64x128xbf16, #tpu.memory_space<vmem>>, vector<1x64x128xbf16>
      %20 = vector.shape_cast %19 : vector<1x64x128xbf16> to vector<64x128xbf16>
      %21 = vector.shape_cast %18 : vector<64x128xbf16> to vector<1x64x128xbf16>
      tpu.vector_store %arg7[%c0_16, %c0_17, %c0_18], %21 {strides = array<i32>} : memref<1x64x128xbf16, #tpu.memory_space<vmem>>, vector<1x64x128xbf16>,
    } else {
    }
    return
  }
  func.func @transform_0(%arg0: i32, %arg1: i32, %arg2: i32, %arg3: i32) -> (i32, i32, i32) {
    %c0_i32 = arith.constant 0 : i32
    return %arg0, %arg1, %arg3 : i32, i32, i32
  }
  func.func @transform_1(%arg0: i32, %arg1: i32, %arg2: i32, %arg3: i32) -> (i32, i32, i32) {
    %c0_i32 = arith.constant 0 : i32
    return %arg0, %arg3, %arg2 : i32, i32, i32
  }
  func.func @transform_2(%arg0: i32, %arg1: i32, %arg2: i32, %arg3: i32) -> (i32, i32) {
    %c0_i32 = arith.constant 0 : i32
    %c0_i32_0 = arith.constant 0 : i32
    return %c0_i32, %arg2 : i32, i32
  }
  func.func @transform_3(%arg0: i32, %arg1: i32, %arg2: i32, %arg3: i32) -> (i32, i32, i32) {
    %c0_i32 = arith.constant 0 : i32
    return %arg0, %arg1, %arg2 : i32, i32, i32
  }
}

module attributes {stable_mosaic.version = 11 : i64} {
  func.func @_bn_stats_kernel(%arg0: i32, %arg1: memref<256x8xbf16, #tpu.memory_space<vmem>>, %arg2: memref<1x8xf32, #tpu.memory_space<vmem>>, %arg3: memref<1x8xf32, #tpu.memory_space<vmem>>, %arg4: memref<1x8xf32, #tpu.memory_space<vmem>>, %arg5: memref<1x8xf32, #tpu.memory_space<vmem>>, %arg6: memref<1x8xf32, #tpu.memory_space<vmem>>, %arg7: memref<1x8xf32, #tpu.memory_space<vmem>>) attributes {dimension_semantics = [#tpu.dimension_semantics<arbitrary>], iteration_bounds = array<i64: 2>, scalar_prefetch = 0 : i64, scratch_operands = 2 : i64, tpu.core_type = #tpu.core_type<tc>, window_params = [{transform_indices = @transform_0, window_bounds = array<i64: 256, 8>}, {pipeline_mode = #tpu.pipeline_mode<synchronous>, transform_indices = @transform_1, window_bounds = array<i64: 1, 8>}, {pipeline_mode = #tpu.pipeline_mode<synchronous>, transform_indices = @transform_2, window_bounds = array<i64: 1, 8>}, {pipeline_mode = #tpu.pipeline_mode<synchronous>, transform_indices = @transform_3, window_bounds = array<i64: 1, 8>}, {pipeline_mode = #tpu.pipeline_mode<synchronous>, transform_indices = @transform_4, window_bounds = array<i64: 1, 8>}]} {
    %c0_i32 = arith.constant 0 : i32
    %0 = arith.cmpi eq, %arg0, %c0_i32 : i32
    %1 = arith.extui %0 : i1 to i32
    %c0_i32_0 = arith.constant 0 : i32
    %2 = arith.cmpi ne, %1, %c0_i32_0 : i32
    scf.if %2 {
      %cst_12 = arith.constant 0.000000e+00 : f32
      %19 = vector.broadcast %cst_12 : f32 to vector<1x8xf32>
      %c0_13 = arith.constant 0 : index
      %c0_14 = arith.constant 0 : index
      %20 = vector.load %arg6[%c0_13, %c0_14] : memref<1x8xf32, #tpu.memory_space<vmem>>, vector<1x8xf32>
      tpu.vector_store %arg6[%c0_13, %c0_14], %19 {strides = array<i32>} : memref<1x8xf32, #tpu.memory_space<vmem>>, vector<1x8xf32>,
      %cst_15 = arith.constant 0.000000e+00 : f32
      %21 = vector.broadcast %cst_15 : f32 to vector<1x8xf32>
      %c0_16 = arith.constant 0 : index
      %c0_17 = arith.constant 0 : index
      %22 = vector.load %arg7[%c0_16, %c0_17] : memref<1x8xf32, #tpu.memory_space<vmem>>, vector<1x8xf32>
      tpu.vector_store %arg7[%c0_16, %c0_17], %21 {strides = array<i32>} : memref<1x8xf32, #tpu.memory_space<vmem>>, vector<1x8xf32>,
    } else {
    }
    %c0 = arith.constant 0 : index
    %c0_1 = arith.constant 0 : index
    %3 = vector.load %arg1[%c0, %c0_1] : memref<256x8xbf16, #tpu.memory_space<vmem>>, vector<256x8xbf16>
    %4 = arith.extf %3 : vector<256x8xbf16> to vector<256x8xf32>
    %c0_2 = arith.constant 0 : index
    %c0_3 = arith.constant 0 : index
    %5 = vector.load %arg6[%c0_2, %c0_3] : memref<1x8xf32, #tpu.memory_space<vmem>>, vector<1x8xf32>
    %cst = arith.constant dense<0.000000e+00> : vector<8xf32>
    %6 = vector.multi_reduction <add>, %4, %cst [0] : vector<256x8xf32> to vector<8xf32>
    %7 = vector.shape_cast %6 : vector<8xf32> to vector<1x8xf32>
    %8 = arith.addf %5, %7 : vector<1x8xf32>
    %c0_4 = arith.constant 0 : index
    %c0_5 = arith.constant 0 : index
    %9 = vector.load %arg6[%c0_4, %c0_5] : memref<1x8xf32, #tpu.memory_space<vmem>>, vector<1x8xf32>
    tpu.vector_store %arg6[%c0_4, %c0_5], %8 {strides = array<i32>} : memref<1x8xf32, #tpu.memory_space<vmem>>, vector<1x8xf32>,
    %c0_6 = arith.constant 0 : index
    %c0_7 = arith.constant 0 : index
    %10 = vector.load %arg7[%c0_6, %c0_7] : memref<1x8xf32, #tpu.memory_space<vmem>>, vector<1x8xf32>
    %11 = arith.mulf %4, %4 : vector<256x8xf32>
    %cst_8 = arith.constant dense<0.000000e+00> : vector<8xf32>
    %12 = vector.multi_reduction <add>, %11, %cst_8 [0] : vector<256x8xf32> to vector<8xf32>
    %13 = vector.shape_cast %12 : vector<8xf32> to vector<1x8xf32>
    %14 = arith.addf %10, %13 : vector<1x8xf32>
    %c0_9 = arith.constant 0 : index
    %c0_10 = arith.constant 0 : index
    %15 = vector.load %arg7[%c0_9, %c0_10] : memref<1x8xf32, #tpu.memory_space<vmem>>, vector<1x8xf32>
    tpu.vector_store %arg7[%c0_9, %c0_10], %14 {strides = array<i32>} : memref<1x8xf32, #tpu.memory_space<vmem>>, vector<1x8xf32>,
    %c1_i32 = arith.constant 1 : i32
    %16 = arith.cmpi eq, %arg0, %c1_i32 : i32
    %17 = arith.extui %16 : i1 to i32
    %c0_i32_11 = arith.constant 0 : i32
    %18 = arith.cmpi ne, %17, %c0_i32_11 : i32
    scf.if %18 {
      %c0_12 = arith.constant 0 : index
      %c0_13 = arith.constant 0 : index
      %19 = vector.load %arg6[%c0_12, %c0_13] : memref<1x8xf32, #tpu.memory_space<vmem>>, vector<1x8xf32>
      %cst_14 = arith.constant 0.001953125 : f32
      %20 = vector.broadcast %cst_14 : f32 to vector<1x8xf32>
      %21 = arith.mulf %19, %20 : vector<1x8xf32>
      %c0_15 = arith.constant 0 : index
      %c0_16 = arith.constant 0 : index
      %22 = vector.load %arg7[%c0_15, %c0_16] : memref<1x8xf32, #tpu.memory_space<vmem>>, vector<1x8xf32>
      %cst_17 = arith.constant 0.001953125 : f32
      %23 = vector.broadcast %cst_17 : f32 to vector<1x8xf32>
      %24 = arith.mulf %22, %23 : vector<1x8xf32>
      %25 = arith.mulf %21, %21 : vector<1x8xf32>
      %26 = arith.subf %24, %25 : vector<1x8xf32>
      %cst_18 = arith.constant 0.000000e+00 : f32
      %27 = vector.broadcast %cst_18 : f32 to vector<1x8xf32>
      %28 = arith.maximumf %26, %27 : vector<1x8xf32>
      %c0_19 = arith.constant 0 : index
      %c0_20 = arith.constant 0 : index
      %29 = vector.load %arg2[%c0_19, %c0_20] : memref<1x8xf32, #tpu.memory_space<vmem>>, vector<1x8xf32>
      %cst_21 = arith.constant 9.99999974E-6 : f32
      %30 = vector.broadcast %cst_21 : f32 to vector<1x8xf32>
      %31 = arith.addf %28, %30 : vector<1x8xf32>
      %32 = math.rsqrt %31 : vector<1x8xf32>
      %33 = arith.mulf %29, %32 : vector<1x8xf32>
      %c0_22 = arith.constant 0 : index
      %c0_23 = arith.constant 0 : index
      %34 = vector.load %arg4[%c0_22, %c0_23] : memref<1x8xf32, #tpu.memory_space<vmem>>, vector<1x8xf32>
      tpu.vector_store %arg4[%c0_22, %c0_23], %33 {strides = array<i32>} : memref<1x8xf32, #tpu.memory_space<vmem>>, vector<1x8xf32>,
      %c0_24 = arith.constant 0 : index
      %c0_25 = arith.constant 0 : index
      %35 = vector.load %arg3[%c0_24, %c0_25] : memref<1x8xf32, #tpu.memory_space<vmem>>, vector<1x8xf32>
      %36 = arith.mulf %21, %33 : vector<1x8xf32>
      %37 = arith.subf %35, %36 : vector<1x8xf32>
      %c0_26 = arith.constant 0 : index
      %c0_27 = arith.constant 0 : index
      %38 = vector.load %arg5[%c0_26, %c0_27] : memref<1x8xf32, #tpu.memory_space<vmem>>, vector<1x8xf32>
      tpu.vector_store %arg5[%c0_26, %c0_27], %37 {strides = array<i32>} : memref<1x8xf32, #tpu.memory_space<vmem>>, vector<1x8xf32>,
    } else {
    }
    return
  }
  func.func @transform_0(%arg0: i32) -> (i32, i32) {
    %c0_i32 = arith.constant 0 : i32
    %c0_i32_0 = arith.constant 0 : i32
    return %arg0, %c0_i32 : i32, i32
  }
  func.func @transform_1(%arg0: i32) -> (i32, i32) {
    %c0_i32 = arith.constant 0 : i32
    %c0_i32_0 = arith.constant 0 : i32
    %c0_i32_1 = arith.constant 0 : i32
    return %c0_i32, %c0_i32_0 : i32, i32
  }
  func.func @transform_2(%arg0: i32) -> (i32, i32) {
    %c0_i32 = arith.constant 0 : i32
    %c0_i32_0 = arith.constant 0 : i32
    %c0_i32_1 = arith.constant 0 : i32
    return %c0_i32, %c0_i32_0 : i32, i32
  }
  func.func @transform_3(%arg0: i32) -> (i32, i32) {
    %c0_i32 = arith.constant 0 : i32
    %c0_i32_0 = arith.constant 0 : i32
    %c0_i32_1 = arith.constant 0 : i32
    return %c0_i32, %c0_i32_0 : i32, i32
  }
  func.func @transform_4(%arg0: i32) -> (i32, i32) {
    %c0_i32 = arith.constant 0 : i32
    %c0_i32_0 = arith.constant 0 : i32
    %c0_i32_1 = arith.constant 0 : i32
    return %c0_i32, %c0_i32_0 : i32, i32
  }
}

module attributes {stable_mosaic.version = 11 : i64} {
  func.func @_bn_apply_concat_kernel(%arg0: i32, %arg1: memref<256x8xbf16, #tpu.memory_space<vmem>>, %arg2: memref<1x8xf32, #tpu.memory_space<vmem>>, %arg3: memref<1x8xf32, #tpu.memory_space<vmem>>, %arg4: memref<256x8xbf16, #tpu.memory_space<vmem>>, %arg5: memref<256x16xbf16, #tpu.memory_space<vmem>>) attributes {dimension_semantics = [#tpu.dimension_semantics<parallel>], iteration_bounds = array<i64: 2>, scalar_prefetch = 0 : i64, scratch_operands = 0 : i64, tpu.core_type = #tpu.core_type<tc>, window_params = [{transform_indices = @transform_0, window_bounds = array<i64: 256, 8>}, {pipeline_mode = #tpu.pipeline_mode<synchronous>, transform_indices = @transform_1, window_bounds = array<i64: 1, 8>}, {pipeline_mode = #tpu.pipeline_mode<synchronous>, transform_indices = @transform_2, window_bounds = array<i64: 1, 8>}, {transform_indices = @transform_3, window_bounds = array<i64: 256, 8>}, {transform_indices = @transform_4, window_bounds = array<i64: 256, 16>}]} {
    %c0 = arith.constant 0 : index
    %c0_0 = arith.constant 0 : index
    %0 = vector.load %arg1[%c0, %c0_0] : memref<256x8xbf16, #tpu.memory_space<vmem>>, vector<256x8xbf16>
    %1 = arith.extf %0 : vector<256x8xbf16> to vector<256x8xf32>
    %c0_1 = arith.constant 0 : index
    %c0_2 = arith.constant 0 : index
    %2 = vector.load %arg2[%c0_1, %c0_2] : memref<1x8xf32, #tpu.memory_space<vmem>>, vector<1x8xf32>
    %3 = vector.broadcast %2 : vector<1x8xf32> to vector<256x8xf32>
    %4 = arith.mulf %1, %3 : vector<256x8xf32>
    %c0_3 = arith.constant 0 : index
    %c0_4 = arith.constant 0 : index
    %5 = vector.load %arg3[%c0_3, %c0_4] : memref<1x8xf32, #tpu.memory_space<vmem>>, vector<1x8xf32>
    %6 = vector.broadcast %5 : vector<1x8xf32> to vector<256x8xf32>
    %7 = arith.addf %4, %6 : vector<256x8xf32>
    %c0_5 = arith.constant 0 : index
    %c0_6 = arith.constant 0 : index
    %8 = vector.load %arg4[%c0_5, %c0_6] : memref<256x8xbf16, #tpu.memory_space<vmem>>, vector<256x8xbf16>
    %9 = arith.extf %8 : vector<256x8xbf16> to vector<256x8xf32>
    %10 = tpu.concatenate %7, %9 in 1 : vector<256x8xf32>, vector<256x8xf32> -> vector<256x16xf32>
    %11 = arith.truncf %10 : vector<256x16xf32> to vector<256x16xbf16>
    %c0_7 = arith.constant 0 : index
    %c0_8 = arith.constant 0 : index
    %12 = vector.load %arg5[%c0_7, %c0_8] : memref<256x16xbf16, #tpu.memory_space<vmem>>, vector<256x16xbf16>
    tpu.vector_store %arg5[%c0_7, %c0_8], %11 {strides = array<i32>} : memref<256x16xbf16, #tpu.memory_space<vmem>>, vector<256x16xbf16>,
    return
  }
  func.func @transform_0(%arg0: i32) -> (i32, i32) {
    %c0_i32 = arith.constant 0 : i32
    %c0_i32_0 = arith.constant 0 : i32
    return %arg0, %c0_i32 : i32, i32
  }
  func.func @transform_1(%arg0: i32) -> (i32, i32) {
    %c0_i32 = arith.constant 0 : i32
    %c0_i32_0 = arith.constant 0 : i32
    %c0_i32_1 = arith.constant 0 : i32
    return %c0_i32, %c0_i32_0 : i32, i32
  }
  func.func @transform_2(%arg0: i32) -> (i32, i32) {
    %c0_i32 = arith.constant 0 : i32
    %c0_i32_0 = arith.constant 0 : i32
    %c0_i32_1 = arith.constant 0 : i32
    return %c0_i32, %c0_i32_0 : i32, i32
  }
  func.func @transform_3(%arg0: i32) -> (i32, i32) {
    %c0_i32 = arith.constant 0 : i32
    %c0_i32_0 = arith.constant 0 : i32
    return %arg0, %c0_i32 : i32, i32
  }
  func.func @transform_4(%arg0: i32) -> (i32, i32) {
    %c0_i32 = arith.constant 0 : i32
    %c0_i32_0 = arith.constant 0 : i32
    return %arg0, %c0_i32 : i32, i32
  }
}

module attributes {stable_mosaic.version = 11 : i64} {
  func.func @_mm_kernel(%arg0: i32, %arg1: i32, %arg2: i32, %arg3: i32, %arg4: memref<1x256x128xbf16, #tpu.memory_space<vmem>>, %arg5: memref<1x128x128xbf16, #tpu.memory_space<vmem>>, %arg6: memref<1x128xf32, #tpu.memory_space<vmem>>, %arg7: memref<1x256x128xf32, #tpu.memory_space<vmem>>, %arg8: memref<256x128xf32, #tpu.memory_space<vmem>>) attributes {dimension_semantics = [#tpu.dimension_semantics<parallel>, #tpu.dimension_semantics<parallel>, #tpu.dimension_semantics<parallel>, #tpu.dimension_semantics<arbitrary>], iteration_bounds = array<i64: 4, 2, 1, 1>, scalar_prefetch = 0 : i64, scratch_operands = 1 : i64, tpu.core_type = #tpu.core_type<tc>, window_params = [{transform_indices = @transform_0, window_bounds = array<i64: 1, 256, 128>}, {transform_indices = @transform_1, window_bounds = array<i64: 1, 128, 128>}, {transform_indices = @transform_2, window_bounds = array<i64: 1, 128>}, {transform_indices = @transform_3, window_bounds = array<i64: 1, 256, 128>}]} {
    %c0_i32 = arith.constant 0 : i32
    %0 = arith.cmpi eq, %arg3, %c0_i32 : i32
    %1 = arith.extui %0 : i1 to i32
    %c0_i32_0 = arith.constant 0 : i32
    %2 = arith.cmpi ne, %1, %c0_i32_0 : i32
    scf.if %2 {
      %cst_12 = arith.constant 0.000000e+00 : f32
      %14 = vector.broadcast %cst_12 : f32 to vector<256x128xf32>
      %c0_13 = arith.constant 0 : index
      %c0_14 = arith.constant 0 : index
      %15 = vector.load %arg8[%c0_13, %c0_14] : memref<256x128xf32, #tpu.memory_space<vmem>>, vector<256x128xf32>
      tpu.vector_store %arg8[%c0_13, %c0_14], %14 {strides = array<i32>} : memref<256x128xf32, #tpu.memory_space<vmem>>, vector<256x128xf32>,
    } else {
    }
    %c0 = arith.constant 0 : index
    %c0_1 = arith.constant 0 : index
    %3 = vector.load %arg8[%c0, %c0_1] : memref<256x128xf32, #tpu.memory_space<vmem>>, vector<256x128xf32>
    %c0_2 = arith.constant 0 : index
    %c0_3 = arith.constant 0 : index
    %c0_4 = arith.constant 0 : index
    %4 = vector.load %arg4[%c0_2, %c0_3, %c0_4] : memref<1x256x128xbf16, #tpu.memory_space<vmem>>, vector<1x256x128xbf16>
    %5 = vector.shape_cast %4 : vector<1x256x128xbf16> to vector<256x128xbf16>
    %c0_5 = arith.constant 0 : index
    %c0_6 = arith.constant 0 : index
    %c0_7 = arith.constant 0 : index
    %6 = vector.load %arg5[%c0_5, %c0_6, %c0_7] : memref<1x128x128xbf16, #tpu.memory_space<vmem>>, vector<1x128x128xbf16>
    %7 = vector.shape_cast %6 : vector<1x128x128xbf16> to vector<128x128xbf16>
    %cst = arith.constant dense<0.000000e+00> : vector<256x128xf32>
    %8 = tpu.matmul %5, %7, %cst {dimension_numbers = #tpu.dot_dimension_numbers<[1], [0], [0], [1], [0, 0, 1, 1], [], []>} : vector<256x128xbf16>, vector<128x128xbf16>, vector<256x128xf32> -> vector<256x128xf32>
    %9 = arith.addf %3, %8 : vector<256x128xf32>
    %c0_8 = arith.constant 0 : index
    %c0_9 = arith.constant 0 : index
    %10 = vector.load %arg8[%c0_8, %c0_9] : memref<256x128xf32, #tpu.memory_space<vmem>>, vector<256x128xf32>
    tpu.vector_store %arg8[%c0_8, %c0_9], %9 {strides = array<i32>} : memref<256x128xf32, #tpu.memory_space<vmem>>, vector<256x128xf32>,
    %c0_i32_10 = arith.constant 0 : i32
    %11 = arith.cmpi eq, %arg3, %c0_i32_10 : i32
    %12 = arith.extui %11 : i1 to i32
    %c0_i32_11 = arith.constant 0 : i32
    %13 = arith.cmpi ne, %12, %c0_i32_11 : i32
    scf.if %13 {
      %c0_12 = arith.constant 0 : index
      %c0_13 = arith.constant 0 : index
      %14 = vector.load %arg8[%c0_12, %c0_13] : memref<256x128xf32, #tpu.memory_space<vmem>>, vector<256x128xf32>
      %c0_14 = arith.constant 0 : index
      %c0_15 = arith.constant 0 : index
      %15 = vector.load %arg6[%c0_14, %c0_15] : memref<1x128xf32, #tpu.memory_space<vmem>>, vector<1x128xf32>
      %16 = vector.broadcast %15 : vector<1x128xf32> to vector<256x128xf32>
      %17 = arith.addf %14, %16 : vector<256x128xf32>
      %18 = math.tanh %17 : vector<256x128xf32>
      %c0_16 = arith.constant 0 : index
      %c0_17 = arith.constant 0 : index
      %c0_18 = arith.constant 0 : index
      %19 = vector.load %arg7[%c0_16, %c0_17, %c0_18] : memref<1x256x128xf32, #tpu.memory_space<vmem>>, vector<1x256x128xf32>
      %20 = vector.shape_cast %19 : vector<1x256x128xf32> to vector<256x128xf32>
      %21 = vector.shape_cast %18 : vector<256x128xf32> to vector<1x256x128xf32>
      tpu.vector_store %arg7[%c0_16, %c0_17, %c0_18], %21 {strides = array<i32>} : memref<1x256x128xf32, #tpu.memory_space<vmem>>, vector<1x256x128xf32>,
    } else {
    }
    return
  }
  func.func @transform_0(%arg0: i32, %arg1: i32, %arg2: i32, %arg3: i32) -> (i32, i32, i32) {
    %c0_i32 = arith.constant 0 : i32
    return %arg0, %arg1, %arg3 : i32, i32, i32
  }
  func.func @transform_1(%arg0: i32, %arg1: i32, %arg2: i32, %arg3: i32) -> (i32, i32, i32) {
    %c0_i32 = arith.constant 0 : i32
    return %arg0, %arg3, %arg2 : i32, i32, i32
  }
  func.func @transform_2(%arg0: i32, %arg1: i32, %arg2: i32, %arg3: i32) -> (i32, i32) {
    %c0_i32 = arith.constant 0 : i32
    %c0_i32_0 = arith.constant 0 : i32
    return %c0_i32, %arg2 : i32, i32
  }
  func.func @transform_3(%arg0: i32, %arg1: i32, %arg2: i32, %arg3: i32) -> (i32, i32, i32) {
    %c0_i32 = arith.constant 0 : i32
    return %arg0, %arg1, %arg2 : i32, i32, i32
  }
}

</mosaic_0001>

<bundles_post_ra>
// kernel: _lambda_.48
= control target key start
LH: loop header
LB: loop body
LE: loop exit
PB: predicated region body
PF: predicated region fallthrough
CT: control target
= control target key end

     0   :  { %s1543_s12 = smov 0   ;;  %s1545_s13 = smov 0   ;;  %s1680_s0 = inlined_call_operand.vmem [shape: bf16[1,512,128], index: 0, kind: input, shape index: {}]   ;;  %s1681_s1 = inlined_call_operand.vmem [shape: bf16[1,128,128], index: 1, kind: input, shape index: {}]   ;;  %s1682_s2 = inlined_call_operand.vmem [shape: f32[1,128], index: 2, kind: input, shape index: {}]   ;;  %s1683_s3 = inlined_call_operand.vmem [shape: bf16[1,512,128], index: 3, kind: output, shape index: {}]  }
   0x1   :  { %s1547_s14 = smov 0  }
   0x2 LB: > { %s35_s15 = sadd.s32 1, %s1517_s13  ;;  %p1172_p0 = scmp.ge.s32.totalorder %s1521_s14, 1  ;;  %s1521_s14 = sphi %s1547_s14, %s13_s14   ;;  %s1517_s13 = sphi %s1545_s13, %s1685_s13   ;;  %s1513_s12 = sphi %s1543_s12, %s1684_s12  }
   0x3   : > { %p37_p1 = scmp.ge.s32.totalorder %s35_s15, 2  ;;  %p209_p2 = scmp.lt.s32.totalorder %s1521_s14, 3 }
   0x5   : > { %s1687_s15 = smov (%p37_p1, %s35_s15), 0  ;;  %p210_p3 = pnand %p1172_p0, %p209_p2 }
   0x6   : > { %s1173_s18 = sshll.u32 (!%p210_p3), %s1513_s12, 5 }
   0x7   : > { %213 = sbr.rel (%p210_p3) target bundleno = 273 (0x111), region = 32  ;;  %p265_p4 = scmp.lt.s32.totalorder (!%p210_p3), %s1173_s18, 63 }
   0xc   : > { %v1475_v0 = vld [vmem:[%s1681_s1 + $0x38] sm:$0xff]   ;;  %v1476_v1 = vld [vmem:[%s1681_s1 + $0x30] sm:$0xff]   ;;  %s1689_s18 = smov (!%p265_p4, %s1173_s18), 63  ;;  %v1477_v2 = vld [vmem:[%s1681_s1 + $0x28] sm:$0xff]  }
   0xd   : > { %1387 = vmatprep.subr.bf16.mxu0 %v1475_v0  ;;  %1435 = vmatprep.subr.bf16.mxu1 %v1475_v0  ;;  %s1174_s23 = sshll.u32 %s1689_s18, 2  ;;  %v1478_v3 = vld [vmem:[%s1681_s1 + $0x20] sm:$0xff]   ;;  %v1479_v6 = vld [vmem:[%s1681_s1 + $0x18] sm:$0xff]   ;;  %v1480_v7 = vld [vmem:[%s1681_s1 + $0x10] sm:$0xff]  }
   0xe   : > { %1388 = vmatpush3.bf16.msra.mxu0 %v1475_v0  ;;  %1443 = vmatpush3.bf16.msra.mxu1 %v1475_v0  ;;  %s1578_s26 = scalar_lea.vmem %s1680_s0, %s1174_s23  ;;  %v1481_v8 = vld [vmem:[%s1681_s1 + $0x8] sm:$0xff]   ;;  %v1482_v9 = vld [vmem:[%s1681_s1] sm:$0xff]   ;;  %s1627_s17 = scalar_lea.vmem %s1683_s3, %s1174_s23 }
   0xf   : > { %1389 = vmatprep.subr.bf16.mxu0 %v1476_v1  ;;  %1436 = vmatprep.subr.bf16.mxu1 %v1476_v1  ;;  %v1483_v4 = vld [vmem:[%s1578_s26] sm:$0xff]   ;;  %v1485_v10 = vld [vmem:[%s1578_s26 + $0x8] sm:$0xff]   ;;  %v1487_v12 = vld [vmem:[%s1578_s26 + $0x10] sm:$0xff]  }
  0x10   : > { %v1484_v5 = vld [vmem:[%s1578_s26 + $0x40] sm:$0xff]   ;;  %1403 = vmatprep.mubr.bf16.mxu0 %v1483_v4  ;;  %v1486_v11 = vld [vmem:[%s1578_s26 + $0x48] sm:$0xff]   ;;  %v1488_v13 = vld [vmem:[%s1578_s26 + $0x50] sm:$0xff]  }
  0x11   : > { %1419 = vmatprep.mubr.bf16.mxu1 %v1484_v5  ;;  %v1489_v14 = vld [vmem:[%s1578_s26 + $0x18] sm:$0xff]   ;;  %v1491_v16 = vld [vmem:[%s1578_s26 + $0x20] sm:$0xff]   ;;  %v1493_v18 = vld [vmem:[%s1578_s26 + $0x28] sm:$0xff]  }
  0x12   : > { %1390 = vmatpush3.bf16.msra.mxu0 %v1476_v1  ;;  %1444 = vmatpush3.bf16.msra.mxu1 %v1476_v1  ;;  %v1490_v15 = vld [vmem:[%s1578_s26 + $0x58] sm:$0xff]   ;;  %v1492_v17 = vld [vmem:[%s1578_s26 + $0x60] sm:$0xff]   ;;  %v1494_v19 = vld [vmem:[%s1578_s26 + $0x68] sm:$0xff]  }
  0x13   : > { %1391 = vmatprep.subr.bf16.mxu0 %v1477_v2  ;;  %1437 = vmatprep.subr.bf16.mxu1 %v1477_v2  ;;  %v1495_v20 = vld [vmem:[%s1578_s26 + $0x30] sm:$0xff]   ;;  %v1497_v22 = vld [vmem:[%s1578_s26 + $0x38] sm:$0xff]   ;;  %v1614_v26 = vld [vmem:[%s1682_s2] ss:$0 sm:$0xff] }
  0x14   : > { %v1496_v21 = vld [vmem:[%s1578_s26 + $0x70] sm:$0xff]   ;;  %v1498_v23 = vld [vmem:[%s1578_s26 + $0x78] sm:$0xff]  }
  0x16   : > { %1392 = vmatpush3.bf16.msra.mxu0 %v1477_v2  ;;  %1445 = vmatpush3.bf16.msra.mxu1 %v1477_v2 }
  0x17   : > { %1393 = vmatprep.subr.bf16.mxu0 %v1478_v3  ;;  %1438 = vmatprep.subr.bf16.mxu1 %v1478_v3 }
  0x1a   : > { %1394 = vmatpush3.bf16.msra.mxu0 %v1478_v3  ;;  %1446 = vmatpush3.bf16.msra.mxu1 %v1478_v3 }
  0x1b   : > { %1395 = vmatprep.subr.bf16.mxu0 %v1479_v6  ;;  %1439 = vmatprep.subr.bf16.mxu1 %v1479_v6 }
  0x1e   : > { %1396 = vmatpush3.bf16.msra.mxu0 %v1479_v6  ;;  %1447 = vmatpush3.bf16.msra.mxu1 %v1479_v6 }
  0x1f   : > { %1397 = vmatprep.subr.bf16.mxu0 %v1480_v7  ;;  %1440 = vmatprep.subr.bf16.mxu1 %v1480_v7 }
  0x22   : > { %1398 = vmatpush3.bf16.msra.mxu0 %v1480_v7  ;;  %1448 = vmatpush3.bf16.msra.mxu1 %v1480_v7 }
  0x23   : > { %1399 = vmatprep.subr.bf16.mxu0 %v1481_v8  ;;  %1441 = vmatprep.subr.bf16.mxu1 %v1481_v8 }
  0x26   : > { %1400 = vmatpush3.bf16.msra.mxu0 %v1481_v8  ;;  %1449 = vmatpush3.bf16.msra.mxu1 %v1481_v8 }
  0x27   : > { %1401 = vmatprep.subr.bf16.mxu0 %v1482_v9  ;;  %1442 = vmatprep.subr.bf16.mxu1 %v1482_v9 }
  0x2a   : > { %1402 = vmatpush3.bf16.msra.mxu0 %v1482_v9  ;;  %1450 = vmatpush3.bf16.msra.mxu1 %v1482_v9 }
  0x2d   : > { %1404 = vmatmul.mubr.bf16.vlgmr.msra.gmra.mxu0 %v1485_v10  ;;  %1420 = vmatmul.mubr.bf16.vlgmr.msra.gmra.mxu1 %v1486_v11 }
  0x2e   : > { %1407 = vmatprep.mubr.bf16.mxu0 %v1487_v12  ;;  %1423 = vmatprep.mubr.bf16.mxu1 %v1488_v13 }
  0x35   : > { %1408 = vmatmul.mubr.bf16.gmra.mxu0 %v1489_v14  ;;  %1424 = vmatmul.mubr.bf16.gmra.mxu1 %v1490_v15 }
  0x36   : > { %1411 = vmatprep.mubr.bf16.mxu0 %v1491_v16  ;;  %1427 = vmatprep.mubr.bf16.mxu1 %v1492_v17 }
  0x3d   : > { %1412 = vmatmul.mubr.bf16.gmra.mxu0 %v1493_v18  ;;  %1428 = vmatmul.mubr.bf16.gmra.mxu1 %v1494_v19 }
  0x3e   : > { %1415 = vmatprep.mubr.bf16.mxu0 %v1495_v20  ;;  %1431 = vmatprep.mubr.bf16.mxu1 %v1496_v21 }
  0x45   : > { %1416 = vmatmul.mubr.bf16.gmra.mxu0 %v1497_v22  ;;  %1432 = vmatmul.mubr.bf16.gmra.mxu1 %v1498_v23 }
  0xed   : > { %v1405_v24 = vpop.f32.mrf.mxu0  ;;  %v1421_v25 = vpop.f32.mrf.mxu1 }
  0xee   : > { %v834_v31 = vadd.f32 %v1405_v24, %v1614_v26  ;;  %v850_v32 = vadd.f32 %v1421_v25, %v1614_v26 }
  0xef   : > { %v599_v27 = vpop.f32.mrf.mxu0  ;;  %v663_v28 = vpop.f32.mrf.mxu1 }
  0xf0   : > { %v832_v35 = vadd.f32 %v1614_v26, %v599_v27  ;;  %v848_v36 = vadd.f32 %v1614_v26, %v663_v28 }
  0xf1   : > { %v1406_v29 = vpop.f32.mrf.mxu0  ;;  %v1422_v30 = vpop.f32.mrf.mxu1 }
  0xf2   : > { %v835_v33 = vadd.f32 %v1406_v29, %v1614_v26  ;;  %v851_v34 = vadd.f32 %v1422_v30, %v1614_v26 }
  0xf3   : > { %v602_v37 = vpop.f32.mrf.mxu0  ;;  %v666_v38 = vpop.f32.mrf.mxu1 }
  0xf4   : > { %v1276_v39 = vpack.c.bf16 %v835_v33, %v834_v31  ;;  %v1316_v40 = vpack.c.bf16 %v851_v34, %v850_v32  ;;  %v833_v41 = vadd.f32 %v1614_v26, %v602_v37  ;;  %v849_v42 = vadd.f32 %v1614_v26, %v666_v38 }
  0xf5   : > { %v1409_v43 = vpop.f32.mrf.mxu0  ;;  %v1425_v44 = vpop.f32.mrf.mxu1 }
  0xf6   : > { %1348 = vst [vmem:[%s1627_s17 + $0x8] sm:$0xff] %v1276_v39   ;;  %1356 = vst [vmem:[%s1627_s17 + $0x48] sm:$0xff] %v1316_v40   ;;  %v1271_v45 = vpack.c.bf16 %v833_v41, %v832_v35  ;;  %v1311_v46 = vpack.c.bf16 %v849_v42, %v848_v36  ;;  %v838_v51 = vadd.f32 %v1409_v43, %v1614_v26 }
  0xf7   : > { %v615_v47 = vpop.f32.mrf.mxu0  ;;  %v679_v48 = vpop.f32.mrf.mxu1  ;;  %v854_v52 = vadd.f32 %v1425_v44, %v1614_v26 }
  0xf8   : > { %1272 = vst [vmem:[%s1627_s17] sm:$0xff] %v1271_v45   ;;  %1355 = vst [vmem:[%s1627_s17 + $0x40] sm:$0xff] %v1311_v46   ;;  %v836_v55 = vadd.f32 %v1614_v26, %v615_v47  ;;  %v852_v56 = vadd.f32 %v1614_v26, %v679_v48 }
  0xf9   : > { %v1410_v49 = vpop.f32.mrf.mxu0  ;;  %v1426_v50 = vpop.f32.mrf.mxu1 }
  0xfa   : > { %v839_v53 = vadd.f32 %v1410_v49, %v1614_v26  ;;  %v855_v54 = vadd.f32 %v1426_v50, %v1614_v26 }
  0xfb   : > { %v618_v57 = vpop.f32.mrf.mxu0  ;;  %v682_v58 = vpop.f32.mrf.mxu1 }
  0xfc   : > { %v1286_v59 = vpack.c.bf16 %v839_v53, %v838_v51  ;;  %v1326_v60 = vpack.c.bf16 %v855_v54, %v854_v52  ;;  %v837_v61 = vadd.f32 %v1614_v26, %v618_v57  ;;  %v853_v62 = vadd.f32 %v1614_v26, %v682_v58 }
  0xfd   : > { %v1413_v63 = vpop.f32.mrf.mxu0  ;;  %v1429_v0 = vpop.f32.mrf.mxu1 }
  0xfe   : > { %1350 = vst [vmem:[%s1627_s17 + $0x18] sm:$0xff] %v1286_v59   ;;  %1358 = vst [vmem:[%s1627_s17 + $0x58] sm:$0xff] %v1326_v60   ;;  %v1281_v1 = vpack.c.bf16 %v837_v61, %v836_v55  ;;  %v1321_v2 = vpack.c.bf16 %v853_v62, %v852_v56  ;;  %v842_v7 = vadd.f32 %v1413_v63, %v1614_v26 }
  0xff   : > { %v631_v3 = vpop.f32.mrf.mxu0  ;;  %v695_v4 = vpop.f32.mrf.mxu1  ;;  %v858_v8 = vadd.f32 %v1429_v0, %v1614_v26 }
 0x100   : > { %1349 = vst [vmem:[%s1627_s17 + $0x10] sm:$0xff] %v1281_v1   ;;  %1357 = vst [vmem:[%s1627_s17 + $0x50] sm:$0xff] %v1321_v2   ;;  %v840_v11 = vadd.f32 %v1614_v26, %v631_v3  ;;  %v856_v12 = vadd.f32 %v1614_v26, %v695_v4 }
 0x101   : > { %v1414_v5 = vpop.f32.mrf.mxu0  ;;  %v1430_v6 = vpop.f32.mrf.mxu1 }
 0x102   : > { %v843_v9 = vadd.f32 %v1414_v5, %v1614_v26  ;;  %v859_v10 = vadd.f32 %v1430_v6, %v1614_v26 }
 0x103   : > { %v634_v13 = vpop.f32.mrf.mxu0  ;;  %v698_v14 = vpop.f32.mrf.mxu1 }
 0x104   : > { %v1296_v15 = vpack.c.bf16 %v843_v9, %v842_v7  ;;  %v1336_v16 = vpack.c.bf16 %v859_v10, %v858_v8  ;;  %v841_v17 = vadd.f32 %v1614_v26, %v634_v13  ;;  %v857_v18 = vadd.f32 %v1614_v26, %v698_v14 }
 0x105   : > { %v1417_v19 = vpop.f32.mrf.mxu0  ;;  %v1433_v20 = vpop.f32.mrf.mxu1 }
 0x106   : > { %1352 = vst [vmem:[%s1627_s17 + $0x28] sm:$0xff] %v1296_v15   ;;  %1360 = vst [vmem:[%s1627_s17 + $0x68] sm:$0xff] %v1336_v16   ;;  %v1291_v21 = vpack.c.bf16 %v841_v17, %v840_v11  ;;  %v1331_v22 = vpack.c.bf16 %v857_v18, %v856_v12  ;;  %v846_v28 = vadd.f32 %v1417_v19, %v1614_v26 }
 0x107   : > { %v647_v23 = vpop.f32.mrf.mxu0  ;;  %v711_v24 = vpop.f32.mrf.mxu1  ;;  %v862_v29 = vadd.f32 %v1433_v20, %v1614_v26 }
 0x108   : > { %1351 = vst [vmem:[%s1627_s17 + $0x20] sm:$0xff] %v1291_v21   ;;  %1359 = vst [vmem:[%s1627_s17 + $0x60] sm:$0xff] %v1331_v22   ;;  %v844_v32 = vadd.f32 %v1614_v26, %v647_v23  ;;  %v860_v33 = vadd.f32 %v1614_v26, %v711_v24 }
 0x109   : > { %v1418_v25 = vpop.f32.mrf.mxu0  ;;  %v1434_v27 = vpop.f32.mrf.mxu1 }
 0x10a   : > { %v847_v30 = vadd.f32 %v1418_v25, %v1614_v26  ;;  %v863_v31 = vadd.f32 %v1434_v27, %v1614_v26 }
 0x10b   : > { %v650_v34 = vpop.f32.mrf.mxu0  ;;  %v714_v35 = vpop.f32.mrf.mxu1 }
 0x10c   : > { %v1306_v36 = vpack.c.bf16 %v847_v30, %v846_v28  ;;  %v1346_v37 = vpack.c.bf16 %v863_v31, %v862_v29  ;;  %v845_v38 = vadd.f32 %v1614_v26, %v650_v34  ;;  %v861_v39 = vadd.f32 %v1614_v26, %v714_v35 }
 0x10e   : > { %1354 = vst [vmem:[%s1627_s17 + $0x38] sm:$0xff] %v1306_v36   ;;  %1362 = vst [vmem:[%s1627_s17 + $0x78] sm:$0xff] %v1346_v37   ;;  %v1301_v40 = vpack.c.bf16 %v845_v38, %v844_v32  ;;  %v1341_v41 = vpack.c.bf16 %v861_v39, %v860_v33 }
 0x110   : > { %1353 = vst [vmem:[%s1627_s17 + $0x30] sm:$0xff] %v1301_v40   ;;  %1361 = vst [vmem:[%s1627_s17 + $0x70] sm:$0xff] %v1341_v41  }
 0x111 PF: > { %s13_s14 = sadd.s32 1, %s1521_s14   ;;  %s1684_s12 = smov %s1517_s13 }
 0x112   : > { %p10_p5 = scmp.ge.s32.totalorder %s13_s14, 4   ;;  %s1685_s13 = smov %s1687_s15 }
 0x114   :  { %12 = sbr.rel (!%p10_p5) target bundleno = 2 (0x2), region = 76 }

// kernel: _lambda_.49
= control target key start
LH: loop header
LB: loop body
LE: loop exit
PB: predicated region body
PF: predicated region fallthrough
CT: control target
= control target key end

     0   :  { %s907_s12 = smov 0   ;;  %s909_s13 = smov 0   ;;  %s980_s0 = inlined_call_operand.vmem [shape: bf16[1,128,128], index: 0, kind: input, shape index: {}]   ;;  %s981_s1 = inlined_call_operand.vmem [shape: bf16[1,128,128], index: 1, kind: input, shape index: {}]   ;;  %s982_s2 = inlined_call_operand.vmem [shape: f32[1,128], index: 2, kind: input, shape index: {}]   ;;  %s983_s3 = inlined_call_operand.vmem [shape: bf16[1,128,128], index: 3, kind: output, shape index: {}]  }
   0x1   :  { %s911_s14 = smov 0  }
   0x2 LB: > { %s35_s15 = sadd.s32 1, %s881_s13  ;;  %p716_p0 = scmp.ge.s32.totalorder %s885_s14, 1  ;;  %s885_s14 = sphi %s911_s14, %s13_s14   ;;  %s881_s13 = sphi %s909_s13, %s985_s13   ;;  %s877_s12 = sphi %s907_s12, %s984_s12  }
   0x3   : > { %p37_p1 = scmp.ge.s32.totalorder %s35_s15, 2  ;;  %p209_p2 = scmp.lt.s32.totalorder %s885_s14, 3 }
   0x5   : > { %s987_s15 = smov (%p37_p1, %s35_s15), 0  ;;  %p210_p3 = pnand %p716_p0, %p209_p2 }
   0x6   : > { %s717_s18 = sshll.u32 (!%p210_p3), %s877_s12, 3 }
   0x7   : > { %213 = sbr.rel (%p210_p3) target bundleno = 249 (0xf9), region = 32  ;;  %p265_p4 = scmp.lt.s32.totalorder (!%p210_p3), %s717_s18, 15 }
   0xc   : > { %v851_v0 = vld [vmem:[%s981_s1 + $0x38] sm:$0xff]   ;;  %v852_v1 = vld [vmem:[%s981_s1 + $0x30] sm:$0xff]   ;;  %s989_s18 = smov (!%p265_p4, %s717_s18), 15  ;;  %v853_v2 = vld [vmem:[%s981_s1 + $0x28] sm:$0xff]  }
   0xd   : > { %787 = vmatprep.subr.bf16.mxu0 %v851_v0  ;;  %811 = vmatprep.subr.bf16.mxu1 %v851_v0  ;;  %s718_s23 = sshll.u32 %s989_s18, 2  ;;  %v854_v3 = vld [vmem:[%s981_s1 + $0x20] sm:$0xff]   ;;  %v855_v6 = vld [vmem:[%s981_s1 + $0x18] sm:$0xff]   ;;  %v856_v7 = vld [vmem:[%s981_s1 + $0x10] sm:$0xff]  }
   0xe   : > { %788 = vmatpush3.bf16.msra.mxu0 %v851_v0  ;;  %819 = vmatpush3.bf16.msra.mxu1 %v851_v0  ;;  %s942_s26 = scalar_lea.vmem %s980_s0, %s718_s23  ;;  %v857_v8 = vld [vmem:[%s981_s1 + $0x8] sm:$0xff]   ;;  %v858_v9 = vld [vmem:[%s981_s1] sm:$0xff]   ;;  %s302_s17 = scalar_lea.vmem %s983_s3, %s718_s23 }
   0xf   : > { %789 = vmatprep.subr.bf16.mxu0 %v852_v1  ;;  %812 = vmatprep.subr.bf16.mxu1 %v852_v1  ;;  %v859_v4 = vld [vmem:[%s942_s26] sm:$0xff]   ;;  %v860_v5 = vld [vmem:[%s942_s26 + $0x10] sm:$0xff]   ;;  %v861_v10 = vld [vmem:[%s942_s26 + $0x8] sm:$0xff]  }
  0x10   : > { %803 = vmatprep.mubr.bf16.mxu0 %v859_v4  ;;  %807 = vmatprep.mubr.bf16.mxu1 %v860_v5  ;;  %v862_v11 = vld [vmem:[%s942_s26 + $0x18] sm:$0xff]   ;;  %v733_v14 = vld [vmem:[%s982_s2] ss:$0 sm:$0xff] }
  0x12   : > { %790 = vmatpush3.bf16.msra.mxu0 %v852_v1  ;;  %820 = vmatpush3.bf16.msra.mxu1 %v852_v1 }
  0x13   : > { %791 = vmatprep.subr.bf16.mxu0 %v853_v2  ;;  %813 = vmatprep.subr.bf16.mxu1 %v853_v2 }
  0x16   : > { %792 = vmatpush3.bf16.msra.mxu0 %v853_v2  ;;  %821 = vmatpush3.bf16.msra.mxu1 %v853_v2 }
  0x17   : > { %793 = vmatprep.subr.bf16.mxu0 %v854_v3  ;;  %814 = vmatprep.subr.bf16.mxu1 %v854_v3 }
  0x1a   : > { %794 = vmatpush3.bf16.msra.mxu0 %v854_v3  ;;  %822 = vmatpush3.bf16.msra.mxu1 %v854_v3 }
  0x1b   : > { %795 = vmatprep.subr.bf16.mxu0 %v855_v6  ;;  %815 = vmatprep.subr.bf16.mxu1 %v855_v6 }
  0x1e   : > { %796 = vmatpush3.bf16.msra.mxu0 %v855_v6  ;;  %823 = vmatpush3.bf16.msra.mxu1 %v855_v6 }
  0x1f   : > { %797 = vmatprep.subr.bf16.mxu0 %v856_v7  ;;  %816 = vmatprep.subr.bf16.mxu1 %v856_v7 }
  0x22   : > { %798 = vmatpush3.bf16.msra.mxu0 %v856_v7  ;;  %824 = vmatpush3.bf16.msra.mxu1 %v856_v7 }
  0x23   : > { %799 = vmatprep.subr.bf16.mxu0 %v857_v8  ;;  %817 = vmatprep.subr.bf16.mxu1 %v857_v8 }
  0x26   : > { %800 = vmatpush3.bf16.msra.mxu0 %v857_v8  ;;  %825 = vmatpush3.bf16.msra.mxu1 %v857_v8 }
  0x27   : > { %801 = vmatprep.subr.bf16.mxu0 %v858_v9  ;;  %818 = vmatprep.subr.bf16.mxu1 %v858_v9 }
  0x2a   : > { %802 = vmatpush3.bf16.msra.mxu0 %v858_v9  ;;  %826 = vmatpush3.bf16.msra.mxu1 %v858_v9 }
  0x2d   : > { %804 = vmatmul.mubr.bf16.vlgmr.msra.gmra.mxu0 %v861_v10  ;;  %808 = vmatmul.mubr.bf16.vlgmr.msra.gmra.mxu1 %v862_v11 }
  0xed   : > { %v805_v12 = vpop.f32.mrf.mxu0  ;;  %v809_v13 = vpop.f32.mrf.mxu1 }
  0xee   : > { %v522_v19 = vadd.f32 %v805_v12, %v733_v14  ;;  %v526_v20 = vadd.f32 %v809_v13, %v733_v14 }
  0xef   : > { %v455_v15 = vpop.f32.mrf.mxu0  ;;  %v471_v16 = vpop.f32.mrf.mxu1 }
  0xf0   : > { %v520_v23 = vadd.f32 %v733_v14, %v455_v15  ;;  %v524_v24 = vadd.f32 %v733_v14, %v471_v16 }
  0xf1   : > { %v806_v17 = vpop.f32.mrf.mxu0  ;;  %v810_v18 = vpop.f32.mrf.mxu1 }
  0xf2   : > { %v523_v21 = vadd.f32 %v806_v17, %v733_v14  ;;  %v527_v22 = vadd.f32 %v810_v18, %v733_v14 }
  0xf3   : > { %v458_v25 = vpop.f32.mrf.mxu0  ;;  %v474_v26 = vpop.f32.mrf.mxu1 }
  0xf4   : > { %v760_v27 = vpack.c.bf16 %v523_v21, %v522_v19  ;;  %v770_v28 = vpack.c.bf16 %v527_v22, %v526_v20  ;;  %v521_v29 = vadd.f32 %v733_v14, %v458_v25  ;;  %v525_v30 = vadd.f32 %v733_v14, %v474_v26 }
  0xf6   : > { %772 = vst [vmem:[%s302_s17 + $0x8] sm:$0xff] %v760_v27   ;;  %774 = vst [vmem:[%s302_s17 + $0x18] sm:$0xff] %v770_v28   ;;  %v755_v31 = vpack.c.bf16 %v521_v29, %v520_v23  ;;  %v765_v32 = vpack.c.bf16 %v525_v30, %v524_v24 }
  0xf8   : > { %756 = vst [vmem:[%s302_s17] sm:$0xff] %v755_v31   ;;  %773 = vst [vmem:[%s302_s17 + $0x10] sm:$0xff] %v765_v32  }
  0xf9 PF: > { %s13_s14 = sadd.s32 1, %s885_s14   ;;  %s984_s12 = smov %s881_s13 }
  0xfa   : > { %p10_p5 = scmp.ge.s32.totalorder %s13_s14, 4   ;;  %s985_s13 = smov %s987_s15 }
  0xfc   :  { %12 = sbr.rel (!%p10_p5) target bundleno = 2 (0x2), region = 76 }

// kernel: _lambda_.51
= control target key start
LH: loop header
LB: loop body
LE: loop exit
PB: predicated region body
PF: predicated region fallthrough
CT: control target
= control target key end

     0   :  { %vm156_vm0 = vcmask 125952   ;;  %s400_s0 = inlined_call_operand.vmem [shape: bf16[128,16], index: 0, kind: input, shape index: {}]   ;;  %s401_s1 = inlined_call_operand.vmem [shape: f32[1,16], index: 1, kind: input, shape index: {}]   ;;  %s402_s2 = inlined_call_operand.vmem [shape: f32[1,16], index: 2, kind: input, shape index: {}]   ;;  %s403_s3 = inlined_call_operand.vmem [shape: bf16[128,16], index: 3, kind: output, shape index: {}]  }
   0x1   :  { %v212_v0 = vld [vmem:[%s400_s0] sm:$0xff]   ;;  %v243_v4 = vld [vmem:[%s400_s0 + $0x8] sm:$0xff]   ;;  %v244_v5 = vld [vmem:[%s400_s0 + $0x10] sm:$0xff]  }
   0x2   :  { %v276_v1 = vld [vmem:[%s401_s1] ss:$0 sm:$0xff]  ;;  %v213_v2 = vunpack.c.l.bf16 %v212_v0  ;;  %v214_v3 = vunpack.c.h.bf16 %v212_v0  ;;  %v245_v6 = vld [vmem:[%s400_s0 + $0x18] sm:$0xff]   ;;  %v217_v8 = vunpack.c.l.bf16 %v243_v4  ;;  %v218_v9 = vunpack.c.h.bf16 %v243_v4  ;;  %v247_v33 = vld [vmem:[%s400_s0 + $0x28] sm:$0xff]  }
   0x3   :  { %v290_v7 = vld [vmem:[%s402_s2] ss:$0 sm:$0xff]  ;;  %v221_v10 = vunpack.c.l.bf16 %v244_v5  ;;  %v222_v11 = vunpack.c.h.bf16 %v244_v5  ;;  %v225_v14 = vunpack.c.l.bf16 %v245_v6  ;;  %v226_v15 = vunpack.c.h.bf16 %v245_v6  ;;  %v248_v34 = vld [vmem:[%s400_s0 + $0x30] sm:$0xff]   ;;  %v249_v39 = vld [vmem:[%s400_s0 + $0x38] sm:$0xff]  }
   0x4   :  { %v53_v12 = vmul.f32 %v213_v2, %v276_v1  ;;  %v54_v13 = vmul.f32 %v214_v3, %v276_v1  ;;  %v55_v16 = vmul.f32 %v217_v8, %v276_v1  ;;  %v56_v17 = vmul.f32 %v218_v9, %v276_v1  ;;  %v246_v28 = vld [vmem:[%s400_s0 + $0x20] sm:$0xff]  }
   0x5   :  { %v57_v18 = vmul.f32 %v221_v10, %v276_v1  ;;  %v58_v19 = vmul.f32 %v222_v11, %v276_v1  ;;  %v59_v22 = vmul.f32 %v225_v14, %v276_v1  ;;  %v60_v23 = vmul.f32 %v226_v15, %v276_v1 }
   0x6   :  { %v76_v20 = vadd.f32 %v290_v7, %v53_v12  ;;  %v77_v21 = vadd.f32 %v290_v7, %v54_v13  ;;  %v78_v24 = vadd.f32 %v290_v7, %v55_v16  ;;  %v79_v25 = vadd.f32 %v290_v7, %v56_v17 }
   0x7   :  { %v80_v26 = vadd.f32 %v290_v7, %v57_v18  ;;  %v81_v27 = vadd.f32 %v290_v7, %v58_v19  ;;  %v82_v31 = vadd.f32 %v290_v7, %v59_v22  ;;  %v83_v32 = vadd.f32 %v290_v7, %v60_v23 }
   0x8   :  { %v195_v29 = vpack.c.bf16 %v76_v20, %v76_v20  ;;  %v196_v30 = vpack.c.bf16 %v77_v21, %v77_v21  ;;  %v197_v35 = vpack.c.bf16 %v78_v24, %v78_v24  ;;  %v198_v36 = vpack.c.bf16 %v79_v25, %v79_v25 }
   0x9   :  { %v199_v37 = vpack.c.bf16 %v80_v26, %v80_v26  ;;  %v200_v38 = vpack.c.bf16 %v81_v27, %v81_v27  ;;  %v201_v40 = vpack.c.bf16 %v82_v31, %v82_v31  ;;  %v202_v41 = vpack.c.bf16 %v83_v32, %v83_v32 }
   0xa   :  { %157 = vst.msk [vmem:[%s403_s3] sm:$0xf] %vm156_vm0, %v195_v29  ;;  %158 = vst.msk [vmem:[%s403_s3 + $0x4] sm:$0xf] %vm156_vm0, %v196_v30  ;;  %v229_v42 = vunpack.c.l.bf16 %v246_v28  ;;  %v230_v43 = vunpack.c.h.bf16 %v246_v28  ;;  %v233_v44 = vunpack.c.l.bf16 %v247_v33  ;;  %v234_v45 = vunpack.c.h.bf16 %v247_v33 }
   0xb   :  { %159 = vst.msk [vmem:[%s403_s3 + $0x8] sm:$0xf] %vm156_vm0, %v197_v35  ;;  %160 = vst.msk [vmem:[%s403_s3 + $0xc] sm:$0xf] %vm156_vm0, %v198_v36  ;;  %v237_v46 = vunpack.c.l.bf16 %v248_v34  ;;  %v238_v47 = vunpack.c.h.bf16 %v248_v34  ;;  %v241_v50 = vunpack.c.l.bf16 %v249_v39  ;;  %v242_v51 = vunpack.c.h.bf16 %v249_v39 }
   0xc   :  { %161 = vst.msk [vmem:[%s403_s3 + $0x10] sm:$0xf] %vm156_vm0, %v199_v37  ;;  %162 = vst.msk [vmem:[%s403_s3 + $0x14] sm:$0xf] %vm156_vm0, %v200_v38  ;;  %v61_v48 = vmul.f32 %v229_v42, %v276_v1  ;;  %v62_v49 = vmul.f32 %v230_v43, %v276_v1  ;;  %v63_v52 = vmul.f32 %v233_v44, %v276_v1 }
   0xd   :  { %163 = vst.msk [vmem:[%s403_s3 + $0x18] sm:$0xf] %vm156_vm0, %v201_v40  ;;  %164 = vst.msk [vmem:[%s403_s3 + $0x1c] sm:$0xf] %vm156_vm0, %v202_v41  ;;  %v64_v53 = vmul.f32 %v234_v45, %v276_v1  ;;  %v65_v54 = vmul.f32 %v237_v46, %v276_v1  ;;  %v66_v55 = vmul.f32 %v238_v47, %v276_v1 }
   0xe   :  { %v84_v56 = vadd.f32 %v290_v7, %v61_v48  ;;  %v85_v57 = vadd.f32 %v290_v7, %v62_v49  ;;  %v67_v58 = vmul.f32 %v241_v50, %v276_v1  ;;  %v68_v59 = vmul.f32 %v242_v51, %v276_v1 }
   0xf   :  { %v86_v60 = vadd.f32 %v290_v7, %v63_v52  ;;  %v87_v61 = vadd.f32 %v290_v7, %v64_v53  ;;  %v88_v62 = vadd.f32 %v290_v7, %v65_v54  ;;  %v89_v63 = vadd.f32 %v290_v7, %v66_v55 }
  0x10   :  { %v203_v0 = vpack.c.bf16 %v84_v56, %v84_v56  ;;  %v204_v2 = vpack.c.bf16 %v85_v57, %v85_v57  ;;  %v90_v3 = vadd.f32 %v290_v7, %v67_v58  ;;  %v91_v4 = vadd.f32 %v290_v7, %v68_v59 }
  0x11   :  { %v205_v5 = vpack.c.bf16 %v86_v60, %v86_v60  ;;  %v206_v6 = vpack.c.bf16 %v87_v61, %v87_v61  ;;  %v207_v8 = vpack.c.bf16 %v88_v62, %v88_v62  ;;  %v208_v9 = vpack.c.bf16 %v89_v63, %v89_v63 }
  0x12   :  { %165 = vst.msk [vmem:[%s403_s3 + $0x20] sm:$0xf] %vm156_vm0, %v203_v0  ;;  %166 = vst.msk [vmem:[%s403_s3 + $0x24] sm:$0xf] %vm156_vm0, %v204_v2  ;;  %v209_v1 = vpack.c.bf16 %v90_v3, %v90_v3  ;;  %v210_v10 = vpack.c.bf16 %v91_v4, %v91_v4 }
  0x13   :  { %167 = vst.msk [vmem:[%s403_s3 + $0x28] sm:$0xf] %vm156_vm0, %v205_v5  ;;  %168 = vst.msk [vmem:[%s403_s3 + $0x2c] sm:$0xf] %vm156_vm0, %v206_v6 }
  0x14   :  { %169 = vst.msk [vmem:[%s403_s3 + $0x30] sm:$0xf] %vm156_vm0, %v207_v8  ;;  %170 = vst.msk [vmem:[%s403_s3 + $0x34] sm:$0xf] %vm156_vm0, %v208_v9 }
  0x15   :  { %171 = vst.msk [vmem:[%s403_s3 + $0x38] sm:$0xf] %vm156_vm0, %v209_v1  ;;  %172 = vst.msk [vmem:[%s403_s3 + $0x3c] sm:$0xf] %vm156_vm0, %v210_v10 }

// kernel: _lambda_.50
= control target key start
LH: loop header
LB: loop body
LE: loop exit
PB: predicated region body
PF: predicated region fallthrough
CT: control target
= control target key end

     0   :  { %vm20_vm0 = vcmask 122880   ;;  %v222_v0 = vmov 0.0   ;;  %vm56_vm1 = vcmask 130048   ;;  %s322_s0 = inlined_call_operand.vmem [shape: bf16[128,16], index: 0, kind: input, shape index: {}]   ;;  %s323_s1 = inlined_call_operand.vmem [shape: f32[1,16], index: 1, kind: input, shape index: {}]   ;;  %s324_s2 = inlined_call_operand.vmem [shape: f32[1,16], index: 2, kind: input, shape index: {}]   ;;  %s325_s3 = inlined_call_operand.vmem [shape: f32[1,16], index: 3, kind: output, shape index: {0}]   ;;  %s326_s4 = inlined_call_operand.vmem [shape: f32[1,16], index: 4, kind: output, shape index: {1}]  }
   0x1   :  { %21 = vst.msk [vmem:[#allocation2] sm:$0x1] %vm20_vm0, %v222_v0  ;;  %22 = vst.msk [vmem:[#allocation3] sm:$0x1] %vm20_vm0, %v222_v0  ;;  %v181_v1 = vld [vmem:[%s322_s0] sm:$0xff]   ;;  %v212_v2 = vld [vmem:[%s322_s0 + $0x8] sm:$0xff]  }
   0x2   :  { %v182_v3 = vunpack.c.l.bf16 %v181_v1  ;;  %v183_v4 = vunpack.c.h.bf16 %v181_v1  ;;  %v186_v5 = vunpack.c.l.bf16 %v212_v2  ;;  %v213_v6 = vld [vmem:[%s322_s0 + $0x10] sm:$0xff]   ;;  %v187_v7 = vunpack.c.h.bf16 %v212_v2  ;;  %v214_v12 = vld [vmem:[%s322_s0 + $0x18] sm:$0xff]   ;;  %v215_v19 = vld [vmem:[%s322_s0 + $0x20] sm:$0xff]  }
   0x3   :  { %v190_v8 = vunpack.c.l.bf16 %v213_v6  ;;  %v191_v14 = vunpack.c.h.bf16 %v213_v6  ;;  %v194_v17 = vunpack.c.l.bf16 %v214_v12  ;;  %v195_v24 = vunpack.c.h.bf16 %v214_v12  ;;  %v216_v31 = vld [vmem:[%s322_s0 + $0x28] sm:$0xff]   ;;  %v217_v45 = vld [vmem:[%s322_s0 + $0x30] sm:$0xff]   ;;  %v218_v58 = vld [vmem:[%s322_s0 + $0x38] sm:$0xff]  }
   0x4   :  { %v57_v9 = vsel %vm56_vm1, %v182_v3, 0.0  ;;  %v58_v10 = vsel %vm56_vm1, %v183_v4, 0.0  ;;  %v60_v11 = vsel %vm56_vm1, %v186_v5, 0.0  ;;  %v62_v15 = vsel %vm56_vm1, %v187_v7, 0.0 }
   0x5   :  { %v59_v13 = vadd.f32 %v58_v10, %v57_v9  ;;  %v64_v18 = vsel %vm56_vm1, %v190_v8, 0.0  ;;  %v98_v21 = vmul.f32 %v182_v3, %v182_v3  ;;  %v99_v22 = vmul.f32 %v183_v4, %v183_v4 }
   0x6   :  { %v100_v23 = vmul.f32 %v186_v5, %v186_v5  ;;  %v66_v25 = vsel %vm56_vm1, %v191_v14, 0.0  ;;  %v101_v27 = vmul.f32 %v187_v7, %v187_v7  ;;  %v198_v28 = vunpack.c.l.bf16 %v215_v19 }
   0x7   :  { %v61_v16 = vadd.f32 %v60_v11, %v59_v13  ;;  %v68_v29 = vsel %vm56_vm1, %v194_v17, 0.0  ;;  %v102_v30 = vmul.f32 %v190_v8, %v190_v8  ;;  %v114_v33 = vsel %vm56_vm1, %v98_v21, 0.0 }
   0x8   :  { %v115_v34 = vsel %vm56_vm1, %v99_v22, 0.0  ;;  %v117_v35 = vsel %vm56_vm1, %v100_v23, 0.0  ;;  %v199_v36 = vunpack.c.h.bf16 %v215_v19  ;;  %v70_v37 = vsel %vm56_vm1, %v195_v24, 0.0 }
   0x9   :  { %v63_v20 = vadd.f32 %v62_v15, %v61_v16  ;;  %v116_v38 = vadd.f32 %v115_v34, %v114_v33  ;;  %v103_v40 = vmul.f32 %v191_v14, %v191_v14  ;;  %v119_v41 = vsel %vm56_vm1, %v101_v27, 0.0 }
   0xa   :  { %v202_v42 = vunpack.c.l.bf16 %v216_v31  ;;  %v72_v43 = vsel %vm56_vm1, %v198_v28, 0.0  ;;  %v104_v47 = vmul.f32 %v194_v17, %v194_v17  ;;  %v121_v48 = vsel %vm56_vm1, %v102_v30, 0.0 }
   0xb   :  { %v65_v26 = vadd.f32 %v64_v18, %v63_v20  ;;  %v118_v44 = vadd.f32 %v117_v35, %v116_v38  ;;  %v203_v49 = vunpack.c.h.bf16 %v216_v31  ;;  %v74_v50 = vsel %vm56_vm1, %v199_v36, 0.0 }
   0xc   :  { %v105_v53 = vmul.f32 %v195_v24, %v195_v24  ;;  %v123_v54 = vsel %vm56_vm1, %v103_v40, 0.0  ;;  %v206_v55 = vunpack.c.l.bf16 %v217_v45  ;;  %v76_v56 = vsel %vm56_vm1, %v202_v42, 0.0 }
   0xd   :  { %v67_v32 = vadd.f32 %v66_v25, %v65_v26  ;;  %v120_v51 = vadd.f32 %v119_v41, %v118_v44  ;;  %v106_v60 = vmul.f32 %v198_v28, %v198_v28  ;;  %v125_v61 = vsel %vm56_vm1, %v104_v47, 0.0  ;;  %v55_v44 = vld [vmem:[#allocation2] sm:$0x1] }
   0xe   :  { %v207_v62 = vunpack.c.h.bf16 %v217_v45  ;;  %v78_v63 = vsel %vm56_vm1, %v203_v49, 0.0  ;;  %v107_v2 = vmul.f32 %v199_v36, %v199_v36  ;;  %v127_v3 = vsel %vm56_vm1, %v105_v53, 0.0 }
   0xf   :  { %v69_v39 = vadd.f32 %v68_v29, %v67_v32  ;;  %v122_v57 = vadd.f32 %v121_v48, %v120_v51  ;;  %v210_v4 = vunpack.c.l.bf16 %v218_v58  ;;  %v80_v5 = vsel %vm56_vm1, %v206_v55, 0.0 }
  0x10   :  { %v108_v8 = vmul.f32 %v202_v42, %v202_v42  ;;  %v129_v9 = vsel %vm56_vm1, %v106_v60, 0.0  ;;  %v211_v10 = vunpack.c.h.bf16 %v218_v58  ;;  %v82_v11 = vsel %vm56_vm1, %v207_v62, 0.0 }
  0x11   :  { %v71_v46 = vadd.f32 %v70_v37, %v69_v39  ;;  %v124_v0 = vadd.f32 %v123_v54, %v122_v57  ;;  %v109_v14 = vmul.f32 %v203_v49, %v203_v49  ;;  %v131_v15 = vsel %vm56_vm1, %v107_v2, 0.0  ;;  %v168_v2 = vld [vmem:[%s324_s2] sm:$0x1] }
  0x12   :  { %v84_v16 = vsel %vm56_vm1, %v210_v4, 0.0  ;;  %v110_v19 = vmul.f32 %v206_v55, %v206_v55  ;;  %v133_v20 = vsel %vm56_vm1, %v108_v8, 0.0  ;;  %v86_v21 = vsel %vm56_vm1, %v211_v10, 0.0 }
  0x13   :  { %v73_v52 = vadd.f32 %v72_v43, %v71_v46  ;;  %v126_v6 = vadd.f32 %v125_v61, %v124_v0  ;;  %v111_v24 = vmul.f32 %v207_v62, %v207_v62  ;;  %v135_v25 = vsel %vm56_vm1, %v109_v14, 0.0 }
  0x14   :  { %v112_v28 = vmul.f32 %v210_v4, %v210_v4  ;;  %v137_v29 = vsel %vm56_vm1, %v110_v19, 0.0  ;;  %v113_v32 = vmul.f32 %v211_v10, %v211_v10 }
  0x15   :  { %v75_v59 = vadd.f32 %v74_v50, %v73_v52  ;;  %v128_v12 = vadd.f32 %v127_v3, %v126_v6  ;;  %v139_v33 = vsel %vm56_vm1, %v111_v24, 0.0  ;;  %v97_v52 = vld [vmem:[#allocation3] sm:$0x1] }
  0x16   :  { %v141_v36 = vsel %vm56_vm1, %v112_v28, 0.0  ;;  %v143_v39 = vsel %vm56_vm1, %v113_v32, 0.0 }
  0x17   :  { %v77_v1 = vadd.f32 %v76_v56, %v75_v59  ;;  %v130_v17 = vadd.f32 %v129_v9, %v128_v12 }
  0x19   :  { %v79_v7 = vadd.f32 %v78_v63, %v77_v1  ;;  %v132_v22 = vadd.f32 %v131_v15, %v130_v17  ;;  %v163_v63 = vld [vmem:[%s323_s1] sm:$0x1] }
  0x1b   :  { %v81_v13 = vadd.f32 %v80_v5, %v79_v7  ;;  %v134_v26 = vadd.f32 %v133_v20, %v132_v22 }
  0x1d   :  { %v83_v18 = vadd.f32 %v82_v11, %v81_v13  ;;  %v136_v30 = vadd.f32 %v135_v25, %v134_v26 }
  0x1f   :  { %v85_v23 = vadd.f32 %v84_v16, %v83_v18  ;;  %v138_v34 = vadd.f32 %v137_v29, %v136_v30 }
  0x21   :  { %v87_v27 = vadd.f32 %v86_v21, %v85_v23  ;;  %v140_v37 = vadd.f32 %v139_v33, %v138_v34 }
  0x23   :  { %v88_v31 = vrot.slane %v87_v27, 4  ;;  %v142_v40 = vadd.f32 %v141_v36, %v140_v37 }
  0x25   :  { %v89_v35 = vadd.f32 %v88_v31, %v87_v27  ;;  %v144_v42 = vadd.f32 %v143_v39, %v142_v40 }
  0x27   :  { %v90_v38 = vrot.slane %v89_v35, 2  ;;  %v145_v45 = vrot.slane %v144_v42, 4 }
  0x29   :  { %v91_v41 = vadd.f32 %v90_v38, %v89_v35  ;;  %v146_v47 = vadd.f32 %v145_v45, %v144_v42 }
  0x2b   :  { %v92_v43 = vrot.slane %v91_v41, 1  ;;  %v147_v49 = vrot.slane %v146_v47, 2 }
  0x2d   :  { %v93_v46 = vadd.f32 %v92_v43, %v91_v41  ;;  %v148_v50 = vadd.f32 %v147_v49, %v146_v47 }
  0x2f   :  { %v94_v48 = vadd.f32 %v93_v46, %v55_v44  ;;  %v149_v51 = vrot.slane %v148_v50, 1 }
  0x31   :  { %96 = vst.msk [vmem:[#allocation2] sm:$0x1] %vm20_vm0, %v94_v48  ;;  %v150_v53 = vadd.f32 %v149_v51, %v148_v50 }
  0x33   :  { %v151_v54 = vadd.f32 %v150_v53, %v97_v52 }
  0x35   :  { %152 = vst.msk [vmem:[#allocation3] sm:$0x1] %vm20_vm0, %v151_v54 }
  0x38   :  { %v156_v55 = vld [vmem:[#allocation2] sm:$0x1] }
  0x39   :  { %v157_v56 = vmul.f32 0.0078125, %v156_v55 }
  0x3b   :  { %v160_v57 = vmul.f32 %v157_v56, %v157_v56 }
  0x3c   :  { %v158_v58 = vld [vmem:[#allocation3] sm:$0x1] }
  0x3d   :  { %v159_v59 = vmul.f32 0.0078125, %v158_v58 }
  0x3f   :  { %v161_v60 = vsub.f32 %v159_v59, %v160_v57 }
  0x41   :  { %v162_v61 = vmax.f32 %v161_v60, 0.0 }
  0x43   :  { %v164_v62 = vadd.f32 1e-05, %v162_v61 }
  0x45   :  { %220 = vrsqrt.f32 %v164_v62 }
  0x52   :  { %v221_v0 = vpop.eup %220 }
  0x53   :  { %v166_v1 = vmul.f32 %v221_v0, %v163_v63 }
  0x55   :  { %167 = vst.msk [vmem:[%s325_s3] sm:$0x1] %vm20_vm0, %v166_v1  ;;  %v169_v3 = vmul.f32 %v166_v1, %v157_v56 }
  0x57   :  { %v170_v4 = vsub.f32 %v168_v2, %v169_v3 }
  0x59   :  { %171 = vst.msk [vmem:[%s326_s4] sm:$0x1] %vm20_vm0, %v170_v4 }

// kernel: _lambda_.54
= control target key start
LH: loop header
LB: loop body
LE: loop exit
PB: predicated region body
PF: predicated region fallthrough
CT: control target
= control target key end

     0   :  { %vm60_vm0 = vcmask 257024   ;;  %s132_s0 = inlined_call_operand.vmem [shape: bf16[32,32], index: 0, kind: input, shape index: {}]   ;;  %s133_s1 = inlined_call_operand.vmem [shape: f32[1,32], index: 1, kind: input, shape index: {}]   ;;  %s134_s2 = inlined_call_operand.vmem [shape: f32[1,32], index: 2, kind: input, shape index: {}]   ;;  %s135_s3 = inlined_call_operand.vmem [shape: bf16[32,32], index: 3, kind: output, shape index: {}]  }
   0x1   :  { %v80_v0 = vld [vmem:[%s132_s0] sm:$0xff]   ;;  %v87_v4 = vld [vmem:[%s132_s0 + $0x8] sm:$0xff]  }
   0x2   :  { %v69_v1 = vld [vmem:[%s133_s1] ss:$0 sm:$0xff]  ;;  %v81_v2 = vunpack.c.l.bf16 %v80_v0  ;;  %v82_v3 = vunpack.c.h.bf16 %v80_v0  ;;  %v85_v6 = vunpack.c.l.bf16 %v87_v4  ;;  %v86_v7 = vunpack.c.h.bf16 %v87_v4 }
   0x3   :  { %v70_v5 = vld [vmem:[%s134_s2] ss:$0 sm:$0xff] }
   0x4   :  { %v29_v8 = vmul.f32 %v81_v2, %v69_v1  ;;  %v30_v9 = vmul.f32 %v82_v3, %v69_v1  ;;  %v31_v10 = vmul.f32 %v85_v6, %v69_v1  ;;  %v32_v11 = vmul.f32 %v86_v7, %v69_v1 }
   0x6   :  { %v40_v12 = vadd.f32 %v70_v5, %v29_v8  ;;  %v41_v13 = vadd.f32 %v70_v5, %v30_v9  ;;  %v42_v14 = vadd.f32 %v70_v5, %v31_v10  ;;  %v43_v15 = vadd.f32 %v70_v5, %v32_v11 }
   0x8   :  { %v75_v16 = vpack.c.bf16 %v40_v12, %v40_v12  ;;  %v76_v17 = vpack.c.bf16 %v41_v13, %v41_v13  ;;  %v77_v18 = vpack.c.bf16 %v42_v14, %v42_v14  ;;  %v78_v19 = vpack.c.bf16 %v43_v15, %v43_v15 }
   0xa   :  { %61 = vst.msk [vmem:[%s135_s3] sm:$0xf] %vm60_vm0, %v75_v16  ;;  %62 = vst.msk [vmem:[%s135_s3 + $0x4] sm:$0xf] %vm60_vm0, %v76_v17 }
   0xb   :  { %63 = vst.msk [vmem:[%s135_s3 + $0x8] sm:$0xf] %vm60_vm0, %v77_v18  ;;  %64 = vst.msk [vmem:[%s135_s3 + $0xc] sm:$0xf] %vm60_vm0, %v78_v19 }

// kernel: _lambda_.53
= control target key start
LH: loop header
LB: loop body
LE: loop exit
PB: predicated region body
PF: predicated region fallthrough
CT: control target
= control target key end

     0   :  { %vm20_vm0 = vcmask 253952   ;;  %v108_v0 = vmov 0.0   ;;  %vm32_vm1 = vcmask 261120   ;;  %s166_s0 = inlined_call_operand.vmem [shape: bf16[32,32], index: 0, kind: input, shape index: {}]   ;;  %s167_s1 = inlined_call_operand.vmem [shape: f32[1,32], index: 1, kind: input, shape index: {}]   ;;  %s168_s2 = inlined_call_operand.vmem [shape: f32[1,32], index: 2, kind: input, shape index: {}]   ;;  %s169_s3 = inlined_call_operand.vmem [shape: f32[1,32], index: 3, kind: output, shape index: {0}]   ;;  %s170_s4 = inlined_call_operand.vmem [shape: f32[1,32], index: 4, kind: output, shape index: {1}]  }
   0x1   :  { %21 = vst.msk [vmem:[#allocation2] sm:$0x1] %vm20_vm0, %v108_v0  ;;  %22 = vst.msk [vmem:[#allocation3] sm:$0x1] %vm20_vm0, %v108_v0  ;;  %v97_v1 = vld [vmem:[%s166_s0] sm:$0xff]   ;;  %v104_v2 = vld [vmem:[%s166_s0 + $0x8] sm:$0xff]  }
   0x2   :  { %v98_v3 = vunpack.c.l.bf16 %v97_v1  ;;  %v99_v4 = vunpack.c.h.bf16 %v97_v1  ;;  %v102_v5 = vunpack.c.l.bf16 %v104_v2  ;;  %v103_v6 = vunpack.c.h.bf16 %v104_v2  ;;  %v79_v49 = vld [vmem:[%s167_s1] sm:$0x1] }
   0x3   :  { %v84_v52 = vld [vmem:[%s168_s2] sm:$0x1] }
   0x4   :  { %v33_v7 = vsel %vm32_vm1, %v98_v3, 0.0  ;;  %v34_v8 = vsel %vm32_vm1, %v99_v4, 0.0  ;;  %v36_v9 = vsel %vm32_vm1, %v102_v5, 0.0  ;;  %v50_v11 = vmul.f32 %v98_v3, %v98_v3 }
   0x5   :  { %v35_v10 = vadd.f32 %v34_v8, %v33_v7  ;;  %v51_v12 = vmul.f32 %v99_v4, %v99_v4  ;;  %v52_v13 = vmul.f32 %v102_v5, %v102_v5  ;;  %v38_v14 = vsel %vm32_vm1, %v103_v6, 0.0 }
   0x6   :  { %v53_v15 = vmul.f32 %v103_v6, %v103_v6  ;;  %v54_v17 = vsel %vm32_vm1, %v50_v11, 0.0 }
   0x7   :  { %v37_v16 = vadd.f32 %v36_v9, %v35_v10  ;;  %v55_v18 = vsel %vm32_vm1, %v51_v12, 0.0  ;;  %v57_v19 = vsel %vm32_vm1, %v52_v13, 0.0 }
   0x8   :  { %v56_v20 = vadd.f32 %v55_v18, %v54_v17  ;;  %v59_v22 = vsel %vm32_vm1, %v53_v15, 0.0  ;;  %v31_v33 = vld [vmem:[#allocation2] sm:$0x1]  ;;  %v49_v38 = vld [vmem:[#allocation3] sm:$0x1] }
   0x9   :  { %v39_v21 = vadd.f32 %v38_v14, %v37_v16 }
   0xa   :  { %v58_v23 = vadd.f32 %v57_v19, %v56_v20 }
   0xb   :  { %v40_v24 = vrot.slane %v39_v21, 4 }
   0xc   :  { %v60_v25 = vadd.f32 %v59_v22, %v58_v23 }
   0xd   :  { %v41_v26 = vadd.f32 %v40_v24, %v39_v21 }
   0xe   :  { %v61_v27 = vrot.slane %v60_v25, 4 }
   0xf   :  { %v42_v28 = vrot.slane %v41_v26, 2 }
  0x10   :  { %v62_v29 = vadd.f32 %v61_v27, %v60_v25 }
  0x11   :  { %v43_v30 = vadd.f32 %v42_v28, %v41_v26 }
  0x12   :  { %v63_v31 = vrot.slane %v62_v29, 2 }
  0x13   :  { %v44_v32 = vrot.slane %v43_v30, 1 }
  0x14   :  { %v64_v34 = vadd.f32 %v63_v31, %v62_v29 }
  0x15   :  { %v45_v35 = vadd.f32 %v44_v32, %v43_v30 }
  0x16   :  { %v65_v36 = vrot.slane %v64_v34, 1 }
  0x17   :  { %v46_v37 = vadd.f32 %v45_v35, %v31_v33 }
  0x18   :  { %v66_v39 = vadd.f32 %v65_v36, %v64_v34 }
  0x19   :  { %48 = vst.msk [vmem:[#allocation2] sm:$0x1] %vm20_vm0, %v46_v37 }
  0x1a   :  { %v67_v40 = vadd.f32 %v66_v39, %v49_v38 }
  0x1c   :  { %68 = vst.msk [vmem:[#allocation3] sm:$0x1] %vm20_vm0, %v67_v40 }
  0x20   :  { %v72_v41 = vld [vmem:[#allocation2] sm:$0x1] }
  0x21   :  { %v73_v42 = vmul.f32 0.03125, %v72_v41 }
  0x23   :  { %v74_v43 = vld [vmem:[#allocation3] sm:$0x1]  ;;  %v76_v44 = vmul.f32 %v73_v42, %v73_v42 }
  0x24   :  { %v75_v45 = vmul.f32 0.03125, %v74_v43 }
  0x26   :  { %v77_v46 = vsub.f32 %v75_v45, %v76_v44 }
  0x28   :  { %v78_v47 = vmax.f32 %v77_v46, 0.0 }
  0x2a   :  { %v80_v48 = vadd.f32 1e-05, %v78_v47 }
  0x2c   :  { %106 = vrsqrt.f32 %v80_v48 }
  0x39   :  { %v107_v50 = vpop.eup %106 }
  0x3a   :  { %v82_v51 = vmul.f32 %v107_v50, %v79_v49 }
  0x3c   :  { %83 = vst.msk [vmem:[%s169_s3] sm:$0x1] %vm20_vm0, %v82_v51  ;;  %v85_v53 = vmul.f32 %v82_v51, %v73_v42 }
  0x3e   :  { %v86_v54 = vsub.f32 %v84_v52, %v85_v53 }
  0x40   :  { %87 = vst.msk [vmem:[%s170_s4] sm:$0x1] %vm20_vm0, %v86_v54 }

// kernel: _lambda_.52
= control target key start
LH: loop header
LB: loop body
LE: loop exit
PB: predicated region body
PF: predicated region fallthrough
CT: control target
= control target key end

     0   :  { %s827_s12 = smov 0   ;;  %s829_s13 = smov 0   ;;  %s915_s0 = inlined_call_operand.vmem [shape: bf16[1,32,256], index: 0, kind: input, shape index: {}]   ;;  %s916_s1 = inlined_call_operand.vmem [shape: bf16[1,256,128], index: 1, kind: input, shape index: {}]   ;;  %s917_s2 = inlined_call_operand.vmem [shape: f32[1,128], index: 2, kind: input, shape index: {}]   ;;  %s918_s3 = inlined_call_operand.vmem [shape: bf16[1,32,128], index: 3, kind: output, shape index: {}]  }
   0x1   :  { %s831_s14 = smov 0  }
   0x2 LB: > { %s35_s15 = sadd.s32 1, %s801_s13  ;;  %p681_p0 = scmp.ge.s32.totalorder %s805_s14, 1  ;;  %s805_s14 = sphi %s831_s14, %s13_s14   ;;  %s801_s13 = sphi %s829_s13, %s920_s13   ;;  %s797_s12 = sphi %s827_s12, %s919_s12  }
   0x3   : > { %p37_p1 = scmp.ge.s32.totalorder %s35_s15, 2  ;;  %p212_p2 = scmp.lt.s32.totalorder %s805_s14, 3 }
   0x5   : > { %s922_s15 = smov (%p37_p1, %s35_s15), 0  ;;  %p213_p3 = pnand %p681_p0, %p212_p2 }
   0x6   : > { %s682_s18 = sshll.u32 (!%p213_p3), %s797_s12, 1 }
   0x7   : > { %216 = sbr.rel (%p213_p3) target bundleno = 251 (0xfb), region = 32  ;;  %p271_p4 = scmp.lt.s32.totalorder (!%p213_p3), %s682_s18, 3 }
   0xc   : > { %v764_v0 = vld [vmem:[%s916_s1 + $0x78] sm:$0xff]   ;;  %v766_v2 = vld [vmem:[%s916_s1 + $0x70] sm:$0xff]   ;;  %v768_v4 = vld [vmem:[%s916_s1 + $0x68] sm:$0xff]   ;;  %s924_s18 = smov (!%p271_p4, %s682_s18), 3 }
   0xd   : > { %v765_v1 = vld [vmem:[%s916_s1 + $0x38] sm:$0xff]   ;;  %718 = vmatprep.subr.bf16.mxu0 %v764_v0  ;;  %v767_v3 = vld [vmem:[%s916_s1 + $0x30] sm:$0xff]   ;;  %v769_v5 = vld [vmem:[%s916_s1 + $0x28] sm:$0xff]   ;;  %s710_s6 = sshll.u32 %s924_s18, 3  ;;  %s686_s5 = sshll.u32 %s924_s18, 2 }
   0xe   : > { %719 = vmatpush3.bf16.msra.mxu0 %v765_v1  ;;  %v770_v6 = vld [vmem:[%s916_s1 + $0x60] sm:$0xff]   ;;  %v772_v8 = vld [vmem:[%s916_s1 + $0x58] sm:$0xff]   ;;  %s280_s11 = scalar_lea.vmem %s915_s0, %s710_s6  ;;  %v774_v10 = vld [vmem:[%s916_s1 + $0x50] sm:$0xff]   ;;  %s310_s8 = scalar_lea.vmem %s918_s3, %s686_s5 }
   0xf   : > { %720 = vmatprep.subr.bf16.mxu0 %v766_v2  ;;  %v771_v7 = vld [vmem:[%s916_s1 + $0x20] sm:$0xff]   ;;  %v773_v9 = vld [vmem:[%s916_s1 + $0x18] sm:$0xff]   ;;  %v775_v12 = vld [vmem:[%s916_s1 + $0x10] sm:$0xff]  }
  0x10   : > { %v782_v11 = vld [vmem:[%s280_s11 + $0x4] ss:$8 sps:$4 sm:$0xff]   ;;  %v780_v17 = vld [vmem:[%s280_s11] ss:$8 sps:$4 sm:$0xff]  }
  0x11   : > { %493 = vmatprep.mubr.bf16.mxu0 %v782_v11  ;;  %v776_v13 = vld [vmem:[%s916_s1 + $0x48] sm:$0xff]   ;;  %v778_v15 = vld [vmem:[%s916_s1 + $0x40] sm:$0xff]  }
  0x12   : > { %721 = vmatpush3.bf16.msra.mxu0 %v767_v3  ;;  %v777_v14 = vld [vmem:[%s916_s1 + $0x8] sm:$0xff]   ;;  %v779_v16 = vld [vmem:[%s916_s1] sm:$0xff]  }
  0x13   : > { %722 = vmatprep.subr.bf16.mxu0 %v768_v4  ;;  %v705_v22 = vld [vmem:[%s917_s2] ss:$0 sm:$0xff] }
  0x16   : > { %723 = vmatpush3.bf16.msra.mxu0 %v769_v5 }
  0x17   : > { %724 = vmatprep.subr.bf16.mxu0 %v770_v6 }
  0x1a   : > { %725 = vmatpush3.bf16.msra.mxu0 %v771_v7 }
  0x1b   : > { %726 = vmatprep.subr.bf16.mxu0 %v772_v8 }
  0x1e   : > { %727 = vmatpush3.bf16.msra.mxu0 %v773_v9 }
  0x1f   : > { %728 = vmatprep.subr.bf16.mxu0 %v774_v10 }
  0x22   : > { %729 = vmatpush3.bf16.msra.mxu0 %v775_v12 }
  0x23   : > { %730 = vmatprep.subr.bf16.mxu0 %v776_v13 }
  0x26   : > { %731 = vmatpush3.bf16.msra.mxu0 %v777_v14 }
  0x27   : > { %732 = vmatprep.subr.bf16.mxu0 %v778_v15 }
  0x2a   : > { %733 = vmatpush3.bf16.msra.mxu0 %v779_v16 }
  0x2d   : > { %494 = vmatmul.mubr.bf16.vlgmr.msra.gmra.mxu0 %v780_v17 }
  0xed   : > { %v734_v18 = vpop.f32.mrf.mxu0 }
  0xef   : > { %v735_v19 = vpop.f32.mrf.mxu0 }
  0xf0   : > { %v736_v21 = vadd.f32 %v735_v19, %v734_v18 }
  0xf1   : > { %v737_v20 = vpop.f32.mrf.mxu0 }
  0xf2   : > { %v518_v25 = vadd.f32 %v736_v21, %v705_v22 }
  0xf3   : > { %v738_v23 = vpop.f32.mrf.mxu0 }
  0xf4   : > { %v739_v24 = vadd.f32 %v738_v23, %v737_v20 }
  0xf6   : > { %v519_v26 = vadd.f32 %v739_v24, %v705_v22 }
  0xf8   : > { %v716_v27 = vpack.c.bf16 %v519_v26, %v518_v25 }
  0xfa   : > { %717 = vst [vmem:[%s310_s8] sm:$0xff] %v716_v27  }
  0xfb PF: > { %s13_s14 = sadd.s32 1, %s805_s14   ;;  %s919_s12 = smov %s801_s13 }
  0xfc   : > { %p10_p5 = scmp.ge.s32.totalorder %s13_s14, 4   ;;  %s920_s13 = smov %s922_s15 }
  0xfe   :  { %12 = sbr.rel (!%p10_p5) target bundleno = 2 (0x2), region = 76 }

// kernel: _lambda_.56
= control target key start
LH: loop header
LB: loop body
LE: loop exit
PB: predicated region body
PF: predicated region fallthrough
CT: control target
= control target key end

     0   :  { %vm20_vm0 = vcmask 516096   ;;  %v78_v0 = vmov 0.0   ;;  %vm26_vm1 = vcmask 523264   ;;  %s125_s0 = inlined_call_operand.vmem [shape: bf16[8,64], index: 0, kind: input, shape index: {}]   ;;  %s126_s1 = inlined_call_operand.vmem [shape: f32[1,64], index: 1, kind: input, shape index: {}]   ;;  %s127_s2 = inlined_call_operand.vmem [shape: f32[1,64], index: 2, kind: input, shape index: {}]   ;;  %s128_s3 = inlined_call_operand.vmem [shape: f32[1,64], index: 3, kind: output, shape index: {0}]   ;;  %s129_s4 = inlined_call_operand.vmem [shape: f32[1,64], index: 4, kind: output, shape index: {1}]  }
   0x1   :  { %21 = vst.msk [vmem:[#allocation2] sm:$0x1] %vm20_vm0, %v78_v0  ;;  %22 = vst.msk [vmem:[#allocation3] sm:$0x1] %vm20_vm0, %v78_v0  ;;  %v23_v1 = vld [vmem:[%s125_s0] sm:$0xf] }
   0x2   :  { %v24_v2 = vunpack.c.l.bf16 %v23_v1  ;;  %v58_v30 = vld [vmem:[%s126_s1] sm:$0x1] }
   0x3   :  { %v63_v33 = vld [vmem:[%s127_s2] sm:$0x1] }
   0x4   :  { %v27_v3 = vsel %vm26_vm1, %v24_v2, 0.0  ;;  %v38_v4 = vmul.f32 %v24_v2, %v24_v2 }
   0x5   :  { %v28_v5 = vrot.slane %v27_v3, 4 }
   0x6   :  { %v39_v6 = vsel %vm26_vm1, %v38_v4, 0.0 }
   0x7   :  { %v29_v7 = vadd.f32 %v28_v5, %v27_v3  ;;  %v40_v8 = vrot.slane %v39_v6, 4 }
   0x8   :  { %v25_v15 = vld [vmem:[#allocation2] sm:$0x1]  ;;  %v37_v18 = vld [vmem:[#allocation3] sm:$0x1] }
   0x9   :  { %v30_v9 = vrot.slane %v29_v7, 2  ;;  %v41_v10 = vadd.f32 %v40_v8, %v39_v6 }
   0xb   :  { %v31_v11 = vadd.f32 %v30_v9, %v29_v7  ;;  %v42_v12 = vrot.slane %v41_v10, 2 }
   0xd   :  { %v32_v13 = vrot.slane %v31_v11, 1  ;;  %v43_v14 = vadd.f32 %v42_v12, %v41_v10 }
   0xf   :  { %v33_v16 = vadd.f32 %v32_v13, %v31_v11  ;;  %v44_v17 = vrot.slane %v43_v14, 1 }
  0x11   :  { %v34_v19 = vadd.f32 %v33_v16, %v25_v15  ;;  %v45_v20 = vadd.f32 %v44_v17, %v43_v14 }
  0x13   :  { %36 = vst.msk [vmem:[#allocation2] sm:$0x1] %vm20_vm0, %v34_v19  ;;  %v46_v21 = vadd.f32 %v45_v20, %v37_v18 }
  0x15   :  { %47 = vst.msk [vmem:[#allocation3] sm:$0x1] %vm20_vm0, %v46_v21 }
  0x1a   :  { %v51_v22 = vld [vmem:[#allocation2] sm:$0x1] }
  0x1b   :  { %v52_v23 = vmul.f32 0.125, %v51_v22 }
  0x1c   :  { %v53_v24 = vld [vmem:[#allocation3] sm:$0x1] }
  0x1d   :  { %v54_v25 = vmul.f32 0.125, %v53_v24  ;;  %v55_v26 = vmul.f32 %v52_v23, %v52_v23 }
  0x1f   :  { %v56_v27 = vsub.f32 %v54_v25, %v55_v26 }
  0x21   :  { %v57_v28 = vmax.f32 %v56_v27, 0.0 }
  0x23   :  { %v59_v29 = vadd.f32 1e-05, %v57_v28 }
  0x25   :  { %76 = vrsqrt.f32 %v59_v29 }
  0x32   :  { %v77_v31 = vpop.eup %76 }
  0x33   :  { %v61_v32 = vmul.f32 %v77_v31, %v58_v30 }
  0x35   :  { %62 = vst.msk [vmem:[%s128_s3] sm:$0x1] %vm20_vm0, %v61_v32  ;;  %v64_v34 = vmul.f32 %v61_v32, %v52_v23 }
  0x37   :  { %v65_v35 = vsub.f32 %v63_v33, %v64_v34 }
  0x39   :  { %66 = vst.msk [vmem:[%s129_s4] sm:$0x1] %vm20_vm0, %v65_v35 }

// kernel: _lambda_.55
= control target key start
LH: loop header
LB: loop body
LE: loop exit
PB: predicated region body
PF: predicated region fallthrough
CT: control target
= control target key end

     0   :  { %s775_s12 = smov 0   ;;  %s777_s13 = smov 0   ;;  %s838_s0 = inlined_call_operand.vmem [shape: bf16[1,8,512], index: 0, kind: input, shape index: {}]   ;;  %s839_s1 = inlined_call_operand.vmem [shape: bf16[1,512,128], index: 1, kind: input, shape index: {}]   ;;  %s840_s2 = inlined_call_operand.vmem [shape: f32[1,128], index: 2, kind: input, shape index: {}]   ;;  %s841_s3 = inlined_call_operand.vmem [shape: bf16[1,8,128], index: 3, kind: output, shape index: {}]  }
   0x1   :  { %s779_s14 = smov 0  }
   0x2 LB: > { %s28_s15 = sadd.s32 1, %s748_s13  ;;  %p636_p0 = scmp.ge.s32.totalorder %s752_s14, 1  ;;  %s752_s14 = sphi %s779_s14, %s13_s14   ;;  %s748_s13 = sphi %s777_s13, %s843_s13   ;;  %s744_s12 = sphi %s775_s12, %s842_s12  }
   0x3   : > { %p29_p1 = scmp.ge.s32.totalorder %s28_s15, 2  ;;  %p210_p2 = scmp.lt.s32.totalorder %s752_s14, 3 }
   0x5   : > { %s845_s15 = smov (%p29_p1, %s28_s15), 0  ;;  %p211_p3 = pnand %p636_p0, %p210_p2 }
   0x6   : > { %s637_s16 = sshll.u32 (!%p211_p3), %s744_s12, 1  ;;  %s639_s17 = sshll.u32 (!%p211_p3), %s744_s12, 5 }
   0x7   : > { %214 = sbr.rel (%p211_p3) target bundleno = 267 (0x10b), region = 32  ;;  %p267_p4 = scmp.lt.s32.totalorder (!%p211_p3), %s637_s16, 3 }
   0x8   : > { %p279_p5 = scmp.lt.s32.totalorder (!%p211_p3), %s639_s17, 63  ;;  %p641_p6 = scmp.ne.s32.totalorder (!%p211_p3), %s744_s12, 0 }
   0xc   : > { %s847_s16 = smov (!%p267_p4, %s637_s16), 3  ;;  %s849_s17 = smov (!%p279_p5, %s639_s17), 63 }
   0xd   : > { %s638_s18 = sshll.u32 %s847_s16, 2  ;;  %s640_s22 = sshll.u32 %s849_s17, 2 }
   0xe   : > { %s274_s21 = scalar_lea.vmem %s838_s0, %s638_s18  ;;  %s803_s25 = scalar_lea.vmem %s839_s1, %s640_s22 }
   0xf   : > { %306 = sbr.rel (%p641_p6) target bundleno = 22 (0x16), region = 36 }
  0x14   : > { %v754_v0 = vmov 0.0  }
  0x15   : > { %307 = vst [vmem:[#allocation2] sm:$0xff] %v754_v0 }
  0x16 PF: > { %v712_v1 = vld [vmem:[%s803_s25 + $0x78] sm:$0xff]   ;;  %v714_v3 = vld [vmem:[%s803_s25 + $0x70] sm:$0xff]   ;;  %v716_v5 = vld [vmem:[%s803_s25 + $0x68] sm:$0xff]   ;;  %p660_p7 = scmp.ne.s32.totalorder %s744_s12, 1 }
  0x17   : > { %v713_v2 = vld [vmem:[%s803_s25 + $0x38] sm:$0xff]   ;;  %665 = vmatprep.subr.bf16.mxu0 %v712_v1  ;;  %v715_v4 = vld [vmem:[%s803_s25 + $0x30] sm:$0xff]   ;;  %v717_v6 = vld [vmem:[%s803_s25 + $0x28] sm:$0xff]  }
  0x18   : > { %666 = vmatpush3.bf16.msra.mxu0 %v713_v2  ;;  %v718_v7 = vld [vmem:[%s803_s25 + $0x60] sm:$0xff]   ;;  %v720_v9 = vld [vmem:[%s803_s25 + $0x58] sm:$0xff]   ;;  %v722_v11 = vld [vmem:[%s803_s25 + $0x50] sm:$0xff]  }
  0x19   : > { %667 = vmatprep.subr.bf16.mxu0 %v714_v3  ;;  %v719_v8 = vld [vmem:[%s803_s25 + $0x20] sm:$0xff]   ;;  %v721_v10 = vld [vmem:[%s803_s25 + $0x18] sm:$0xff]   ;;  %v723_v14 = vld [vmem:[%s803_s25 + $0x10] sm:$0xff]  }
  0x1a   : > { %v309_v12 = vld [vmem:[%s274_s21] sm:$0xff]  ;;  %v724_v15 = vld [vmem:[%s803_s25 + $0x48] sm:$0xff]  }
  0x1b   : > { %v643_v13 = vcombine.high %v309_v12, %v309_v12  ;;  %v725_v16 = vld [vmem:[%s803_s25 + $0x8] sm:$0xff]   ;;  %v726_v17 = vld [vmem:[%s803_s25 + $0x40] sm:$0xff]   ;;  %v642_v19 = vcombine.low %v309_v12, %v309_v12 }
  0x1c   : > { %668 = vmatpush3.bf16.msra.mxu0 %v715_v4  ;;  %v727_v18 = vld [vmem:[%s803_s25] sm:$0xff]  }
  0x1d   : > { %669 = vmatprep.subr.bf16.mxu0 %v716_v5  ;;  %477 = vmatprep.mubr.bf16.mxu0 %v643_v13  ;;  %v308_v21 = vld [vmem:[#allocation2] sm:$0xff] }
  0x20   : > { %670 = vmatpush3.bf16.msra.mxu0 %v717_v6 }
  0x21   : > { %671 = vmatprep.subr.bf16.mxu0 %v718_v7 }
  0x24   : > { %672 = vmatpush3.bf16.msra.mxu0 %v719_v8 }
  0x25   : > { %673 = vmatprep.subr.bf16.mxu0 %v720_v9 }
  0x28   : > { %674 = vmatpush3.bf16.msra.mxu0 %v721_v10 }
  0x29   : > { %675 = vmatprep.subr.bf16.mxu0 %v722_v11 }
  0x2c   : > { %676 = vmatpush3.bf16.msra.mxu0 %v723_v14 }
  0x2d   : > { %677 = vmatprep.subr.bf16.mxu0 %v724_v15 }
  0x30   : > { %678 = vmatpush3.bf16.msra.mxu0 %v725_v16 }
  0x31   : > { %679 = vmatprep.subr.bf16.mxu0 %v726_v17 }
  0x34   : > { %680 = vmatpush3.bf16.msra.mxu0 %v727_v18 }
  0x37   : > { %478 = vmatmul.mubr.bf16.vlgmr.msra.gmra.mxu0 %v642_v19 }
  0xf7   : > { %v681_v20 = vpop.f32.mrf.mxu0 }
  0xf9   : > { %v682_v22 = vpop.f32.mrf.mxu0 }
  0xfa   : > { %v683_v23 = vadd.f32 %v682_v22, %v681_v20  ;;  %490 = sbr.rel (%p660_p7) target bundleno = 267 (0x10b), region = 40 }
  0xfb   : > { %v684_v24 = vpop.f32.mrf.mxu0 }
  0xfc   : > { %v485_v25 = vadd.f32 %v683_v23, %v308_v21 }
  0xfd   : > { %v685_v26 = vpop.f32.mrf.mxu0 }
  0xfe   : > { %486 = vst [vmem:[#allocation2] sm:$0xff] %v485_v25 }
  0xff   : > { %v661_v28 = vld [vmem:[%s840_s2] ss:$0 sm:$0xff] }
 0x105   : > { %v491_v27 = vld [vmem:[#allocation2] sm:$0xff] }
 0x106   : > { %v499_v29 = vadd.f32 %v661_v28, %v491_v27 }
 0x108   : > { %v500_v30 = vpack.c.bf16 %v499_v29, %v499_v29 }
 0x10a   : > { %501 = vst [vmem:[%s841_s3] sm:$0xf] %v500_v30 }
 0x10b PF: > { %s13_s14 = sadd.s32 1, %s752_s14   ;;  %s842_s12 = smov %s748_s13 }
 0x10c   : > { %p10_p8 = scmp.ge.s32.totalorder %s13_s14, 4   ;;  %s843_s13 = smov %s845_s15 }
 0x10e   :  { %12 = sbr.rel (!%p10_p8) target bundleno = 2 (0x2), region = 76 }

// kernel: _lambda_.57
= control target key start
LH: loop header
LB: loop body
LE: loop exit
PB: predicated region body
PF: predicated region fallthrough
CT: control target
= control target key end

     0   :  { %vm33_vm0 = vcmask 519168   ;;  %s73_s0 = inlined_call_operand.vmem [shape: bf16[8,64], index: 0, kind: input, shape index: {}]   ;;  %s74_s1 = inlined_call_operand.vmem [shape: f32[1,64], index: 1, kind: input, shape index: {}]   ;;  %s75_s2 = inlined_call_operand.vmem [shape: f32[1,64], index: 2, kind: input, shape index: {}]   ;;  %s76_s3 = inlined_call_operand.vmem [shape: bf16[8,64], index: 3, kind: output, shape index: {}]  }
   0x1   :  { %v14_v0 = vld [vmem:[%s73_s0] sm:$0xf] }
   0x2   :  { %v39_v1 = vld [vmem:[%s74_s1] ss:$0 sm:$0xff]  ;;  %v15_v2 = vunpack.c.l.bf16 %v14_v0 }
   0x3   :  { %v40_v3 = vld [vmem:[%s75_s2] ss:$0 sm:$0xff] }
   0x4   :  { %v23_v4 = vmul.f32 %v39_v1, %v15_v2 }
   0x6   :  { %v31_v5 = vadd.f32 %v40_v3, %v23_v4 }
   0x8   :  { %v32_v6 = vpack.c.bf16 %v31_v5, %v31_v5 }
   0xa   :  { %34 = vst.msk [vmem:[%s76_s3] sm:$0xf] %vm33_vm0, %v32_v6 }

// kernel: _lambda_.61
= control target key start
LH: loop header
LB: loop body
LE: loop exit
PB: predicated region body
PF: predicated region fallthrough
CT: control target
= control target key end

     0   :  { %s52_s17 = smov 64   ;;  %vm41_vm0 = vcmask 523264   ;;  %s93_s3 = inlined_call_operand.vmem [shape: bf16[8,64], index: 3, kind: input, shape index: {}]   ;;  %s94_s0 = inlined_call_operand.vmem [shape: bf16[8,64], index: 0, kind: input, shape index: {}]   ;;  %s95_s1 = inlined_call_operand.vmem [shape: f32[1,64], index: 1, kind: input, shape index: {}]   ;;  %s96_s2 = inlined_call_operand.vmem [shape: f32[1,64], index: 2, kind: input, shape index: {}]   ;;  %s97_s4 = inlined_call_operand.vmem [shape: bf16[8,128], index: 4, kind: output, shape index: {}]  }
   0x1   :  { %v35_v0 = vld [vmem:[%s93_s3] sm:$0xf] }
   0x2   :  { %v36_v1 = vunpack.c.l.bf16 %v35_v0  ;;  %v17_v2 = vld [vmem:[%s94_s0] sm:$0xf] }
   0x3   :  { %v18_v3 = vunpack.c.l.bf16 %v17_v2  ;;  %v49_v4 = vld [vmem:[%s95_s1] ss:$0 sm:$0xff] }
   0x4   :  { %38 = vrot.lane.b32.xlu0 %v36_v1, %s52_s17  ;;  %v50_v6 = vld [vmem:[%s96_s2] ss:$0 sm:$0xff] }
   0x5   :  { %v26_v5 = vmul.f32 %v49_v4, %v18_v3 }
   0x7   :  { %v34_v7 = vadd.f32 %v50_v6, %v26_v5 }
  0x76   :  { %v39_v8 = vpop.permute.xlu0 %38 }
  0x77   :  { %v42_v9 = vsel %vm41_vm0, %v34_v7, %v39_v8 }
  0x78   :  { %v43_v10 = vpack.c.bf16 %v42_v9, %v42_v9 }
  0x7a   :  { %44 = vst [vmem:[%s97_s4] sm:$0xf] %v43_v10 }

// kernel: _lambda_.58
= control target key start
LH: loop header
LB: loop body
LE: loop exit
PB: predicated region body
PF: predicated region fallthrough
CT: control target
= control target key end

     0   :  { %s1003_s12 = smov 0   ;;  %s1005_s13 = smov 0   ;;  %s1090_s0 = inlined_call_operand.vmem [shape: bf16[1,2,1024], index: 0, kind: input, shape index: {}]   ;;  %s1091_s1 = inlined_call_operand.vmem [shape: bf16[1,1024,128], index: 1, kind: input, shape index: {}]   ;;  %s1092_s2 = inlined_call_operand.vmem [shape: f32[1,128], index: 2, kind: input, shape index: {}]   ;;  %s1093_s3 = inlined_call_operand.vmem [shape: bf16[1,2,128], index: 3, kind: output, shape index: {}]  }
   0x1   :  { %s1007_s14 = smov 0  }
   0x2 LB: > { %s28_s15 = sadd.s32 1, %s975_s13  ;;  %p812_p0 = scmp.ge.s32.totalorder %s979_s14, 1  ;;  %s979_s14 = sphi %s1007_s14, %s13_s14   ;;  %s975_s13 = sphi %s1005_s13, %s1095_s13   ;;  %s971_s12 = sphi %s1003_s12, %s1094_s12  }
   0x3   : > { %p29_p1 = scmp.ge.s32.totalorder %s28_s15, 2  ;;  %p209_p2 = scmp.lt.s32.totalorder %s979_s14, 3 }
   0x5   : > { %s1097_s15 = smov (%p29_p1, %s28_s15), 0  ;;  %p210_p3 = pnand %p812_p0, %p209_p2 }
   0x6   : > { %s813_s16 = sshll.u32 (!%p210_p3), %s971_s12, 2  ;;  %s814_s17 = sshll.u32 (!%p210_p3), %s971_s12, 6 }
   0x7   : > { %213 = sbr.rel (%p210_p3) target bundleno = 270 (0x10e), region = 32  ;;  %p264_p4 = scmp.lt.s32.totalorder (!%p210_p3), %s813_s16, 7 }
   0x8   : > { %p275_p5 = scmp.lt.s32.totalorder (!%p210_p3), %s814_s17, 127  ;;  %p816_p6 = scmp.ne.s32.totalorder (!%p210_p3), %s971_s12, 0 }
   0xc   : > { %s1099_s16 = smov (!%p264_p4, %s813_s16), 7  ;;  %s1101_s17 = smov (!%p275_p5, %s814_s17), 127 }
   0xd   : > { %s270_s20 = scalar_lea.vmem %s1090_s0, %s1099_s16  ;;  %s815_s21 = sshll.u32 %s1101_s17, 2 }
   0xe   : > { %s1034_s24 = scalar_lea.vmem %s1091_s1, %s815_s21  ;;  %301 = sbr.rel (%p816_p6) target bundleno = 21 (0x15), region = 36 }
  0x13   : > { %v981_v0 = vmov 0.0  }
  0x14   : > { %302 = vst [vmem:[#allocation2] sm:$0x3] %v981_v0 }
  0x15 PF: > { %v925_v1 = vld [vmem:[%s1034_s24 + $0x78] sm:$0xff]   ;;  %v929_v5 = vld [vmem:[%s1034_s24 + $0x70] sm:$0xff]   ;;  %v933_v9 = vld [vmem:[%s1034_s24 + $0x68] sm:$0xff]   ;;  %v381_v31 = vlaneseq  ;;  %v982_v35 = vmov 1966171168   ;;  %p850_p7 = scmp.ne.s32.totalorder %s971_s12, 1 }
  0x16   : > { %v926_v2 = vld [vmem:[%s1034_s24 + $0xf8] sm:$0xff]   ;;  %855 = vmatprep.subr.bf16.mxu0 %v925_v1  ;;  %v930_v6 = vld [vmem:[%s1034_s24 + $0xf0] sm:$0xff]   ;;  %v934_v10 = vld [vmem:[%s1034_s24 + $0xe8] sm:$0xff]   ;;  %v379_v36 = vunpack.c.l.s4 %v982_v35 }
  0x17   : > { %v927_v3 = vld [vmem:[%s1034_s24 + $0x38] sm:$0xff]   ;;  %877 = vmatprep.subr.bf16.mxu1 %v926_v2  ;;  %v931_v7 = vld [vmem:[%s1034_s24 + $0x30] sm:$0xff]   ;;  %v935_v11 = vld [vmem:[%s1034_s24 + $0x28] sm:$0xff]   ;;  %v382_v37 = vshrl.u32 %v381_v31, 7 }
  0x18   : > { %v928_v4 = vld [vmem:[%s1034_s24 + $0xb8] sm:$0xff]   ;;  %856 = vmatpush3.bf16.msra.mxu0 %v927_v3  ;;  %v932_v8 = vld [vmem:[%s1034_s24 + $0xb0] sm:$0xff]   ;;  %v936_v12 = vld [vmem:[%s1034_s24 + $0xa8] sm:$0xff]   ;;  %v380_v39 = vunpack.c.0.s8 %v379_v36 }
  0x19   : > { %878 = vmatpush3.bf16.msra.mxu1 %v928_v4  ;;  %857 = vmatprep.subr.bf16.mxu0 %v929_v5  ;;  %v937_v13 = vld [vmem:[%s1034_s24 + $0x60] sm:$0xff]   ;;  %v941_v17 = vld [vmem:[%s1034_s24 + $0x58] sm:$0xff]   ;;  %v945_v21 = vld [vmem:[%s1034_s24 + $0x50] sm:$0xff]  }
  0x1a   : > { %879 = vmatprep.subr.bf16.mxu1 %v930_v6  ;;  %v938_v14 = vld [vmem:[%s1034_s24 + $0xe0] sm:$0xff]   ;;  %v942_v18 = vld [vmem:[%s1034_s24 + $0xd8] sm:$0xff]   ;;  %v946_v22 = vld [vmem:[%s1034_s24 + $0xd0] sm:$0xff]   ;;  %v383_v40 = vsub.s32 %v380_v39, %v382_v37 }
  0x1b   : > { %v939_v15 = vld [vmem:[%s1034_s24 + $0x20] sm:$0xff]   ;;  %v943_v19 = vld [vmem:[%s1034_s24 + $0x18] sm:$0xff]   ;;  %v947_v23 = vld [vmem:[%s1034_s24 + $0x10] sm:$0xff]  }
  0x1c   : > { %858 = vmatpush3.bf16.msra.mxu0 %v931_v7  ;;  %v940_v16 = vld [vmem:[%s1034_s24 + $0xa0] sm:$0xff]   ;;  %v944_v20 = vld [vmem:[%s1034_s24 + $0x98] sm:$0xff]   ;;  %v948_v24 = vld [vmem:[%s1034_s24 + $0x90] sm:$0xff]  }
  0x1d   : > { %880 = vmatpush3.bf16.msra.mxu1 %v932_v8  ;;  %859 = vmatprep.subr.bf16.mxu0 %v933_v9  ;;  %v949_v25 = vld [vmem:[%s1034_s24 + $0x48] sm:$0xff]   ;;  %v953_v29 = vld [vmem:[%s1034_s24 + $0x40] sm:$0xff]  }
  0x1e   : > { %881 = vmatprep.subr.bf16.mxu1 %v934_v10  ;;  %v950_v26 = vld [vmem:[%s1034_s24 + $0xc8] sm:$0xff]   ;;  %v954_v30 = vld [vmem:[%s1034_s24 + $0xc0] sm:$0xff]  }
  0x1f   : > { %v951_v27 = vld [vmem:[%s1034_s24 + $0x8] sm:$0xff]   ;;  %v955_v32 = vld [vmem:[%s1034_s24] sm:$0xff]  }
  0x20   : > { %860 = vmatpush3.bf16.msra.mxu0 %v935_v11  ;;  %v952_v28 = vld [vmem:[%s1034_s24 + $0x88] sm:$0xff]   ;;  %v956_v33 = vld [vmem:[%s1034_s24 + $0x80] sm:$0xff]  }
  0x21   : > { %882 = vmatpush3.bf16.msra.mxu1 %v936_v12  ;;  %861 = vmatprep.subr.bf16.mxu0 %v937_v13  ;;  %v817_v34 = vld.sshfl [vmem:[%s270_s20] sm:$0x33 pattern:$0x75316420] }
  0x22   : > { %883 = vmatprep.subr.bf16.mxu1 %v938_v14  ;;  %v377_v38 = vcombine.high %v817_v34, %v817_v34  ;;  %v384_v42 = vrot.slane %v817_v34, %v383_v40  ;;  %v303_v52 = vld [vmem:[#allocation2] sm:$0x3] }
  0x24   : > { %862 = vmatpush3.bf16.msra.mxu0 %v939_v15  ;;  %v391_v41 = vrot.slane %v377_v38, %v383_v40  ;;  %v392_v44 = vcombine.high %v384_v42, %v384_v42 }
  0x25   : > { %884 = vmatpush3.bf16.msra.mxu1 %v940_v16  ;;  %863 = vmatprep.subr.bf16.mxu0 %v941_v17 }
  0x26   : > { %885 = vmatprep.subr.bf16.mxu1 %v942_v18  ;;  %622 = vmatprep.mubr.bf16.mxu0 %v391_v41  ;;  %v393_v43 = vcombine.high %v391_v41, %v391_v41 }
  0x28   : > { %864 = vmatpush3.bf16.msra.mxu0 %v943_v19  ;;  %662 = vmatprep.mubr.bf16.mxu1 %v393_v43 }
  0x29   : > { %886 = vmatpush3.bf16.msra.mxu1 %v944_v20  ;;  %865 = vmatprep.subr.bf16.mxu0 %v945_v21 }
  0x2a   : > { %887 = vmatprep.subr.bf16.mxu1 %v946_v22 }
  0x2c   : > { %866 = vmatpush3.bf16.msra.mxu0 %v947_v23 }
  0x2d   : > { %888 = vmatpush3.bf16.msra.mxu1 %v948_v24  ;;  %867 = vmatprep.subr.bf16.mxu0 %v949_v25 }
  0x2e   : > { %889 = vmatprep.subr.bf16.mxu1 %v950_v26 }
  0x30   : > { %868 = vmatpush3.bf16.msra.mxu0 %v951_v27 }
  0x31   : > { %890 = vmatpush3.bf16.msra.mxu1 %v952_v28  ;;  %869 = vmatprep.subr.bf16.mxu0 %v953_v29 }
  0x32   : > { %891 = vmatprep.subr.bf16.mxu1 %v954_v30 }
  0x34   : > { %870 = vmatpush3.bf16.msra.mxu0 %v955_v32 }
  0x35   : > { %892 = vmatpush3.bf16.msra.mxu1 %v956_v33 }
  0x37   : > { %623 = vmatmul.mubr.bf16.vlgmr.msra.gmra.mxu0 %v384_v42 }
  0x38   : > { %663 = vmatmul.mubr.bf16.vlgmr.msra.gmra.mxu1 %v392_v44 }
  0xf7   : > { %v871_v45 = vpop.f32.mrf.mxu0 }
  0xf8   : > { %v893_v46 = vpop.f32.mrf.mxu1 }
  0xf9   : > { %v872_v47 = vpop.f32.mrf.mxu0 }
  0xfa   : > { %v873_v48 = vadd.f32 %v872_v47, %v871_v45  ;;  %v894_v49 = vpop.f32.mrf.mxu1 }
  0xfb   : > { %v874_v50 = vpop.f32.mrf.mxu0  ;;  %v895_v51 = vadd.f32 %v894_v49, %v893_v46 }
  0xfc   : > { %v896_v53 = vpop.f32.mrf.mxu1 }
  0xfd   : > { %v875_v54 = vpop.f32.mrf.mxu0  ;;  %v665_v55 = vadd.f32 %v895_v51, %v873_v48  ;;  %675 = sbr.rel (%p850_p7) target bundleno = 270 (0x10e), region = 40 }
  0xfe   : > { %v897_v56 = vpop.f32.mrf.mxu1 }
  0xff   : > { %v670_v57 = vadd.f32 %v665_v55, %v303_v52 }
 0x101   : > { %671 = vst [vmem:[#allocation2] sm:$0x3] %v670_v57 }
 0x102   : > { %v851_v59 = vld [vmem:[%s1092_s2] ss:$0 sm:$0xff] }
 0x108   : > { %v676_v58 = vld [vmem:[#allocation2] sm:$0x3] }
 0x109   : > { %v684_v60 = vadd.f32 %v851_v59, %v676_v58 }
 0x10b   : > { %v685_v61 = vpack.c.bf16 %v684_v60, %v684_v60 }
 0x10d   : > { %686 = vst [vmem:[%s1093_s3] sm:$0x1] %v685_v61 }
 0x10e PF: > { %s13_s14 = sadd.s32 1, %s979_s14   ;;  %s1094_s12 = smov %s975_s13 }
 0x10f   : > { %p10_p8 = scmp.ge.s32.totalorder %s13_s14, 4   ;;  %s1095_s13 = smov %s1097_s15 }
 0x111   :  { %12 = sbr.rel (!%p10_p8) target bundleno = 2 (0x2), region = 76 }

// kernel: _lambda_.59
= control target key start
LH: loop header
LB: loop body
LE: loop exit
PB: predicated region body
PF: predicated region fallthrough
CT: control target
= control target key end

     0   :  { %s778_s12 = smov 0   ;;  %s780_s13 = smov 0   ;;  %s840_s0 = inlined_call_operand.vmem [shape: bf16[4,2,256], index: 0, kind: input, shape index: {}]   ;;  %s841_s1 = inlined_call_operand.vmem [shape: bf16[4,256,128], index: 1, kind: input, shape index: {}]   ;;  %s842_s2 = inlined_call_operand.vmem [shape: f32[1,128], index: 2, kind: input, shape index: {}]   ;;  %s843_s3 = inlined_call_operand.vmem [shape: bf16[4,2,128], index: 3, kind: output, shape index: {}]  }
   0x1   :  { %s782_s14 = smov 0  }
   0x2 LB: > { %s39_s15 = sadd.s32 1, %s750_s13  ;;  %p643_p0 = scmp.ge.s32.totalorder %s754_s14, 1  ;;  %s754_s14 = sphi %s782_s14, %s13_s14   ;;  %s750_s13 = sphi %s780_s13, %s845_s13   ;;  %s746_s12 = sphi %s778_s12, %s844_s12  }
   0x3   : > { %p41_p1 = scmp.ge.s32.totalorder %s39_s15, 4  ;;  %p209_p2 = scmp.lt.s32.totalorder %s754_s14, 5 }
   0x5   : > { %s847_s15 = smov (%p41_p1, %s39_s15), 0  ;;  %p210_p3 = pnand %p643_p0, %p209_p2 }
   0x6   : > { %p260_p4 = scmp.lt.s32.totalorder (!%p210_p3), %s746_s12, 3 }
   0x7   : > { %213 = sbr.rel (%p210_p3) target bundleno = 260 (0x104), region = 32 }
   0xc   : > { %s849_s12 = smov (!%p260_p4, %s746_s12), 3  ;;  %v756_v6 = vmov 1966171168   ;;  %v349_v8 = vlaneseq  ;;  %v757_v26 = vmov 0.0   ;;  %v664_v34 = vld [vmem:[%s842_s2] ss:$0 sm:$0xff] }
   0xd   : > { %s667_s16 = sshll.u32 %s849_s12, 7  ;;  %v347_v7 = vunpack.c.l.s4 %v756_v6  ;;  %s644_s20 = sshll.u32 %s849_s12, 1  ;;  %302 = vst [vmem:[#allocation2] sm:$0x3] %v757_v26 }
   0xe   : > { %s802_s19 = scalar_lea.vmem %s841_s1, %s667_s16  ;;  %v350_v12 = vshrl.u32 %v349_v8, 7  ;;  %s270_s23 = scalar_lea.vmem %s840_s0, %s644_s20 }
   0xf   : > { %v716_v0 = vld [vmem:[%s802_s19 + $0x78] sm:$0xff]   ;;  %v718_v2 = vld [vmem:[%s802_s19 + $0x70] sm:$0xff]   ;;  %v720_v4 = vld [vmem:[%s802_s19 + $0x68] sm:$0xff]   ;;  %v348_v11 = vunpack.c.0.s8 %v347_v7  ;;  %s296_s28 = scalar_lea.vmem %s843_s3, %s849_s12 }
  0x10   : > { %v717_v1 = vld [vmem:[%s802_s19 + $0x38] sm:$0xff]   ;;  %668 = vmatprep.subr.bf16.mxu0 %v716_v0  ;;  %v719_v3 = vld [vmem:[%s802_s19 + $0x30] sm:$0xff]   ;;  %v721_v5 = vld [vmem:[%s802_s19 + $0x28] sm:$0xff]  }
  0x11   : > { %669 = vmatpush3.bf16.msra.mxu0 %v717_v1  ;;  %v722_v9 = vld [vmem:[%s802_s19 + $0x60] sm:$0xff]   ;;  %v724_v13 = vld [vmem:[%s802_s19 + $0x58] sm:$0xff]   ;;  %v351_v15 = vsub.s32 %v348_v11, %v350_v12  ;;  %v726_v16 = vld [vmem:[%s802_s19 + $0x50] sm:$0xff]  }
  0x12   : > { %670 = vmatprep.subr.bf16.mxu0 %v718_v2  ;;  %v723_v10 = vld [vmem:[%s802_s19 + $0x20] sm:$0xff]   ;;  %v725_v14 = vld [vmem:[%s802_s19 + $0x18] sm:$0xff]   ;;  %v727_v19 = vld [vmem:[%s802_s19 + $0x10] sm:$0xff]  }
  0x13   : > { %v647_v17 = vld.sshfl [vmem:[%s270_s23] sm:$0x11 pattern:$0x75316420]  ;;  %v728_v21 = vld [vmem:[%s802_s19 + $0x48] sm:$0xff]  }
  0x14   : > { %v345_v18 = vcombine.high %v647_v17, %v647_v17  ;;  %v729_v22 = vld [vmem:[%s802_s19 + $0x8] sm:$0xff]   ;;  %v730_v23 = vld [vmem:[%s802_s19 + $0x40] sm:$0xff]   ;;  %v352_v25 = vrot.slane %v647_v17, %v351_v15 }
  0x15   : > { %671 = vmatpush3.bf16.msra.mxu0 %v719_v3  ;;  %v731_v24 = vld [vmem:[%s802_s19] sm:$0xff]  }
  0x16   : > { %672 = vmatprep.subr.bf16.mxu0 %v720_v4  ;;  %v359_v20 = vrot.slane %v345_v18, %v351_v15  ;;  %v303_v28 = vld [vmem:[#allocation2] sm:$0x3] }
  0x18   : > { %490 = vmatprep.mubr.bf16.mxu0 %v359_v20 }
  0x19   : > { %673 = vmatpush3.bf16.msra.mxu0 %v721_v5 }
  0x1a   : > { %674 = vmatprep.subr.bf16.mxu0 %v722_v9 }
  0x1d   : > { %675 = vmatpush3.bf16.msra.mxu0 %v723_v10 }
  0x1e   : > { %676 = vmatprep.subr.bf16.mxu0 %v724_v13 }
  0x21   : > { %677 = vmatpush3.bf16.msra.mxu0 %v725_v14 }
  0x22   : > { %678 = vmatprep.subr.bf16.mxu0 %v726_v16 }
  0x25   : > { %679 = vmatpush3.bf16.msra.mxu0 %v727_v19 }
  0x26   : > { %680 = vmatprep.subr.bf16.mxu0 %v728_v21 }
  0x29   : > { %681 = vmatpush3.bf16.msra.mxu0 %v729_v22 }
  0x2a   : > { %682 = vmatprep.subr.bf16.mxu0 %v730_v23 }
  0x2d   : > { %683 = vmatpush3.bf16.msra.mxu0 %v731_v24 }
  0x30   : > { %491 = vmatmul.mubr.bf16.vlgmr.msra.gmra.mxu0 %v352_v25 }
  0xf0   : > { %v684_v27 = vpop.f32.mrf.mxu0 }
  0xf2   : > { %v685_v29 = vpop.f32.mrf.mxu0 }
  0xf3   : > { %v686_v30 = vadd.f32 %v685_v29, %v684_v27 }
  0xf4   : > { %v687_v31 = vpop.f32.mrf.mxu0 }
  0xf5   : > { %v498_v32 = vadd.f32 %v686_v30, %v303_v28 }
  0xf6   : > { %v688_v33 = vpop.f32.mrf.mxu0 }
  0xf7   : > { %499 = vst [vmem:[#allocation2] sm:$0x3] %v498_v32 }
  0xfe   : > { %v503_v35 = vld [vmem:[#allocation2] sm:$0x3] }
  0xff   : > { %v511_v36 = vadd.f32 %v664_v34, %v503_v35 }
 0x101   : > { %v512_v37 = vpack.c.bf16 %v511_v36, %v511_v36 }
 0x103   : > { %513 = vst [vmem:[%s296_s28] sm:$0x1] %v512_v37 }
 0x104 PF: > { %s13_s14 = sadd.s32 1, %s754_s14   ;;  %s844_s12 = smov %s750_s13 }
 0x105   : > { %p10_p5 = scmp.ge.s32.totalorder %s13_s14, 6   ;;  %s845_s13 = smov %s847_s15 }
 0x107   :  { %12 = sbr.rel (!%p10_p5) target bundleno = 2 (0x2), region = 76 }

// kernel: _lambda_.64
= control target key start
LH: loop header
LB: loop body
LE: loop exit
PB: predicated region body
PF: predicated region fallthrough
CT: control target
= control target key end

     0   :  { %s140_s19 = smov 32   ;;  %vm71_vm0 = vcmask 261120   ;;  %vm92_vm1 = vcmask 519168   ;;  %s204_s3 = inlined_call_operand.vmem [shape: bf16[32,32], index: 3, kind: input, shape index: {}]   ;;  %s205_s0 = inlined_call_operand.vmem [shape: bf16[32,32], index: 0, kind: input, shape index: {}]   ;;  %s206_s1 = inlined_call_operand.vmem [shape: f32[1,32], index: 1, kind: input, shape index: {}]   ;;  %s207_s2 = inlined_call_operand.vmem [shape: f32[1,32], index: 2, kind: input, shape index: {}]   ;;  %s208_s4 = inlined_call_operand.vmem [shape: bf16[32,64], index: 4, kind: output, shape index: {}]  }
   0x1   :  { %v120_v0 = vld [vmem:[%s204_s3] sm:$0xff]   ;;  %v128_v1 = vld [vmem:[%s204_s3 + $0x8] sm:$0xff]  }
   0x2   :  { %v121_v2 = vunpack.c.l.bf16 %v120_v0  ;;  %v122_v3 = vunpack.c.h.bf16 %v120_v0  ;;  %v125_v4 = vunpack.c.l.bf16 %v128_v1  ;;  %v126_v5 = vunpack.c.h.bf16 %v128_v1  ;;  %v112_v8 = vld [vmem:[%s205_s0] sm:$0xff]   ;;  %v127_v12 = vld [vmem:[%s205_s0 + $0x8] sm:$0xff]  }
   0x3   :  { %v113_v9 = vunpack.c.l.bf16 %v112_v8  ;;  %v114_v10 = vunpack.c.h.bf16 %v112_v8  ;;  %v101_v11 = vld [vmem:[%s206_s1] ss:$0 sm:$0xff]  ;;  %v117_v15 = vunpack.c.l.bf16 %v127_v12  ;;  %v118_v16 = vunpack.c.h.bf16 %v127_v12 }
   0x4   :  { %v130_v6 = vpack.i.bf16 %v122_v3, %v121_v2  ;;  %v135_v7 = vpack.i.bf16 %v126_v5, %v125_v4  ;;  %v102_v17 = vld [vmem:[%s207_s2] ss:$0 sm:$0xff] }
   0x5   :  { %v32_v13 = vmul.f32 %v113_v9, %v101_v11  ;;  %v33_v14 = vmul.f32 %v114_v10, %v101_v11  ;;  %v34_v20 = vmul.f32 %v117_v15, %v101_v11  ;;  %v35_v21 = vmul.f32 %v118_v16, %v101_v11 }
   0x6   :  { %131 = vrot.lane.b32.xlu0 %v130_v6, %s140_s19 }
   0x7   :  { %v43_v18 = vadd.f32 %v102_v17, %v32_v13  ;;  %v44_v19 = vadd.f32 %v102_v17, %v33_v14  ;;  %v45_v27 = vadd.f32 %v102_v17, %v34_v20  ;;  %v46_v28 = vadd.f32 %v102_v17, %v35_v21 }
   0xa   :  { %136 = vrot.lane.b32.xlu0 %v135_v7, %s140_s19 }
  0x78   :  { %v132_v22 = vpop.permute.xlu0 %131 }
  0x79   :  { %v134_v23 = vunpack.i.h.bf16 %v132_v22  ;;  %v133_v24 = vunpack.i.l.bf16 %v132_v22 }
  0x7b   :  { %v72_v25 = vsel %vm71_vm0, %v43_v18, %v133_v24  ;;  %v73_v26 = vsel %vm71_vm0, %v44_v19, %v134_v23 }
  0x7c   :  { %v107_v29 = vpack.c.bf16 %v72_v25, %v72_v25  ;;  %v108_v30 = vpack.c.bf16 %v73_v26, %v73_v26  ;;  %v137_v31 = vpop.permute.xlu0 %136 }
  0x7d   :  { %v139_v32 = vunpack.i.h.bf16 %v137_v31  ;;  %v138_v33 = vunpack.i.l.bf16 %v137_v31 }
  0x7e   :  { %93 = vst.msk [vmem:[%s208_s4] sm:$0xf] %vm92_vm1, %v107_v29  ;;  %94 = vst.msk [vmem:[%s208_s4 + $0x4] sm:$0xf] %vm92_vm1, %v108_v30 }
  0x7f   :  { %v74_v34 = vsel %vm71_vm0, %v45_v27, %v138_v33  ;;  %v75_v35 = vsel %vm71_vm0, %v46_v28, %v139_v32 }
  0x80   :  { %v109_v36 = vpack.c.bf16 %v74_v34, %v74_v34  ;;  %v110_v37 = vpack.c.bf16 %v75_v35, %v75_v35 }
  0x82   :  { %95 = vst.msk [vmem:[%s208_s4 + $0x8] sm:$0xf] %vm92_vm1, %v109_v36  ;;  %96 = vst.msk [vmem:[%s208_s4 + $0xc] sm:$0xf] %vm92_vm1, %v110_v37 }

// kernel: _lambda_.62
= control target key start
LH: loop header
LB: loop body
LE: loop exit
PB: predicated region body
PF: predicated region fallthrough
CT: control target
= control target key end

     0   :  { %s816_s12 = smov 0   ;;  %s818_s13 = smov 0   ;;  %s903_s0 = inlined_call_operand.vmem [shape: bf16[4,8,512], index: 0, kind: input, shape index: {}]   ;;  %s904_s1 = inlined_call_operand.vmem [shape: bf16[4,512,128], index: 1, kind: input, shape index: {}]   ;;  %s905_s2 = inlined_call_operand.vmem [shape: f32[1,128], index: 2, kind: input, shape index: {}]   ;;  %s906_s3 = inlined_call_operand.vmem [shape: bf16[4,8,128], index: 3, kind: output, shape index: {}]  }
   0x1   :  { %s820_s14 = smov 0   ;;  %s822_s15 = smov 0  }
   0x2   :  { %s824_s16 = smov 0  }
   0x3 LB: > { %s28_s17 = sadd.s32 1, %s785_s14  ;;  %s39_s18 = sadd.s32 1, %s789_s15  ;;  %s793_s16 = sphi %s824_s16, %s13_s16   ;;  %s789_s15 = sphi %s822_s15, %s910_s15   ;;  %s785_s14 = sphi %s820_s14, %s909_s14   ;;  %s781_s13 = sphi %s818_s13, %s908_s13   ;;  %s777_s12 = sphi %s816_s12, %s907_s12  }
   0x4   : > { %p29_p0 = scmp.ge.s32.totalorder %s28_s17, 2  ;;  %p643_p1 = scmp.ge.s32.totalorder %s793_s16, 1 }
   0x5   : > { %p210_p2 = scmp.lt.s32.totalorder %s793_s16, 9 }
   0x6   : > { %s912_s17 = smov (%p29_p0, %s28_s17), 0  ;;  %s914_s18 = smov (!%p29_p0, %s39_s18), %s789_s15 }
   0x7   : > { %p211_p3 = pnand %p643_p1, %p210_p2  ;;  %p41_p4 = scmp.ge.s32.totalorder %s914_s18, 4 }
   0x8   : > { %s644_s19 = sshll.u32 (!%p211_p3), %s777_s12, 1  ;;  %p263_p5 = scmp.lt.s32.totalorder (!%p211_p3), %s781_s13, 3 }
   0x9   : > { %s916_s18 = smov (%p41_p4, %s914_s18), 0  ;;  %214 = sbr.rel (%p211_p3) target bundleno = 271 (0x10f), region = 32 }
   0xa   : > { %p267_p6 = scmp.lt.s32.totalorder (!%p211_p3), %s644_s19, 3  ;;  %s647_s20 = sshll.u32 (!%p211_p3), %s777_s12, 5 }
   0xb   : > { %p279_p7 = scmp.lt.s32.totalorder (!%p211_p3), %s647_s20, 63  ;;  %p651_p8 = scmp.ne.s32.totalorder (!%p211_p3), %s777_s12, 0 }
   0xe   : > { %s918_s13 = smov (!%p263_p5, %s781_s13), 3  ;;  %s920_s19 = smov (!%p267_p6, %s644_s19), 3 }
   0xf   : > { %s645_s21 = sshll.u32 %s918_s13, 2  ;;  %s648_s30 = sshll.u32 %s918_s13, 6 }
  0x10   : > { %s272_s22 = sadd.s32 %s645_s21, %s920_s19  ;;  %s853_s26 = scalar_lea.vmem %s906_s3, %s645_s21 }
  0x11   : > { %s646_s23 = sshll.u32 %s272_s22, 2  ;;  %s922_s20 = smov (!%p279_p7, %s647_s20), 63 }
  0x12   : > { %s858_s29 = scalar_lea.vmem %s903_s0, %s646_s23  ;;  %s285_s4 = sadd.s32 %s648_s30, %s922_s20 }
  0x13   : > { %s649_s5 = sshll.u32 %s285_s4, 2  ;;  %306 = sbr.rel (%p651_p8) target bundleno = 26 (0x1a), region = 36 }
  0x14   : > { %s863_s8 = scalar_lea.vmem %s904_s1, %s649_s5 }
  0x18   : > { %v795_v0 = vmov 0.0  }
  0x19   : > { %307 = vst [vmem:[#allocation2] sm:$0xff] %v795_v0 }
  0x1a PF: > { %v737_v1 = vld [vmem:[%s863_s8 + $0x78] sm:$0xff]   ;;  %v739_v3 = vld [vmem:[%s863_s8 + $0x70] sm:$0xff]   ;;  %v741_v5 = vld [vmem:[%s863_s8 + $0x68] sm:$0xff]   ;;  %p670_p9 = scmp.ne.s32.totalorder %s777_s12, 1 }
  0x1b   : > { %v738_v2 = vld [vmem:[%s863_s8 + $0x38] sm:$0xff]   ;;  %674 = vmatprep.subr.bf16.mxu0 %v737_v1  ;;  %v740_v4 = vld [vmem:[%s863_s8 + $0x30] sm:$0xff]   ;;  %v742_v6 = vld [vmem:[%s863_s8 + $0x28] sm:$0xff]  }
  0x1c   : > { %675 = vmatpush3.bf16.msra.mxu0 %v738_v2  ;;  %v743_v7 = vld [vmem:[%s863_s8 + $0x60] sm:$0xff]   ;;  %v745_v9 = vld [vmem:[%s863_s8 + $0x58] sm:$0xff]   ;;  %v747_v11 = vld [vmem:[%s863_s8 + $0x50] sm:$0xff]  }
  0x1d   : > { %676 = vmatprep.subr.bf16.mxu0 %v739_v3  ;;  %v744_v8 = vld [vmem:[%s863_s8 + $0x20] sm:$0xff]   ;;  %v746_v10 = vld [vmem:[%s863_s8 + $0x18] sm:$0xff]   ;;  %v748_v14 = vld [vmem:[%s863_s8 + $0x10] sm:$0xff]  }
  0x1e   : > { %v309_v12 = vld [vmem:[%s858_s29] sm:$0xff]  ;;  %v749_v15 = vld [vmem:[%s863_s8 + $0x48] sm:$0xff]  }
  0x1f   : > { %v653_v13 = vcombine.high %v309_v12, %v309_v12  ;;  %v750_v16 = vld [vmem:[%s863_s8 + $0x8] sm:$0xff]   ;;  %v751_v17 = vld [vmem:[%s863_s8 + $0x40] sm:$0xff]   ;;  %v652_v19 = vcombine.low %v309_v12, %v309_v12 }
  0x20   : > { %677 = vmatpush3.bf16.msra.mxu0 %v740_v4  ;;  %v752_v18 = vld [vmem:[%s863_s8] sm:$0xff]  }
  0x21   : > { %678 = vmatprep.subr.bf16.mxu0 %v741_v5  ;;  %477 = vmatprep.mubr.bf16.mxu0 %v653_v13  ;;  %v308_v21 = vld [vmem:[#allocation2] sm:$0xff] }
  0x24   : > { %679 = vmatpush3.bf16.msra.mxu0 %v742_v6 }
  0x25   : > { %680 = vmatprep.subr.bf16.mxu0 %v743_v7 }
  0x28   : > { %681 = vmatpush3.bf16.msra.mxu0 %v744_v8 }
  0x29   : > { %682 = vmatprep.subr.bf16.mxu0 %v745_v9 }
  0x2c   : > { %683 = vmatpush3.bf16.msra.mxu0 %v746_v10 }
  0x2d   : > { %684 = vmatprep.subr.bf16.mxu0 %v747_v11 }
  0x30   : > { %685 = vmatpush3.bf16.msra.mxu0 %v748_v14 }
  0x31   : > { %686 = vmatprep.subr.bf16.mxu0 %v749_v15 }
  0x34   : > { %687 = vmatpush3.bf16.msra.mxu0 %v750_v16 }
  0x35   : > { %688 = vmatprep.subr.bf16.mxu0 %v751_v17 }
  0x38   : > { %689 = vmatpush3.bf16.msra.mxu0 %v752_v18 }
  0x3b   : > { %478 = vmatmul.mubr.bf16.vlgmr.msra.gmra.mxu0 %v652_v19 }
  0xfb   : > { %v690_v20 = vpop.f32.mrf.mxu0 }
  0xfd   : > { %v691_v22 = vpop.f32.mrf.mxu0 }
  0xfe   : > { %v692_v23 = vadd.f32 %v691_v22, %v690_v20  ;;  %490 = sbr.rel (%p670_p9) target bundleno = 271 (0x10f), region = 40 }
  0xff   : > { %v693_v24 = vpop.f32.mrf.mxu0 }
 0x100   : > { %v485_v25 = vadd.f32 %v692_v23, %v308_v21 }
 0x101   : > { %v694_v26 = vpop.f32.mrf.mxu0 }
 0x102   : > { %486 = vst [vmem:[#allocation2] sm:$0xff] %v485_v25 }
 0x103   : > { %v671_v28 = vld [vmem:[%s905_s2] ss:$0 sm:$0xff] }
 0x109   : > { %v491_v27 = vld [vmem:[#allocation2] sm:$0xff] }
 0x10a   : > { %v499_v29 = vadd.f32 %v671_v28, %v491_v27 }
 0x10c   : > { %v500_v30 = vpack.c.bf16 %v499_v29, %v499_v29 }
 0x10e   : > { %501 = vst [vmem:[%s853_s26] sm:$0xf] %v500_v30 }
 0x10f PF: > { %s13_s16 = sadd.s32 1, %s793_s16   ;;  %s907_s12 = smov %s785_s14 }
 0x110   : > { %p10_p10 = scmp.ge.s32.totalorder %s13_s16, 10   ;;  %s908_s13 = smov %s789_s15 }
 0x111   : > { %s909_s14 = smov %s912_s17  ;;  %s910_s15 = smov %s916_s18 }
 0x112   :  { %12 = sbr.rel (!%p10_p10) target bundleno = 3 (0x3), region = 76 }

// kernel: _lambda_.65
= control target key start
LH: loop header
LB: loop body
LE: loop exit
PB: predicated region body
PF: predicated region fallthrough
CT: control target
= control target key end

     0   :  { %s862_s12 = smov 0   ;;  %s864_s13 = smov 0   ;;  %s940_s0 = inlined_call_operand.vmem [shape: bf16[4,32,256], index: 0, kind: input, shape index: {}]   ;;  %s941_s1 = inlined_call_operand.vmem [shape: bf16[4,256,128], index: 1, kind: input, shape index: {}]   ;;  %s942_s2 = inlined_call_operand.vmem [shape: f32[1,128], index: 2, kind: input, shape index: {}]   ;;  %s943_s3 = inlined_call_operand.vmem [shape: bf16[4,32,128], index: 3, kind: output, shape index: {}]  }
   0x1   :  { %s866_s14 = smov 0   ;;  %s868_s15 = smov 0  }
   0x2   :  { %s870_s16 = smov 0  }
   0x3 LB: > { %s35_s17 = sadd.s32 1, %s832_s14  ;;  %s39_s18 = sadd.s32 1, %s836_s15  ;;  %s840_s16 = sphi %s870_s16, %s13_s16   ;;  %s836_s15 = sphi %s868_s15, %s947_s15   ;;  %s832_s14 = sphi %s866_s14, %s946_s14   ;;  %s828_s13 = sphi %s864_s13, %s945_s13   ;;  %s824_s12 = sphi %s862_s12, %s944_s12  }
   0x4   : > { %p37_p0 = scmp.ge.s32.totalorder %s35_s17, 2  ;;  %p680_p1 = scmp.ge.s32.totalorder %s840_s16, 1 }
   0x5   : > { %p212_p2 = scmp.lt.s32.totalorder %s840_s16, 9 }
   0x6   : > { %s949_s17 = smov (%p37_p0, %s35_s17), 0  ;;  %s951_s18 = smov (!%p37_p0, %s39_s18), %s836_s15 }
   0x7   : > { %p213_p3 = pnand %p680_p1, %p212_p2  ;;  %p41_p4 = scmp.ge.s32.totalorder %s951_s18, 4 }
   0x8   : > { %p269_p5 = scmp.lt.s32.totalorder (!%p213_p3), %s828_s13, 3  ;;  %s681_s19 = sshll.u32 (!%p213_p3), %s824_s12, 1 }
   0x9   : > { %s953_s18 = smov (%p41_p4, %s951_s18), 0  ;;  %216 = sbr.rel (%p213_p3) target bundleno = 256 (0x100), region = 32 }
   0xa   : > { %p271_p6 = scmp.lt.s32.totalorder (!%p213_p3), %s681_s19, 3 }
   0xe   : > { %s955_s13 = smov (!%p269_p5, %s828_s13), 3  ;;  %s957_s19 = smov (!%p271_p6, %s681_s19), 3  ;;  %v708_v22 = vld [vmem:[%s942_s2] ss:$0 sm:$0xff] }
   0xf   : > { %s713_s20 = sshll.u32 %s955_s13, 7  ;;  %s688_s24 = sshll.u32 %s955_s13, 2 }
  0x10   : > { %s895_s23 = scalar_lea.vmem %s941_s1, %s713_s20  ;;  %s899_s25 = sadd.s32 %s688_s24, %s957_s19 }
  0x11   : > { %v783_v0 = vld [vmem:[%s895_s23 + $0x78] sm:$0xff]   ;;  %v785_v2 = vld [vmem:[%s895_s23 + $0x70] sm:$0xff]   ;;  %v787_v4 = vld [vmem:[%s895_s23 + $0x68] sm:$0xff]   ;;  %s682_s26 = sshll.u32 %s957_s19, 1  ;;  %s683_s27 = sshll.u32 %s955_s13, 3 }
  0x12   : > { %v784_v1 = vld [vmem:[%s895_s23 + $0x38] sm:$0xff]   ;;  %721 = vmatprep.subr.bf16.mxu0 %v783_v0  ;;  %v786_v3 = vld [vmem:[%s895_s23 + $0x30] sm:$0xff]   ;;  %v788_v5 = vld [vmem:[%s895_s23 + $0x28] sm:$0xff]   ;;  %s278_s28 = sadd.s32 %s683_s27, %s682_s26  ;;  %s689_s8 = sshll.u32 %s899_s25, 2 }
  0x13   : > { %722 = vmatpush3.bf16.msra.mxu0 %v784_v1  ;;  %v789_v6 = vld [vmem:[%s895_s23 + $0x60] sm:$0xff]   ;;  %s684_s29 = sshll.u32 %s278_s28, 2  ;;  %v791_v8 = vld [vmem:[%s895_s23 + $0x58] sm:$0xff]   ;;  %v793_v10 = vld [vmem:[%s895_s23 + $0x50] sm:$0xff]   ;;  %s310_s11 = scalar_lea.vmem %s943_s3, %s689_s8 }
  0x14   : > { %723 = vmatprep.subr.bf16.mxu0 %v785_v2  ;;  %v790_v7 = vld [vmem:[%s895_s23 + $0x20] sm:$0xff]   ;;  %s280_s5 = scalar_lea.vmem %s940_s0, %s684_s29  ;;  %v792_v9 = vld [vmem:[%s895_s23 + $0x18] sm:$0xff]   ;;  %v794_v12 = vld [vmem:[%s895_s23 + $0x10] sm:$0xff]  }
  0x15   : > { %v801_v11 = vld [vmem:[%s280_s5 + $0x4] ss:$8 sps:$4 sm:$0xff]   ;;  %v799_v17 = vld [vmem:[%s280_s5] ss:$8 sps:$4 sm:$0xff]  }
  0x16   : > { %493 = vmatprep.mubr.bf16.mxu0 %v801_v11  ;;  %v795_v13 = vld [vmem:[%s895_s23 + $0x48] sm:$0xff]   ;;  %v797_v15 = vld [vmem:[%s895_s23 + $0x40] sm:$0xff]  }
  0x17   : > { %724 = vmatpush3.bf16.msra.mxu0 %v786_v3  ;;  %v796_v14 = vld [vmem:[%s895_s23 + $0x8] sm:$0xff]   ;;  %v798_v16 = vld [vmem:[%s895_s23] sm:$0xff]  }
  0x18   : > { %725 = vmatprep.subr.bf16.mxu0 %v787_v4 }
  0x1b   : > { %726 = vmatpush3.bf16.msra.mxu0 %v788_v5 }
  0x1c   : > { %727 = vmatprep.subr.bf16.mxu0 %v789_v6 }
  0x1f   : > { %728 = vmatpush3.bf16.msra.mxu0 %v790_v7 }
  0x20   : > { %729 = vmatprep.subr.bf16.mxu0 %v791_v8 }
  0x23   : > { %730 = vmatpush3.bf16.msra.mxu0 %v792_v9 }
  0x24   : > { %731 = vmatprep.subr.bf16.mxu0 %v793_v10 }
  0x27   : > { %732 = vmatpush3.bf16.msra.mxu0 %v794_v12 }
  0x28   : > { %733 = vmatprep.subr.bf16.mxu0 %v795_v13 }
  0x2b   : > { %734 = vmatpush3.bf16.msra.mxu0 %v796_v14 }
  0x2c   : > { %735 = vmatprep.subr.bf16.mxu0 %v797_v15 }
  0x2f   : > { %736 = vmatpush3.bf16.msra.mxu0 %v798_v16 }
  0x32   : > { %494 = vmatmul.mubr.bf16.vlgmr.msra.gmra.mxu0 %v799_v17 }
  0xf2   : > { %v737_v18 = vpop.f32.mrf.mxu0 }
  0xf4   : > { %v738_v19 = vpop.f32.mrf.mxu0 }
  0xf5   : > { %v739_v21 = vadd.f32 %v738_v19, %v737_v18 }
  0xf6   : > { %v740_v20 = vpop.f32.mrf.mxu0 }
  0xf7   : > { %v518_v25 = vadd.f32 %v739_v21, %v708_v22 }
  0xf8   : > { %v741_v23 = vpop.f32.mrf.mxu0 }
  0xf9   : > { %v742_v24 = vadd.f32 %v741_v23, %v740_v20 }
  0xfb   : > { %v519_v26 = vadd.f32 %v742_v24, %v708_v22 }
  0xfd   : > { %v719_v27 = vpack.c.bf16 %v519_v26, %v518_v25 }
  0xff   : > { %720 = vst [vmem:[%s310_s11] sm:$0xff] %v719_v27  }
 0x100 PF: > { %s13_s16 = sadd.s32 1, %s840_s16   ;;  %s944_s12 = smov %s832_s14 }
 0x101   : > { %p10_p7 = scmp.ge.s32.totalorder %s13_s16, 10   ;;  %s945_s13 = smov %s836_s15 }
 0x102   : > { %s946_s14 = smov %s949_s17  ;;  %s947_s15 = smov %s953_s18 }
 0x103   :  { %12 = sbr.rel (!%p10_p7) target bundleno = 3 (0x3), region = 76 }

// kernel: _lambda_.67
= control target key start
LH: loop header
LB: loop body
LE: loop exit
PB: predicated region body
PF: predicated region fallthrough
CT: control target
= control target key end

     0   :  { %s446_s27 = smov 16   ;;  %vm191_vm0 = vcmask 130048   ;;  %vm272_vm1 = vcmask 257024   ;;  %s642_s3 = inlined_call_operand.vmem [shape: bf16[128,16], index: 3, kind: input, shape index: {}]   ;;  %s643_s0 = inlined_call_operand.vmem [shape: bf16[128,16], index: 0, kind: input, shape index: {}]   ;;  %s644_s1 = inlined_call_operand.vmem [shape: f32[1,16], index: 1, kind: input, shape index: {}]   ;;  %s645_s2 = inlined_call_operand.vmem [shape: f32[1,16], index: 2, kind: input, shape index: {}]   ;;  %s646_s4 = inlined_call_operand.vmem [shape: bf16[128,32], index: 4, kind: output, shape index: {}]  }
   0x1   :  { %v399_v0 = vld [vmem:[%s642_s3 + $0x10] sm:$0xff]   ;;  %v360_v1 = vld [vmem:[%s642_s3] sm:$0xff]   ;;  %v400_v2 = vld [vmem:[%s642_s3 + $0x18] sm:$0xff]  }
   0x2   :  { %v369_v3 = vunpack.c.l.bf16 %v399_v0  ;;  %v370_v4 = vunpack.c.h.bf16 %v399_v0  ;;  %v361_v5 = vunpack.c.l.bf16 %v360_v1  ;;  %v362_v6 = vunpack.c.h.bf16 %v360_v1  ;;  %v398_v7 = vld [vmem:[%s642_s3 + $0x8] sm:$0xff]   ;;  %v401_v13 = vld [vmem:[%s642_s3 + $0x20] sm:$0xff]   ;;  %v404_v22 = vld [vmem:[%s642_s3 + $0x38] sm:$0xff]  }
   0x3   :  { %v402_v8 = vld [vmem:[%s642_s3 + $0x28] sm:$0xff]   ;;  %v373_v9 = vunpack.c.l.bf16 %v400_v2  ;;  %v374_v10 = vunpack.c.h.bf16 %v400_v2  ;;  %v365_v11 = vunpack.c.l.bf16 %v398_v7  ;;  %v366_v12 = vunpack.c.h.bf16 %v398_v7  ;;  %v403_v23 = vld [vmem:[%s642_s3 + $0x30] sm:$0xff]   ;;  %v328_v33 = vld [vmem:[%s643_s0] sm:$0xff]  }
   0x4   :  { %v416_v14 = vpack.i.bf16 %v370_v4, %v369_v3  ;;  %v406_v15 = vpack.i.bf16 %v362_v6, %v361_v5  ;;  %v381_v16 = vunpack.c.l.bf16 %v402_v8  ;;  %v382_v17 = vunpack.c.h.bf16 %v402_v8  ;;  %v392_v32 = vld [vmem:[%s643_s0 + $0x10] sm:$0xff]   ;;  %v393_v34 = vld [vmem:[%s643_s0 + $0x18] sm:$0xff]   ;;  %v391_v35 = vld [vmem:[%s643_s0 + $0x8] sm:$0xff]  }
   0x5   :  { %v421_v18 = vpack.i.bf16 %v374_v10, %v373_v9  ;;  %v411_v19 = vpack.i.bf16 %v366_v12, %v365_v11  ;;  %v377_v20 = vunpack.c.l.bf16 %v401_v13  ;;  %v378_v21 = vunpack.c.h.bf16 %v401_v13  ;;  %v511_v39 = vld [vmem:[%s644_s1] ss:$0 sm:$0xff]  ;;  %v395_v45 = vld [vmem:[%s643_s0 + $0x28] sm:$0xff]   ;;  %v397_v50 = vld [vmem:[%s643_s0 + $0x38] sm:$0xff]  }
   0x6   :  { %417 = vrot.lane.b32.xlu1 %v416_v14, %s446_s27  ;;  %407 = vrot.lane.b32.xlu0 %v406_v15, %s446_s27  ;;  %v431_v24 = vpack.i.bf16 %v382_v17, %v381_v16  ;;  %v389_v25 = vunpack.c.l.bf16 %v404_v22  ;;  %v390_v27 = vunpack.c.h.bf16 %v404_v22  ;;  %v385_v28 = vunpack.c.l.bf16 %v403_v23  ;;  %v394_v49 = vld [vmem:[%s643_s0 + $0x20] sm:$0xff]   ;;  %v396_v1 = vld [vmem:[%s643_s0 + $0x30] sm:$0xff]  }
   0x7   :  { %v426_v26 = vpack.i.bf16 %v378_v21, %v377_v20  ;;  %v386_v29 = vunpack.c.h.bf16 %v403_v23  ;;  %v337_v36 = vunpack.c.l.bf16 %v392_v32  ;;  %v338_v37 = vunpack.c.h.bf16 %v392_v32  ;;  %v528_v51 = vld [vmem:[%s645_s2] ss:$0 sm:$0xff] }
   0x8   :  { %v441_v30 = vpack.i.bf16 %v390_v27, %v389_v25  ;;  %v329_v38 = vunpack.c.l.bf16 %v328_v33  ;;  %v330_v40 = vunpack.c.h.bf16 %v328_v33  ;;  %v341_v41 = vunpack.c.l.bf16 %v393_v34 }
   0x9   :  { %v436_v31 = vpack.i.bf16 %v386_v29, %v385_v28  ;;  %v342_v42 = vunpack.c.h.bf16 %v393_v34  ;;  %v333_v43 = vunpack.c.l.bf16 %v391_v35  ;;  %v334_v44 = vunpack.c.h.bf16 %v391_v35 }
   0xa   :  { %422 = vrot.lane.b32.xlu1 %v421_v18, %s446_s27  ;;  %412 = vrot.lane.b32.xlu0 %v411_v19, %s446_s27  ;;  %v60_v46 = vmul.f32 %v337_v36, %v511_v39  ;;  %v61_v47 = vmul.f32 %v338_v37, %v511_v39  ;;  %v56_v48 = vmul.f32 %v329_v38, %v511_v39  ;;  %v349_v53 = vunpack.c.l.bf16 %v395_v45 }
   0xb   :  { %v57_v52 = vmul.f32 %v330_v40, %v511_v39  ;;  %v350_v54 = vunpack.c.h.bf16 %v395_v45  ;;  %v62_v55 = vmul.f32 %v341_v41, %v511_v39  ;;  %v63_v56 = vmul.f32 %v342_v42, %v511_v39 }
   0xc   :  { %v58_v57 = vmul.f32 %v333_v43, %v511_v39  ;;  %v59_v58 = vmul.f32 %v334_v44, %v511_v39  ;;  %v345_v59 = vunpack.c.l.bf16 %v394_v49  ;;  %v346_v60 = vunpack.c.h.bf16 %v394_v49 }
   0xd   :  { %v357_v61 = vunpack.c.l.bf16 %v397_v50  ;;  %v83_v62 = vadd.f32 %v528_v51, %v60_v46  ;;  %v84_v63 = vadd.f32 %v528_v51, %v61_v47  ;;  %v79_v0 = vadd.f32 %v528_v51, %v56_v48 }
   0xe   :  { %432 = vrot.lane.b32.xlu1 %v431_v24, %s446_s27  ;;  %427 = vrot.lane.b32.xlu0 %v426_v26, %s446_s27  ;;  %v80_v2 = vadd.f32 %v528_v51, %v57_v52  ;;  %v66_v3 = vmul.f32 %v349_v53, %v511_v39  ;;  %v67_v4 = vmul.f32 %v350_v54, %v511_v39  ;;  %v358_v5 = vunpack.c.h.bf16 %v397_v50 }
   0xf   :  { %v85_v6 = vadd.f32 %v528_v51, %v62_v55  ;;  %v86_v7 = vadd.f32 %v528_v51, %v63_v56  ;;  %v81_v8 = vadd.f32 %v528_v51, %v58_v57  ;;  %v82_v9 = vadd.f32 %v528_v51, %v59_v58 }
  0x10   :  { %v64_v12 = vmul.f32 %v345_v59, %v511_v39  ;;  %v65_v13 = vmul.f32 %v346_v60, %v511_v39  ;;  %v70_v14 = vmul.f32 %v357_v61, %v511_v39  ;;  %v353_v15 = vunpack.c.l.bf16 %v396_v1 }
  0x11   :  { %v89_v20 = vadd.f32 %v528_v51, %v66_v3  ;;  %v90_v21 = vadd.f32 %v528_v51, %v67_v4  ;;  %v71_v22 = vmul.f32 %v358_v5, %v511_v39  ;;  %v354_v23 = vunpack.c.h.bf16 %v396_v1 }
  0x12   :  { %442 = vrot.lane.b32.xlu1 %v441_v30, %s446_s27  ;;  %437 = vrot.lane.b32.xlu0 %v436_v31, %s446_s27  ;;  %v87_v38 = vadd.f32 %v528_v51, %v64_v12  ;;  %v88_v40 = vadd.f32 %v528_v51, %v65_v13  ;;  %v68_v41 = vmul.f32 %v353_v15, %v511_v39 }
  0x13   :  { %v69_v42 = vmul.f32 %v354_v23, %v511_v39  ;;  %v93_v39 = vadd.f32 %v528_v51, %v70_v14  ;;  %v94_v58 = vadd.f32 %v528_v51, %v71_v22 }
  0x14   :  { %v91_v59 = vadd.f32 %v528_v51, %v68_v41 }
  0x15   :  { %v92_v60 = vadd.f32 %v528_v51, %v69_v42 }
  0x78   :  { %v418_v10 = vpop.permute.xlu1 %417  ;;  %v408_v11 = vpop.permute.xlu0 %407 }
  0x79   :  { %v420_v16 = vunpack.i.h.bf16 %v418_v10  ;;  %v419_v17 = vunpack.i.l.bf16 %v418_v10  ;;  %v410_v18 = vunpack.i.h.bf16 %v408_v11  ;;  %v409_v19 = vunpack.i.l.bf16 %v408_v11 }
  0x7b   :  { %v196_v24 = vsel %vm191_vm0, %v83_v62, %v419_v17  ;;  %v197_v25 = vsel %vm191_vm0, %v84_v63, %v420_v16  ;;  %v192_v26 = vsel %vm191_vm0, %v79_v0, %v409_v19  ;;  %v193_v27 = vsel %vm191_vm0, %v80_v2, %v410_v18 }
  0x7c   :  { %v315_v28 = vpack.c.bf16 %v196_v24, %v196_v24  ;;  %v316_v29 = vpack.c.bf16 %v197_v25, %v197_v25  ;;  %v311_v30 = vpack.c.bf16 %v192_v26, %v192_v26  ;;  %v312_v31 = vpack.c.bf16 %v193_v27, %v193_v27  ;;  %v423_v32 = vpop.permute.xlu1 %422  ;;  %v413_v33 = vpop.permute.xlu0 %412 }
  0x7d   :  { %v425_v34 = vunpack.i.h.bf16 %v423_v32  ;;  %v424_v35 = vunpack.i.l.bf16 %v423_v32  ;;  %v415_v36 = vunpack.i.h.bf16 %v413_v33  ;;  %v414_v37 = vunpack.i.l.bf16 %v413_v33 }
  0x7e   :  { %277 = vst.msk [vmem:[%s646_s4 + $0x10] sm:$0xf] %vm272_vm1, %v315_v28  ;;  %278 = vst.msk [vmem:[%s646_s4 + $0x14] sm:$0xf] %vm272_vm1, %v316_v29 }
  0x7f   :  { %273 = vst.msk [vmem:[%s646_s4] sm:$0xf] %vm272_vm1, %v311_v30  ;;  %274 = vst.msk [vmem:[%s646_s4 + $0x4] sm:$0xf] %vm272_vm1, %v312_v31  ;;  %v198_v43 = vsel %vm191_vm0, %v85_v6, %v424_v35  ;;  %v199_v44 = vsel %vm191_vm0, %v86_v7, %v425_v34  ;;  %v194_v45 = vsel %vm191_vm0, %v81_v8, %v414_v37 }
  0x80   :  { %v195_v46 = vsel %vm191_vm0, %v82_v9, %v415_v36  ;;  %v317_v47 = vpack.c.bf16 %v198_v43, %v198_v43  ;;  %v318_v48 = vpack.c.bf16 %v199_v44, %v199_v44  ;;  %v313_v49 = vpack.c.bf16 %v194_v45, %v194_v45  ;;  %v433_v52 = vpop.permute.xlu1 %432  ;;  %v428_v53 = vpop.permute.xlu0 %427 }
  0x81   :  { %v314_v50 = vpack.c.bf16 %v195_v46, %v195_v46  ;;  %v435_v54 = vunpack.i.h.bf16 %v433_v52  ;;  %v434_v55 = vunpack.i.l.bf16 %v433_v52  ;;  %v430_v56 = vunpack.i.h.bf16 %v428_v53 }
  0x82   :  { %v429_v57 = vunpack.i.l.bf16 %v428_v53  ;;  %279 = vst.msk [vmem:[%s646_s4 + $0x18] sm:$0xf] %vm272_vm1, %v317_v47  ;;  %280 = vst.msk [vmem:[%s646_s4 + $0x1c] sm:$0xf] %vm272_vm1, %v318_v48 }
  0x83   :  { %275 = vst.msk [vmem:[%s646_s4 + $0x8] sm:$0xf] %vm272_vm1, %v313_v49  ;;  %276 = vst.msk [vmem:[%s646_s4 + $0xc] sm:$0xf] %vm272_vm1, %v314_v50  ;;  %v202_v61 = vsel %vm191_vm0, %v89_v20, %v434_v55  ;;  %v203_v62 = vsel %vm191_vm0, %v90_v21, %v435_v54  ;;  %v201_v0 = vsel %vm191_vm0, %v88_v40, %v430_v56 }
  0x84   :  { %v200_v63 = vsel %vm191_vm0, %v87_v38, %v429_v57  ;;  %v321_v1 = vpack.c.bf16 %v202_v61, %v202_v61  ;;  %v322_v2 = vpack.c.bf16 %v203_v62, %v203_v62  ;;  %v320_v4 = vpack.c.bf16 %v201_v0, %v201_v0  ;;  %v443_v5 = vpop.permute.xlu1 %442  ;;  %v438_v6 = vpop.permute.xlu0 %437 }
  0x85   :  { %v319_v3 = vpack.c.bf16 %v200_v63, %v200_v63  ;;  %v445_v7 = vunpack.i.h.bf16 %v443_v5  ;;  %v444_v8 = vunpack.i.l.bf16 %v443_v5  ;;  %v440_v9 = vunpack.i.h.bf16 %v438_v6 }
  0x86   :  { %v439_v10 = vunpack.i.l.bf16 %v438_v6  ;;  %283 = vst.msk [vmem:[%s646_s4 + $0x28] sm:$0xf] %vm272_vm1, %v321_v1  ;;  %284 = vst.msk [vmem:[%s646_s4 + $0x2c] sm:$0xf] %vm272_vm1, %v322_v2 }
  0x87   :  { %281 = vst.msk [vmem:[%s646_s4 + $0x20] sm:$0xf] %vm272_vm1, %v319_v3  ;;  %282 = vst.msk [vmem:[%s646_s4 + $0x24] sm:$0xf] %vm272_vm1, %v320_v4  ;;  %v206_v51 = vsel %vm191_vm0, %v93_v39, %v444_v8  ;;  %v207_v11 = vsel %vm191_vm0, %v94_v58, %v445_v7  ;;  %v205_v13 = vsel %vm191_vm0, %v92_v60, %v440_v9 }
  0x88   :  { %v204_v12 = vsel %vm191_vm0, %v91_v59, %v439_v10  ;;  %v325_v14 = vpack.c.bf16 %v206_v51, %v206_v51  ;;  %v326_v15 = vpack.c.bf16 %v207_v11, %v207_v11  ;;  %v324_v17 = vpack.c.bf16 %v205_v13, %v205_v13 }
  0x89   :  { %v323_v16 = vpack.c.bf16 %v204_v12, %v204_v12 }
  0x8a   :  { %287 = vst.msk [vmem:[%s646_s4 + $0x38] sm:$0xf] %vm272_vm1, %v325_v14  ;;  %288 = vst.msk [vmem:[%s646_s4 + $0x3c] sm:$0xf] %vm272_vm1, %v326_v15 }
  0x8b   :  { %285 = vst.msk [vmem:[%s646_s4 + $0x30] sm:$0xf] %vm272_vm1, %v323_v16  ;;  %286 = vst.msk [vmem:[%s646_s4 + $0x34] sm:$0xf] %vm272_vm1, %v324_v17 }

// kernel: _lambda_.68
= control target key start
LH: loop header
LB: loop body
LE: loop exit
PB: predicated region body
PF: predicated region fallthrough
CT: control target
= control target key end

     0   :  { %s943_s12 = smov 0   ;;  %s945_s13 = smov 0   ;;  %s1023_s0 = inlined_call_operand.vmem [shape: bf16[4,128,128], index: 0, kind: input, shape index: {}]   ;;  %s1024_s1 = inlined_call_operand.vmem [shape: bf16[4,128,128], index: 1, kind: input, shape index: {}]   ;;  %s1025_s2 = inlined_call_operand.vmem [shape: f32[1,128], index: 2, kind: input, shape index: {}]   ;;  %s1026_s3 = inlined_call_operand.vmem [shape: bf16[4,128,128], index: 3, kind: output, shape index: {}]  }
   0x1   :  { %s947_s14 = smov 0   ;;  %s949_s15 = smov 0  }
   0x2   :  { %s951_s16 = smov 0  }
   0x3 LB: > { %s35_s17 = sadd.s32 1, %s913_s14  ;;  %s39_s18 = sadd.s32 1, %s917_s15  ;;  %s921_s16 = sphi %s951_s16, %s13_s16   ;;  %s917_s15 = sphi %s949_s15, %s1030_s15   ;;  %s913_s14 = sphi %s947_s14, %s1029_s14   ;;  %s909_s13 = sphi %s945_s13, %s1028_s13   ;;  %s905_s12 = sphi %s943_s12, %s1027_s12  }
   0x4   : > { %p37_p0 = scmp.ge.s32.totalorder %s35_s17, 2  ;;  %p715_p1 = scmp.ge.s32.totalorder %s921_s16, 1 }
   0x5   : > { %p209_p2 = scmp.lt.s32.totalorder %s921_s16, 9 }
   0x6   : > { %s1032_s17 = smov (%p37_p0, %s35_s17), 0  ;;  %s1034_s18 = smov (!%p37_p0, %s39_s18), %s917_s15 }
   0x7   : > { %p210_p3 = pnand %p715_p1, %p209_p2  ;;  %p41_p4 = scmp.ge.s32.totalorder %s1034_s18, 4 }
   0x8   : > { %p263_p5 = scmp.lt.s32.totalorder (!%p210_p3), %s909_s13, 3  ;;  %s716_s19 = sshll.u32 (!%p210_p3), %s905_s12, 3 }
   0x9   : > { %s1036_s18 = smov (%p41_p4, %s1034_s18), 0  ;;  %213 = sbr.rel (%p210_p3) target bundleno = 254 (0xfe), region = 32 }
   0xa   : > { %p265_p6 = scmp.lt.s32.totalorder (!%p210_p3), %s716_s19, 15 }
   0xe   : > { %s1038_s13 = smov (!%p263_p5, %s909_s13), 3  ;;  %s1040_s19 = smov (!%p265_p6, %s716_s19), 15  ;;  %v736_v14 = vld [vmem:[%s1025_s2] ss:$0 sm:$0xff] }
   0xf   : > { %s747_s20 = sshll.u32 %s1038_s13, 6  ;;  %s717_s21 = sshll.u32 %s1038_s13, 4 }
  0x10   : > { %s976_s24 = scalar_lea.vmem %s1024_s1, %s747_s20  ;;  %s978_s25 = sadd.s32 %s717_s21, %s1040_s19 }
  0x11   : > { %v871_v0 = vld [vmem:[%s976_s24 + $0x38] sm:$0xff]   ;;  %v872_v1 = vld [vmem:[%s976_s24 + $0x30] sm:$0xff]   ;;  %s718_s26 = sshll.u32 %s978_s25, 2  ;;  %v873_v2 = vld [vmem:[%s976_s24 + $0x28] sm:$0xff]  }
  0x12   : > { %791 = vmatprep.subr.bf16.mxu0 %v871_v0  ;;  %815 = vmatprep.subr.bf16.mxu1 %v871_v0  ;;  %s989_s29 = scalar_lea.vmem %s1023_s0, %s718_s26  ;;  %v874_v3 = vld [vmem:[%s976_s24 + $0x20] sm:$0xff]   ;;  %v875_v6 = vld [vmem:[%s976_s24 + $0x18] sm:$0xff]   ;;  %v876_v7 = vld [vmem:[%s976_s24 + $0x10] sm:$0xff]   ;;  %s302_s7 = scalar_lea.vmem %s1026_s3, %s718_s26 }
  0x13   : > { %792 = vmatpush3.bf16.msra.mxu0 %v871_v0  ;;  %823 = vmatpush3.bf16.msra.mxu1 %v871_v0  ;;  %v879_v4 = vld [vmem:[%s989_s29] sm:$0xff]   ;;  %v880_v5 = vld [vmem:[%s989_s29 + $0x10] sm:$0xff]   ;;  %v877_v8 = vld [vmem:[%s976_s24 + $0x8] sm:$0xff]  }
  0x14   : > { %793 = vmatprep.subr.bf16.mxu0 %v872_v1  ;;  %816 = vmatprep.subr.bf16.mxu1 %v872_v1  ;;  %v878_v9 = vld [vmem:[%s976_s24] sm:$0xff]   ;;  %v881_v10 = vld [vmem:[%s989_s29 + $0x8] sm:$0xff]   ;;  %v882_v11 = vld [vmem:[%s989_s29 + $0x18] sm:$0xff]  }
  0x15   : > { %807 = vmatprep.mubr.bf16.mxu0 %v879_v4  ;;  %811 = vmatprep.mubr.bf16.mxu1 %v880_v5 }
  0x17   : > { %794 = vmatpush3.bf16.msra.mxu0 %v872_v1  ;;  %824 = vmatpush3.bf16.msra.mxu1 %v872_v1 }
  0x18   : > { %795 = vmatprep.subr.bf16.mxu0 %v873_v2  ;;  %817 = vmatprep.subr.bf16.mxu1 %v873_v2 }
  0x1b   : > { %796 = vmatpush3.bf16.msra.mxu0 %v873_v2  ;;  %825 = vmatpush3.bf16.msra.mxu1 %v873_v2 }
  0x1c   : > { %797 = vmatprep.subr.bf16.mxu0 %v874_v3  ;;  %818 = vmatprep.subr.bf16.mxu1 %v874_v3 }
  0x1f   : > { %798 = vmatpush3.bf16.msra.mxu0 %v874_v3  ;;  %826 = vmatpush3.bf16.msra.mxu1 %v874_v3 }
  0x20   : > { %799 = vmatprep.subr.bf16.mxu0 %v875_v6  ;;  %819 = vmatprep.subr.bf16.mxu1 %v875_v6 }
  0x23   : > { %800 = vmatpush3.bf16.msra.mxu0 %v875_v6  ;;  %827 = vmatpush3.bf16.msra.mxu1 %v875_v6 }
  0x24   : > { %801 = vmatprep.subr.bf16.mxu0 %v876_v7  ;;  %820 = vmatprep.subr.bf16.mxu1 %v876_v7 }
  0x27   : > { %802 = vmatpush3.bf16.msra.mxu0 %v876_v7  ;;  %828 = vmatpush3.bf16.msra.mxu1 %v876_v7 }
  0x28   : > { %803 = vmatprep.subr.bf16.mxu0 %v877_v8  ;;  %821 = vmatprep.subr.bf16.mxu1 %v877_v8 }
  0x2b   : > { %804 = vmatpush3.bf16.msra.mxu0 %v877_v8  ;;  %829 = vmatpush3.bf16.msra.mxu1 %v877_v8 }
  0x2c   : > { %805 = vmatprep.subr.bf16.mxu0 %v878_v9  ;;  %822 = vmatprep.subr.bf16.mxu1 %v878_v9 }
  0x2f   : > { %806 = vmatpush3.bf16.msra.mxu0 %v878_v9  ;;  %830 = vmatpush3.bf16.msra.mxu1 %v878_v9 }
  0x32   : > { %808 = vmatmul.mubr.bf16.vlgmr.msra.gmra.mxu0 %v881_v10  ;;  %812 = vmatmul.mubr.bf16.vlgmr.msra.gmra.mxu1 %v882_v11 }
  0xf2   : > { %v809_v12 = vpop.f32.mrf.mxu0  ;;  %v813_v13 = vpop.f32.mrf.mxu1 }
  0xf3   : > { %v522_v19 = vadd.f32 %v809_v12, %v736_v14  ;;  %v526_v20 = vadd.f32 %v813_v13, %v736_v14 }
  0xf4   : > { %v455_v15 = vpop.f32.mrf.mxu0  ;;  %v471_v16 = vpop.f32.mrf.mxu1 }
  0xf5   : > { %v520_v23 = vadd.f32 %v736_v14, %v455_v15  ;;  %v524_v24 = vadd.f32 %v736_v14, %v471_v16 }
  0xf6   : > { %v810_v17 = vpop.f32.mrf.mxu0  ;;  %v814_v18 = vpop.f32.mrf.mxu1 }
  0xf7   : > { %v523_v21 = vadd.f32 %v810_v17, %v736_v14  ;;  %v527_v22 = vadd.f32 %v814_v18, %v736_v14 }
  0xf8   : > { %v458_v25 = vpop.f32.mrf.mxu0  ;;  %v474_v26 = vpop.f32.mrf.mxu1 }
  0xf9   : > { %v764_v27 = vpack.c.bf16 %v523_v21, %v522_v19  ;;  %v774_v28 = vpack.c.bf16 %v527_v22, %v526_v20  ;;  %v521_v29 = vadd.f32 %v736_v14, %v458_v25  ;;  %v525_v30 = vadd.f32 %v736_v14, %v474_v26 }
  0xfb   : > { %776 = vst [vmem:[%s302_s7 + $0x8] sm:$0xff] %v764_v27   ;;  %778 = vst [vmem:[%s302_s7 + $0x18] sm:$0xff] %v774_v28   ;;  %v759_v31 = vpack.c.bf16 %v521_v29, %v520_v23  ;;  %v769_v32 = vpack.c.bf16 %v525_v30, %v524_v24 }
  0xfd   : > { %760 = vst [vmem:[%s302_s7] sm:$0xff] %v759_v31   ;;  %777 = vst [vmem:[%s302_s7 + $0x10] sm:$0xff] %v769_v32  }
  0xfe PF: > { %s13_s16 = sadd.s32 1, %s921_s16   ;;  %s1027_s12 = smov %s913_s14 }
  0xff   : > { %p10_p7 = scmp.ge.s32.totalorder %s13_s16, 10   ;;  %s1028_s13 = smov %s917_s15 }
 0x100   : > { %s1029_s14 = smov %s1032_s17  ;;  %s1030_s15 = smov %s1036_s18 }
 0x101   :  { %12 = sbr.rel (!%p10_p7) target bundleno = 3 (0x3), region = 76 }

// kernel: _lambda_.69
= control target key start
LH: loop header
LB: loop body
LE: loop exit
PB: predicated region body
PF: predicated region fallthrough
CT: control target
= control target key end

     0   :  { %s620_s15 = smov 0   ;;  %s737_s0 = inlined_call_operand.vmem [shape: bf16[512,8], index: 0, kind: input, shape index: {}]   ;;  %s738_s1 = inlined_call_operand.vmem [shape: f32[1,8], index: 1, kind: input, shape index: {}]   ;;  %s739_s2 = inlined_call_operand.vmem [shape: f32[1,8], index: 2, kind: input, shape index: {}]   ;;  %s740_s3 = inlined_call_operand.vmem [shape: f32[1,8], index: 3, kind: output, shape index: {0}]   ;;  %s741_s4 = inlined_call_operand.vmem [shape: f32[1,8], index: 4, kind: output, shape index: {1}]  }
   0x1 LB: > { %s626_s16 = sadd.s32 4294967295, %s592_s15   ;;  %p489_p0 = scmp.ge.s32.totalorder %s592_s15, 1  ;;  %s592_s15 = sphi %s620_s15, %s15_s15  }
   0x2   : > { %p156_p1 = scmp.lt.s32.totalorder %s592_s15, 3 }
   0x4   : > { %p157_p2 = pnand %p489_p0, %p156_p1 }
   0x5   : > { %s490_s17 = sshll.u32 (!%p157_p2), %s626_s16, 5  ;;  %p492_p4 = scmp.ne.s32.totalorder (!%p157_p2), %s626_s16, 0 }
   0x6   : > { %160 = sbr.rel (%p157_p2) target bundleno = 141 (0x8d), region = 32  ;;  %p178_p3 = scmp.lt.s32.totalorder (!%p157_p2), %s490_s17, 63 }
   0xb   : > { %s743_s17 = smov (!%p178_p3, %s490_s17), 63  ;;  %186 = sbr.rel (%p492_p4) target bundleno = 18 (0x12), region = 36 }
   0xc   : > { %s491_s18 = sshll.u32 %s743_s17, 2 }
   0xd   : > { %s634_s21 = scalar_lea.vmem %s737_s0, %s491_s18 }
  0x10   : > { %vm187_vm0 = vcmask 57344   ;;  %v594_v0 = vmov 0.0  }
  0x11   : > { %188 = vst.msk [vmem:[#allocation2] sm:$0x1] %vm187_vm0, %v594_v0  ;;  %189 = vst.msk [vmem:[#allocation3] sm:$0x1] %vm187_vm0, %v594_v0 }
  0x12 PF: > { %v497_v1 = vld [vmem:[%s634_s21] sm:$0xff]   ;;  %v560_v2 = vld [vmem:[%s634_s21 + $0x8] sm:$0xff]   ;;  %vm255_vm1 = vcmask 64512   ;;  %v561_v6 = vld [vmem:[%s634_s21 + $0x10] sm:$0xff]   ;;  %vm326_vm2 = vcmask 57344   ;;  %p493_p5 = scmp.ne.s32.totalorder %s626_s16, 1 }
  0x13   : > { %v498_v3 = vunpack.c.l.bf16 %v497_v1  ;;  %v499_v4 = vunpack.c.h.bf16 %v497_v1  ;;  %v502_v5 = vunpack.c.l.bf16 %v560_v2  ;;  %v503_v7 = vunpack.c.h.bf16 %v560_v2  ;;  %v562_v14 = vld [vmem:[%s634_s21 + $0x18] sm:$0xff]   ;;  %v563_v21 = vld [vmem:[%s634_s21 + $0x20] sm:$0xff]   ;;  %v564_v27 = vld [vmem:[%s634_s21 + $0x28] sm:$0xff]  }
  0x14   : > { %v506_v12 = vunpack.c.l.bf16 %v561_v6  ;;  %v507_v16 = vunpack.c.h.bf16 %v561_v6  ;;  %v510_v19 = vunpack.c.l.bf16 %v562_v14  ;;  %v511_v23 = vunpack.c.h.bf16 %v562_v14  ;;  %v565_v34 = vld [vmem:[%s634_s21 + $0x30] sm:$0xff]   ;;  %v566_v50 = vld [vmem:[%s634_s21 + $0x38] sm:$0xff]   ;;  %v567_v63 = vld [vmem:[%s634_s21 + $0x40] sm:$0xff]  }
  0x15   : > { %v256_v8 = vsel %vm255_vm1, %v498_v3, 0.0  ;;  %v257_v9 = vsel %vm255_vm1, %v499_v4, 0.0  ;;  %v259_v10 = vsel %vm255_vm1, %v502_v5, 0.0  ;;  %v261_v13 = vsel %vm255_vm1, %v503_v7, 0.0 }
  0x16   : > { %v258_v11 = vadd.f32 %v257_v9, %v256_v8  ;;  %v263_v17 = vsel %vm255_vm1, %v506_v12, 0.0  ;;  %v265_v20 = vsel %vm255_vm1, %v507_v16, 0.0  ;;  %v267_v24 = vsel %vm255_vm1, %v510_v19, 0.0 }
  0x17   : > { %v514_v26 = vunpack.c.l.bf16 %v563_v21  ;;  %v269_v28 = vsel %vm255_vm1, %v511_v23, 0.0  ;;  %v515_v30 = vunpack.c.h.bf16 %v563_v21  ;;  %v518_v32 = vunpack.c.l.bf16 %v564_v27 }
  0x18   : > { %v260_v15 = vadd.f32 %v259_v10, %v258_v11  ;;  %v329_v36 = vmul.f32 %v498_v3, %v498_v3  ;;  %v330_v37 = vmul.f32 %v499_v4, %v499_v4  ;;  %v331_v38 = vmul.f32 %v502_v5, %v502_v5 }
  0x19   : > { %v271_v31 = vsel %vm255_vm1, %v514_v26, 0.0  ;;  %v273_v35 = vsel %vm255_vm1, %v515_v30, 0.0  ;;  %v519_v39 = vunpack.c.h.bf16 %v564_v27  ;;  %v275_v41 = vsel %vm255_vm1, %v518_v32, 0.0 }
  0x1a   : > { %v262_v18 = vadd.f32 %v261_v13, %v260_v15  ;;  %v332_v42 = vmul.f32 %v503_v7, %v503_v7  ;;  %v522_v43 = vunpack.c.l.bf16 %v565_v34  ;;  %v333_v46 = vmul.f32 %v506_v12, %v506_v12  ;;  %v568_v12 = vld [vmem:[%s634_s21 + $0x48] sm:$0xff]  }
  0x1b   : > { %v277_v45 = vsel %vm255_vm1, %v519_v39, 0.0  ;;  %v361_v47 = vsel %vm255_vm1, %v329_v36, 0.0  ;;  %v362_v48 = vsel %vm255_vm1, %v330_v37, 0.0  ;;  %v364_v49 = vsel %vm255_vm1, %v331_v38, 0.0  ;;  %v570_v38 = vld [vmem:[%s634_s21 + $0x58] sm:$0xff]  }
  0x1c   : > { %v264_v22 = vadd.f32 %v263_v17, %v262_v18  ;;  %v363_v52 = vadd.f32 %v362_v48, %v361_v47  ;;  %v523_v53 = vunpack.c.h.bf16 %v565_v34  ;;  %v279_v54 = vsel %vm255_vm1, %v522_v43, 0.0 }
  0x1d   : > { %v334_v55 = vmul.f32 %v507_v16, %v507_v16  ;;  %v366_v56 = vsel %vm255_vm1, %v332_v42, 0.0  ;;  %v526_v59 = vunpack.c.l.bf16 %v566_v50  ;;  %v335_v61 = vmul.f32 %v510_v19, %v510_v19 }
  0x1e   : > { %v266_v25 = vadd.f32 %v265_v20, %v264_v22  ;;  %v365_v58 = vadd.f32 %v364_v49, %v363_v52  ;;  %v281_v60 = vsel %vm255_vm1, %v523_v53, 0.0  ;;  %v368_v62 = vsel %vm255_vm1, %v333_v46, 0.0 }
  0x1f   : > { %v527_v2 = vunpack.c.h.bf16 %v566_v50  ;;  %v283_v3 = vsel %vm255_vm1, %v526_v59, 0.0  ;;  %v336_v4 = vmul.f32 %v511_v23, %v511_v23  ;;  %v370_v5 = vsel %vm255_vm1, %v334_v55, 0.0 }
  0x20   : > { %v268_v29 = vadd.f32 %v267_v24, %v266_v25  ;;  %v367_v1 = vadd.f32 %v366_v56, %v365_v58  ;;  %v530_v8 = vunpack.c.l.bf16 %v567_v63  ;;  %v337_v10 = vmul.f32 %v514_v26, %v514_v26  ;;  %v569_v25 = vld [vmem:[%s634_s21 + $0x50] sm:$0xff]  }
  0x21   : > { %v285_v9 = vsel %vm255_vm1, %v527_v2, 0.0  ;;  %v372_v11 = vsel %vm255_vm1, %v335_v61, 0.0  ;;  %v531_v15 = vunpack.c.h.bf16 %v567_v63  ;;  %v338_v17 = vmul.f32 %v515_v30, %v515_v30 }
  0x22   : > { %v270_v33 = vadd.f32 %v269_v28, %v268_v29  ;;  %v369_v7 = vadd.f32 %v368_v62, %v367_v1  ;;  %v287_v16 = vsel %vm255_vm1, %v530_v8, 0.0  ;;  %v374_v18 = vsel %vm255_vm1, %v336_v4, 0.0 }
  0x23   : > { %v534_v21 = vunpack.c.l.bf16 %v568_v12  ;;  %v289_v22 = vsel %vm255_vm1, %v531_v15, 0.0  ;;  %v339_v23 = vmul.f32 %v518_v32, %v518_v32  ;;  %v376_v24 = vsel %vm255_vm1, %v337_v10, 0.0 }
  0x24   : > { %v272_v40 = vadd.f32 %v271_v31, %v270_v33  ;;  %v371_v14 = vadd.f32 %v370_v5, %v369_v7  ;;  %v535_v28 = vunpack.c.h.bf16 %v568_v12  ;;  %v340_v31 = vmul.f32 %v519_v39, %v519_v39 }
  0x25   : > { %v291_v29 = vsel %vm255_vm1, %v534_v21, 0.0  ;;  %v378_v30 = vsel %vm255_vm1, %v338_v17, 0.0  ;;  %v341_v37 = vmul.f32 %v522_v43, %v522_v43  ;;  %v380_v32 = vsel %vm255_vm1, %v339_v23, 0.0 }
  0x26   : > { %v274_v44 = vadd.f32 %v273_v35, %v272_v40  ;;  %v373_v20 = vadd.f32 %v372_v11, %v371_v14  ;;  %v538_v35 = vunpack.c.l.bf16 %v569_v25  ;;  %v293_v36 = vsel %vm255_vm1, %v535_v28, 0.0 }
  0x27   : > { %v539_v42 = vunpack.c.h.bf16 %v569_v25  ;;  %v382_v39 = vsel %vm255_vm1, %v340_v31, 0.0  ;;  %v542_v48 = vunpack.c.l.bf16 %v570_v38  ;;  %v343_v50 = vmul.f32 %v526_v59, %v526_v59 }
  0x28   : > { %v276_v51 = vadd.f32 %v275_v41, %v274_v44  ;;  %v375_v27 = vadd.f32 %v374_v18, %v373_v20  ;;  %v295_v44 = vsel %vm255_vm1, %v538_v35, 0.0  ;;  %v384_v43 = vsel %vm255_vm1, %v341_v37, 0.0 }
  0x29   : > { %v297_v49 = vsel %vm255_vm1, %v539_v42, 0.0  ;;  %v543_v55 = vunpack.c.h.bf16 %v570_v38  ;;  %v299_v56 = vsel %vm255_vm1, %v542_v48, 0.0  ;;  %v345_v63 = vmul.f32 %v530_v8, %v530_v8 }
  0x2a   : > { %v278_v57 = vadd.f32 %v277_v45, %v276_v51  ;;  %v377_v34 = vadd.f32 %v376_v24, %v375_v27  ;;  %v342_v45 = vmul.f32 %v523_v53, %v523_v53  ;;  %v571_v51 = vld [vmem:[%s634_s21 + $0x60] sm:$0xff]   ;;  %v388_v59 = vsel %vm255_vm1, %v343_v50, 0.0 }
  0x2b   : > { %v546_v61 = vunpack.c.l.bf16 %v571_v51  ;;  %v301_v62 = vsel %vm255_vm1, %v543_v55, 0.0  ;;  %v547_v4 = vunpack.c.h.bf16 %v571_v51  ;;  %v347_v12 = vmul.f32 %v534_v21, %v534_v21  ;;  %v574_v21 = vld [vmem:[%s634_s21 + $0x78] sm:$0xff]  }
  0x2c   : > { %v280_v0 = vadd.f32 %v279_v54, %v278_v57  ;;  %v379_v41 = vadd.f32 %v378_v30, %v377_v34  ;;  %v344_v57 = vmul.f32 %v527_v2, %v527_v2  ;;  %v386_v53 = vsel %vm255_vm1, %v342_v45, 0.0 }
  0x2d   : > { %v303_v5 = vsel %vm255_vm1, %v546_v61, 0.0  ;;  %v305_v11 = vsel %vm255_vm1, %v547_v4, 0.0  ;;  %v392_v8 = vsel %vm255_vm1, %v345_v63, 0.0  ;;  %v349_v25 = vmul.f32 %v538_v35, %v538_v35 }
  0x2e   : > { %v282_v6 = vadd.f32 %v281_v60, %v280_v0  ;;  %v381_v47 = vadd.f32 %v380_v32, %v379_v41  ;;  %v572_v0 = vld [vmem:[%s634_s21 + $0x68] sm:$0xff]   ;;  %v390_v2 = vsel %vm255_vm1, %v344_v57, 0.0  ;;  %v558_v37 = vunpack.c.l.bf16 %v574_v21 }
  0x2f   : > { %v550_v10 = vunpack.c.l.bf16 %v572_v0  ;;  %v551_v17 = vunpack.c.h.bf16 %v572_v0  ;;  %v351_v38 = vmul.f32 %v542_v48, %v542_v48  ;;  %v353_v50 = vmul.f32 %v546_v61, %v546_v61 }
  0x30   : > { %v284_v13 = vadd.f32 %v283_v3, %v282_v6  ;;  %v383_v54 = vadd.f32 %v382_v39, %v381_v47  ;;  %v346_v6 = vmul.f32 %v531_v15, %v531_v15  ;;  %v315_v45 = vsel %vm255_vm1, %v558_v37, 0.0 }
  0x31   : > { %v307_v18 = vsel %vm255_vm1, %v550_v10, 0.0  ;;  %v309_v24 = vsel %vm255_vm1, %v551_v17, 0.0  ;;  %v352_v39 = vmul.f32 %v543_v55, %v543_v55  ;;  %v354_v48 = vmul.f32 %v547_v4, %v547_v4 }
  0x32   : > { %v286_v19 = vadd.f32 %v285_v9, %v284_v13  ;;  %v385_v60 = vadd.f32 %v384_v43, %v383_v54  ;;  %v573_v13 = vld [vmem:[%s634_s21 + $0x70] sm:$0xff]   ;;  %v394_v15 = vsel %vm255_vm1, %v346_v6, 0.0  ;;  %v404_v43 = vsel %vm255_vm1, %v351_v38, 0.0 }
  0x33   : > { %v554_v23 = vunpack.c.l.bf16 %v573_v13  ;;  %v555_v31 = vunpack.c.h.bf16 %v573_v13  ;;  %v406_v54 = vsel %vm255_vm1, %v352_v39, 0.0  ;;  %v410_v63 = vsel %vm255_vm1, %v354_v48, 0.0 }
  0x34   : > { %v288_v26 = vadd.f32 %v287_v16, %v286_v19  ;;  %v387_v3 = vadd.f32 %v386_v53, %v385_v60  ;;  %v348_v19 = vmul.f32 %v535_v28, %v535_v28  ;;  %v355_v53 = vmul.f32 %v550_v10, %v550_v10 }
  0x35   : > { %v311_v30 = vsel %vm255_vm1, %v554_v23, 0.0  ;;  %v313_v32 = vsel %vm255_vm1, %v555_v31, 0.0  ;;  %v357_v61 = vmul.f32 %v554_v23, %v554_v23  ;;  %v358_v4 = vmul.f32 %v555_v31, %v555_v31 }
  0x36   : > { %v290_v33 = vadd.f32 %v289_v22, %v288_v26  ;;  %v389_v9 = vadd.f32 %v388_v59, %v387_v3  ;;  %v396_v26 = vsel %vm255_vm1, %v347_v12, 0.0  ;;  %v398_v34 = vsel %vm255_vm1, %v348_v19, 0.0 }
  0x37   : > { %v416_v10 = vsel %vm255_vm1, %v357_v61, 0.0 }
  0x38   : > { %v292_v40 = vadd.f32 %v291_v29, %v290_v33  ;;  %v391_v16 = vadd.f32 %v390_v2, %v389_v9  ;;  %v350_v33 = vmul.f32 %v539_v42, %v539_v42  ;;  %v359_v9 = vmul.f32 %v558_v37, %v558_v37 }
  0x3a   : > { %v294_v46 = vadd.f32 %v293_v36, %v292_v40  ;;  %v393_v22 = vadd.f32 %v392_v8, %v391_v16  ;;  %v400_v40 = vsel %vm255_vm1, %v349_v25, 0.0  ;;  %v254_v8 = vld [vmem:[#allocation2] sm:$0x1] }
  0x3c   : > { %v296_v52 = vadd.f32 %v295_v44, %v294_v46  ;;  %v395_v29 = vadd.f32 %v394_v15, %v393_v22  ;;  %v559_v44 = vunpack.c.h.bf16 %v574_v21  ;;  %v402_v46 = vsel %vm255_vm1, %v350_v33, 0.0 }
  0x3e   : > { %v298_v58 = vadd.f32 %v297_v49, %v296_v52  ;;  %v397_v36 = vadd.f32 %v396_v26, %v395_v29  ;;  %v317_v49 = vsel %vm255_vm1, %v559_v44, 0.0  ;;  %v360_v13 = vmul.f32 %v559_v44, %v559_v44  ;;  %v328_v29 = vld [vmem:[#allocation3] sm:$0x1] }
  0x40   : > { %v300_v1 = vadd.f32 %v299_v56, %v298_v58  ;;  %v399_v41 = vadd.f32 %v398_v34, %v397_v36  ;;  %v408_v58 = vsel %vm255_vm1, %v353_v50, 0.0 }
  0x42   : > { %v302_v7 = vadd.f32 %v301_v62, %v300_v1  ;;  %v401_v42 = vadd.f32 %v400_v40, %v399_v41  ;;  %v356_v62 = vmul.f32 %v551_v17, %v551_v17  ;;  %v412_v1 = vsel %vm255_vm1, %v355_v53, 0.0 }
  0x44   : > { %v304_v14 = vadd.f32 %v303_v5, %v302_v7  ;;  %v403_v52 = vadd.f32 %v402_v46, %v401_v42  ;;  %v414_v6 = vsel %vm255_vm1, %v356_v62, 0.0 }
  0x46   : > { %v306_v20 = vadd.f32 %v305_v11, %v304_v14  ;;  %v405_v57 = vadd.f32 %v404_v43, %v403_v52  ;;  %v418_v14 = vsel %vm255_vm1, %v358_v4, 0.0 }
  0x48   : > { %v308_v27 = vadd.f32 %v307_v18, %v306_v20  ;;  %v407_v60 = vadd.f32 %v406_v54, %v405_v57  ;;  %v420_v18 = vsel %vm255_vm1, %v359_v9, 0.0  ;;  %v422_v20 = vsel %vm255_vm1, %v360_v13, 0.0 }
  0x4a   : > { %v310_v28 = vadd.f32 %v309_v24, %v308_v27  ;;  %v409_v0 = vadd.f32 %v408_v58, %v407_v60 }
  0x4c   : > { %v312_v35 = vadd.f32 %v311_v30, %v310_v28  ;;  %v411_v5 = vadd.f32 %v410_v63, %v409_v0 }
  0x4e   : > { %v314_v47 = vadd.f32 %v313_v32, %v312_v35  ;;  %v413_v7 = vadd.f32 %v412_v1, %v411_v5 }
  0x50   : > { %v316_v51 = vadd.f32 %v315_v45, %v314_v47  ;;  %v415_v12 = vadd.f32 %v414_v6, %v413_v7 }
  0x52   : > { %v318_v56 = vadd.f32 %v317_v49, %v316_v51  ;;  %v417_v17 = vadd.f32 %v416_v10, %v415_v12 }
  0x54   : > { %v319_v55 = vrot.slane %v318_v56, 4  ;;  %v419_v15 = vadd.f32 %v418_v14, %v417_v17 }
  0x56   : > { %v320_v59 = vadd.f32 %v319_v55, %v318_v56  ;;  %v421_v22 = vadd.f32 %v420_v18, %v419_v15 }
  0x58   : > { %v321_v3 = vrot.slane %v320_v59, 2  ;;  %v423_v23 = vadd.f32 %v422_v20, %v421_v22 }
  0x5a   : > { %v322_v2 = vadd.f32 %v321_v3, %v320_v59  ;;  %v424_v24 = vrot.slane %v423_v23, 4 }
  0x5c   : > { %v323_v11 = vrot.slane %v322_v2, 1  ;;  %v425_v25 = vadd.f32 %v424_v24, %v423_v23 }
  0x5e   : > { %v324_v16 = vadd.f32 %v323_v11, %v322_v2  ;;  %v426_v26 = vrot.slane %v425_v25, 2 }
  0x60   : > { %v325_v19 = vadd.f32 %v324_v16, %v254_v8  ;;  %v427_v21 = vadd.f32 %v426_v26, %v425_v25 }
  0x62   : > { %327 = vst.msk [vmem:[#allocation2] sm:$0x1] %vm326_vm2, %v325_v19  ;;  %v428_v27 = vrot.slane %v427_v21, 1 }
  0x64   : > { %v429_v31 = vadd.f32 %v428_v27, %v427_v21  ;;  %435 = sbr.rel (%p493_p5) target bundleno = 141 (0x8d), region = 40 }
  0x66   : > { %v430_v30 = vadd.f32 %v429_v31, %v328_v29 }
  0x68   : > { %431 = vst.msk [vmem:[#allocation3] sm:$0x1] %vm326_vm2, %v430_v30 }
  0x69   : > { %v436_v33 = vld [vmem:[#allocation2] sm:$0x1] }
  0x6a   : > { %v437_v28 = vmul.f32 0.001953125, %v436_v33  ;;  %v443_v35 = vld [vmem:[%s738_s1] sm:$0x1] }
  0x6b   : > { %v448_v45 = vld [vmem:[%s739_s2] sm:$0x1] }
  0x6c   : > { %v440_v37 = vmul.f32 %v437_v28, %v437_v28 }
  0x6f   : > { %v438_v34 = vld [vmem:[#allocation3] sm:$0x1] }
  0x70   : > { %v439_v36 = vmul.f32 0.001953125, %v438_v34 }
  0x72   : > { %v441_v32 = vsub.f32 %v439_v36, %v440_v37 }
  0x74   : > { %v442_v38 = vmax.f32 %v441_v32, 0.0 }
  0x76   : > { %v444_v40 = vadd.f32 1e-05, %v442_v38 }
  0x78   : > { %584 = vrsqrt.f32 %v444_v40 }
  0x85   : > { %v585_v41 = vpop.eup %584 }
  0x86   : > { %v446_v44 = vmul.f32 %v585_v41, %v443_v35 }
  0x88   : > { %447 = vst.msk [vmem:[%s740_s3] sm:$0x1] %vm326_vm2, %v446_v44  ;;  %v449_v39 = vmul.f32 %v446_v44, %v437_v28 }
  0x8a   : > { %v450_v46 = vsub.f32 %v448_v45, %v449_v39 }
  0x8c   : > { %451 = vst.msk [vmem:[%s741_s4] sm:$0x1] %vm326_vm2, %v450_v46 }
  0x8d PF: > { %s15_s15 = sadd.s32 1, %s592_s15  }
  0x8e   : > { %p12_p6 = scmp.ge.s32.totalorder %s15_s15, 4  }
  0x90   :  { %14 = sbr.rel (!%p12_p6) target bundleno = 1 (0x1), region = 74 }

// kernel: _lambda_.70
= control target key start
LH: loop header
LB: loop body
LE: loop exit
PB: predicated region body
PF: predicated region fallthrough
CT: control target
= control target key end

     0   :  { %s1179_s15 = smov 0   ;;  %s1519_s0 = inlined_call_operand.vmem [shape: bf16[512,8], index: 0, kind: input, shape index: {}]   ;;  %s1520_s1 = inlined_call_operand.vmem [shape: f32[1,8], index: 1, kind: input, shape index: {}]   ;;  %s1521_s2 = inlined_call_operand.vmem [shape: f32[1,8], index: 2, kind: input, shape index: {}]   ;;  %s1522_s3 = inlined_call_operand.vmem [shape: bf16[512,8], index: 3, kind: input, shape index: {}]   ;;  %s1523_s4 = inlined_call_operand.vmem [shape: bf16[512,16], index: 4, kind: output, shape index: {}]  }
   0x1 LB: > { %s819_s16 = sadd.s32 4294967295, %s1151_s15   ;;  %p823_p0 = scmp.ge.s32.totalorder %s1151_s15, 1  ;;  %s1151_s15 = sphi %s1179_s15, %s14_s15  }
   0x2   : > { %p174_p1 = scmp.lt.s32.totalorder %s1151_s15, 3 }
   0x4   : > { %p175_p2 = pnand %p823_p0, %p174_p1 }
   0x5   : > { %s824_s17 = sshll.u32 (!%p175_p2), %s819_s16, 5  ;;  %s1153_s22 = smov (!%p175_p2), 8  }
   0x6   : > { %178 = sbr.rel (%p175_p2) target bundleno = 169 (0xa9), region = 36  ;;  %p206_p3 = scmp.lt.s32.totalorder (!%p175_p2), %s824_s17, 63 }
   0xb   : > { %s1525_s17 = smov (!%p206_p3, %s824_s17), 63  ;;  %vm557_vm0 = vcmask 64512   ;;  %vm718_vm1 = vcmask 125952  }
   0xc   : > { %s1187_s18 = sshll.u32 %s1525_s17, 2 }
   0xd   : > { %s1193_s21 = scalar_lea.vmem %s1522_s3, %s1187_s18  ;;  %s1231_s25 = scalar_lea.vmem %s1519_s0, %s1187_s18 }
   0xe   : > { %v1042_v0 = vld [vmem:[%s1193_s21 + $0x10] sm:$0xff]   ;;  %v963_v1 = vld [vmem:[%s1193_s21] sm:$0xff]   ;;  %v1043_v2 = vld [vmem:[%s1193_s21 + $0x18] sm:$0xff]   ;;  %s1354_s6 = scalar_lea.vmem %s1523_s4, %s1187_s18 }
   0xf   : > { %v972_v3 = vunpack.c.l.bf16 %v1042_v0  ;;  %v973_v4 = vunpack.c.h.bf16 %v1042_v0  ;;  %v964_v5 = vunpack.c.l.bf16 %v963_v1  ;;  %v965_v6 = vunpack.c.h.bf16 %v963_v1  ;;  %v1041_v7 = vld [vmem:[%s1193_s21 + $0x8] sm:$0xff]   ;;  %v1044_v13 = vld [vmem:[%s1193_s21 + $0x20] sm:$0xff]   ;;  %v1047_v22 = vld [vmem:[%s1193_s21 + $0x38] sm:$0xff]  }
  0x10   : > { %v1045_v8 = vld [vmem:[%s1193_s21 + $0x28] sm:$0xff]   ;;  %v976_v9 = vunpack.c.l.bf16 %v1043_v2  ;;  %v977_v10 = vunpack.c.h.bf16 %v1043_v2  ;;  %v968_v11 = vunpack.c.l.bf16 %v1041_v7  ;;  %v969_v12 = vunpack.c.h.bf16 %v1041_v7  ;;  %v1046_v23 = vld [vmem:[%s1193_s21 + $0x30] sm:$0xff]   ;;  %v1048_v31 = vld [vmem:[%s1193_s21 + $0x40] sm:$0xff]  }
  0x11   : > { %v1075_v14 = vpack.i.bf16 %v973_v4, %v972_v3  ;;  %v1065_v15 = vpack.i.bf16 %v965_v6, %v964_v5  ;;  %v984_v16 = vunpack.c.l.bf16 %v1045_v8  ;;  %v985_v17 = vunpack.c.h.bf16 %v1045_v8  ;;  %v1049_v30 = vld [vmem:[%s1193_s21 + $0x48] sm:$0xff]   ;;  %v1051_v38 = vld [vmem:[%s1193_s21 + $0x58] sm:$0xff]   ;;  %v1050_v39 = vld [vmem:[%s1193_s21 + $0x50] sm:$0xff]  }
  0x12   : > { %v1080_v18 = vpack.i.bf16 %v977_v10, %v976_v9  ;;  %v1070_v19 = vpack.i.bf16 %v969_v12, %v968_v11  ;;  %v980_v20 = vunpack.c.l.bf16 %v1044_v13  ;;  %v981_v21 = vunpack.c.h.bf16 %v1044_v13  ;;  %v1053_v46 = vld [vmem:[%s1193_s21 + $0x68] sm:$0xff]   ;;  %v1052_v47 = vld [vmem:[%s1193_s21 + $0x60] sm:$0xff]   ;;  %v1055_v54 = vld [vmem:[%s1193_s21 + $0x78] sm:$0xff]  }
  0x13   : > { %1076 = vrot.lane.b32.xlu1 %v1075_v14, %s1153_s22  ;;  %1066 = vrot.lane.b32.xlu0 %v1065_v15, %s1153_s22  ;;  %v1090_v24 = vpack.i.bf16 %v985_v17, %v984_v16  ;;  %v992_v25 = vunpack.c.l.bf16 %v1047_v22  ;;  %v993_v27 = vunpack.c.h.bf16 %v1047_v22  ;;  %v988_v28 = vunpack.c.l.bf16 %v1046_v23  ;;  %v1054_v55 = vld [vmem:[%s1193_s21 + $0x70] sm:$0xff]   ;;  %v899_v1 = vld [vmem:[%s1231_s25] sm:$0xff]  }
  0x14   : > { %v1085_v26 = vpack.i.bf16 %v981_v21, %v980_v20  ;;  %v989_v29 = vunpack.c.h.bf16 %v1046_v23  ;;  %v1000_v32 = vunpack.c.l.bf16 %v1049_v30  ;;  %v1001_v33 = vunpack.c.h.bf16 %v1049_v30  ;;  %v1027_v0 = vld [vmem:[%s1231_s25 + $0x10] sm:$0xff]   ;;  %v1028_v4 = vld [vmem:[%s1231_s25 + $0x18] sm:$0xff]   ;;  %v1239_v5 = vld [vmem:[%s1520_s1] ss:$0 sm:$0xff] }
  0x15   : > { %v1100_v34 = vpack.i.bf16 %v993_v27, %v992_v25  ;;  %v996_v36 = vunpack.c.l.bf16 %v1048_v31  ;;  %v997_v37 = vunpack.c.h.bf16 %v1048_v31  ;;  %v1008_v41 = vunpack.c.l.bf16 %v1051_v38  ;;  %v1026_v8 = vld [vmem:[%s1231_s25 + $0x8] sm:$0xff]   ;;  %v1247_v13 = vld [vmem:[%s1521_s2] ss:$0 sm:$0xff]  ;;  %v1032_v22 = vld [vmem:[%s1231_s25 + $0x38] sm:$0xff]  }
  0x16   : > { %v1095_v35 = vpack.i.bf16 %v989_v29, %v988_v28  ;;  %v1110_v40 = vpack.i.bf16 %v1001_v33, %v1000_v32  ;;  %v1009_v43 = vunpack.c.h.bf16 %v1051_v38  ;;  %v1004_v44 = vunpack.c.l.bf16 %v1050_v39  ;;  %v1030_v17 = vld [vmem:[%s1231_s25 + $0x28] sm:$0xff]   ;;  %v1029_v21 = vld [vmem:[%s1231_s25 + $0x20] sm:$0xff]   ;;  %v1031_v29 = vld [vmem:[%s1231_s25 + $0x30] sm:$0xff]  }
  0x17   : > { %1081 = vrot.lane.b32.xlu1 %v1080_v18, %s1153_s22  ;;  %1071 = vrot.lane.b32.xlu0 %v1070_v19, %s1153_s22  ;;  %v1105_v42 = vpack.i.bf16 %v997_v37, %v996_v36  ;;  %v1005_v45 = vunpack.c.h.bf16 %v1050_v39  ;;  %v1016_v48 = vunpack.c.l.bf16 %v1053_v46  ;;  %v1017_v49 = vunpack.c.h.bf16 %v1053_v46  ;;  %v1034_v30 = vld [vmem:[%s1231_s25 + $0x48] sm:$0xff]  }
  0x18   : > { %v1120_v50 = vpack.i.bf16 %v1009_v43, %v1008_v41  ;;  %v1012_v52 = vunpack.c.l.bf16 %v1052_v47  ;;  %v1013_v53 = vunpack.c.h.bf16 %v1052_v47  ;;  %v1024_v57 = vunpack.c.l.bf16 %v1055_v54 }
  0x19   : > { %v1115_v51 = vpack.i.bf16 %v1005_v45, %v1004_v44  ;;  %v1130_v56 = vpack.i.bf16 %v1017_v49, %v1016_v48  ;;  %v1025_v59 = vunpack.c.h.bf16 %v1055_v54  ;;  %v1020_v60 = vunpack.c.l.bf16 %v1054_v55  ;;  %v1036_v44 = vld [vmem:[%s1231_s25 + $0x58] sm:$0xff]  }
  0x1a   : > { %v1125_v58 = vpack.i.bf16 %v1013_v53, %v1012_v52  ;;  %v1021_v61 = vunpack.c.h.bf16 %v1054_v55  ;;  %v908_v2 = vunpack.c.l.bf16 %v1027_v0  ;;  %v909_v3 = vunpack.c.h.bf16 %v1027_v0  ;;  %v1035_v53 = vld [vmem:[%s1231_s25 + $0x50] sm:$0xff]  }
  0x1b   : > { %1091 = vrot.lane.b32.xlu1 %v1090_v24, %s1153_s22  ;;  %1086 = vrot.lane.b32.xlu0 %v1085_v26, %s1153_s22  ;;  %v1140_v62 = vpack.i.bf16 %v1025_v59, %v1024_v57  ;;  %v900_v6 = vunpack.c.l.bf16 %v899_v1  ;;  %v901_v7 = vunpack.c.h.bf16 %v899_v1  ;;  %v912_v9 = vunpack.c.l.bf16 %v1028_v4 }
  0x1c   : > { %v1135_v63 = vpack.i.bf16 %v1021_v61, %v1020_v60  ;;  %v913_v10 = vunpack.c.h.bf16 %v1028_v4  ;;  %v298_v11 = vmul.f32 %v908_v2, %v1239_v5  ;;  %v299_v12 = vmul.f32 %v909_v3, %v1239_v5 }
  0x1d   : > { %v294_v14 = vmul.f32 %v900_v6, %v1239_v5  ;;  %v295_v15 = vmul.f32 %v901_v7, %v1239_v5  ;;  %v904_v16 = vunpack.c.l.bf16 %v1026_v8  ;;  %v300_v18 = vmul.f32 %v912_v9, %v1239_v5  ;;  %v1315_v7 = vld [vmem:[%s1231_s25 + $0x68] sm:$0xff]  }
  0x1e   : > { %v301_v19 = vmul.f32 %v913_v10, %v1239_v5  ;;  %v905_v20 = vunpack.c.h.bf16 %v1026_v8  ;;  %v1257_v23 = vadd.f32 %v1247_v13, %v298_v11  ;;  %v1260_v24 = vadd.f32 %v1247_v13, %v299_v12 }
  0x1f   : > { %1101 = vrot.lane.b32.xlu1 %v1100_v34, %s1153_s22  ;;  %1096 = vrot.lane.b32.xlu0 %v1095_v35, %s1153_s22  ;;  %v1263_v25 = vadd.f32 %v1247_v13, %v294_v14  ;;  %v1266_v26 = vadd.f32 %v1247_v13, %v295_v15  ;;  %v296_v27 = vmul.f32 %v904_v16, %v1239_v5  ;;  %v920_v28 = vunpack.c.l.bf16 %v1030_v17  ;;  %v1033_v35 = vld [vmem:[%s1231_s25 + $0x40] sm:$0xff]  }
  0x20   : > { %v921_v31 = vunpack.c.h.bf16 %v1030_v17  ;;  %v916_v32 = vunpack.c.l.bf16 %v1029_v21  ;;  %v917_v33 = vunpack.c.h.bf16 %v1029_v21  ;;  %v928_v34 = vunpack.c.l.bf16 %v1032_v22 }
  0x21   : > { %v1273_v36 = vadd.f32 %v1247_v13, %v300_v18  ;;  %v1276_v37 = vadd.f32 %v1247_v13, %v301_v19  ;;  %v297_v38 = vmul.f32 %v905_v20, %v1239_v5  ;;  %v929_v39 = vunpack.c.h.bf16 %v1032_v22 }
  0x22   : > { %v925_v41 = vunpack.c.h.bf16 %v1031_v29  ;;  %v937_v43 = vunpack.c.h.bf16 %v1034_v30  ;;  %v1281_v45 = vadd.f32 %v1247_v13, %v296_v27  ;;  %v304_v46 = vmul.f32 %v920_v28, %v1239_v5 }
  0x23   : > { %1111 = vrot.lane.b32.xlu1 %v1110_v40, %s1153_s22  ;;  %1106 = vrot.lane.b32.xlu0 %v1105_v42, %s1153_s22  ;;  %v924_v40 = vunpack.c.l.bf16 %v1031_v29  ;;  %v936_v42 = vunpack.c.l.bf16 %v1034_v30  ;;  %v932_v47 = vunpack.c.l.bf16 %v1033_v35  ;;  %v933_v48 = vunpack.c.h.bf16 %v1033_v35 }
  0x24   : > { %v305_v49 = vmul.f32 %v921_v31, %v1239_v5  ;;  %v308_v52 = vmul.f32 %v928_v34, %v1239_v5  ;;  %v1290_v54 = vadd.f32 %v1247_v13, %v297_v38  ;;  %v309_v55 = vmul.f32 %v929_v39, %v1239_v5 }
  0x25   : > { %v945_v57 = vunpack.c.h.bf16 %v1036_v44  ;;  %v307_v59 = vmul.f32 %v925_v41, %v1239_v5  ;;  %v312_v60 = vmul.f32 %v936_v42, %v1239_v5  ;;  %v313_v61 = vmul.f32 %v937_v43, %v1239_v5  ;;  %v1365_v41 = vld [vmem:[%s1231_s25 + $0x60] sm:$0xff]  }
  0x26   : > { %v311_v0 = vmul.f32 %v933_v48, %v1239_v5  ;;  %v940_v1 = vunpack.c.l.bf16 %v1035_v53  ;;  %v1303_v2 = vadd.f32 %v1247_v13, %v305_v49  ;;  %v1312_v6 = vadd.f32 %v1247_v13, %v308_v52 }
  0x27   : > { %1121 = vrot.lane.b32.xlu1 %v1120_v50, %s1153_s22  ;;  %1116 = vrot.lane.b32.xlu0 %v1115_v51, %s1153_s22  ;;  %v302_v50 = vmul.f32 %v916_v32, %v1239_v5  ;;  %v303_v51 = vmul.f32 %v917_v33, %v1239_v5  ;;  %v1318_v8 = vadd.f32 %v1247_v13, %v309_v55  ;;  %v941_v11 = vunpack.c.h.bf16 %v1035_v53 }
  0x28   : > { %v317_v10 = vmul.f32 %v945_v57, %v1239_v5  ;;  %v1326_v14 = vadd.f32 %v1247_v13, %v307_v59  ;;  %v1329_v15 = vadd.f32 %v1247_v13, %v312_v60  ;;  %v1332_v16 = vadd.f32 %v1247_v13, %v313_v61 }
  0x29   : > { %v1306_v3 = vadd.f32 %v1247_v13, %v302_v50  ;;  %v1309_v4 = vadd.f32 %v1247_v13, %v303_v51  ;;  %v1338_v20 = vadd.f32 %v1247_v13, %v311_v0  ;;  %v314_v21 = vmul.f32 %v940_v1, %v1239_v5 }
  0x2a   : > { %v952_v22 = vunpack.c.l.bf16 %v1315_v7  ;;  %v1346_v32 = vadd.f32 %v1247_v13, %v317_v10  ;;  %v315_v33 = vmul.f32 %v941_v11, %v1239_v5  ;;  %v953_v34 = vunpack.c.h.bf16 %v1315_v7 }
  0x2b   : > { %1131 = vrot.lane.b32.xlu1 %v1130_v56, %s1153_s22  ;;  %1126 = vrot.lane.b32.xlu0 %v1125_v58, %s1153_s22  ;;  %v944_v56 = vunpack.c.l.bf16 %v1036_v44  ;;  %v306_v58 = vmul.f32 %v924_v40, %v1239_v5  ;;  %v948_v51 = vunpack.c.l.bf16 %v1365_v41  ;;  %v949_v52 = vunpack.c.h.bf16 %v1365_v41 }
  0x2d   : > { %v316_v9 = vmul.f32 %v944_v56, %v1239_v5  ;;  %v1323_v12 = vadd.f32 %v1247_v13, %v306_v58  ;;  %v1390_v58 = vld [vmem:[%s1231_s25 + $0x78] sm:$0xff]  }
  0x2e   : > { %v960_v10 = vunpack.c.l.bf16 %v1390_v58  ;;  %v961_v11 = vunpack.c.h.bf16 %v1390_v58 }
  0x2f   : > { %1141 = vrot.lane.b32.xlu1 %v1140_v62, %s1153_s22  ;;  %1136 = vrot.lane.b32.xlu0 %v1135_v63, %s1153_s22  ;;  %v1298_v62 = vadd.f32 %v1247_v13, %v304_v46  ;;  %v310_v63 = vmul.f32 %v932_v47, %v1239_v5  ;;  %v1343_v31 = vadd.f32 %v1247_v13, %v316_v9 }
  0x31   : > { %v1335_v19 = vadd.f32 %v1247_v13, %v310_v63 }
  0x85   : > { %v1077_v17 = vpop.permute.xlu1 %1076  ;;  %v1067_v18 = vpop.permute.xlu0 %1066 }
  0x86   : > { %v1079_v27 = vunpack.i.h.bf16 %v1077_v17  ;;  %v1078_v28 = vunpack.i.l.bf16 %v1077_v17  ;;  %v1069_v29 = vunpack.i.h.bf16 %v1067_v18  ;;  %v1068_v30 = vunpack.i.l.bf16 %v1067_v18 }
  0x88   : > { %v562_v35 = vsel %vm557_vm0, %v1257_v23, %v1078_v28  ;;  %v563_v38 = vsel %vm557_vm0, %v1260_v24, %v1079_v27  ;;  %v558_v39 = vsel %vm557_vm0, %v1263_v25, %v1068_v30  ;;  %v559_v40 = vsel %vm557_vm0, %v1266_v26, %v1069_v29  ;;  %v1415_v27 = vld [vmem:[%s1231_s25 + $0x70] sm:$0xff]  }
  0x89   : > { %v870_v42 = vpack.c.bf16 %v562_v35, %v562_v35  ;;  %v871_v43 = vpack.c.bf16 %v563_v38, %v563_v38  ;;  %v866_v44 = vpack.c.bf16 %v558_v39, %v558_v39  ;;  %v867_v46 = vpack.c.bf16 %v559_v40, %v559_v40  ;;  %v1082_v47 = vpop.permute.xlu1 %1081  ;;  %v1072_v23 = vpop.permute.xlu0 %1071 }
  0x8a   : > { %v1084_v48 = vunpack.i.h.bf16 %v1082_v47  ;;  %v1083_v49 = vunpack.i.l.bf16 %v1082_v47  ;;  %v1074_v24 = vunpack.i.h.bf16 %v1072_v23  ;;  %v1073_v50 = vunpack.i.l.bf16 %v1072_v23 }
  0x8b   : > { %723 = vst.msk [vmem:[%s1354_s6 + $0x10] sm:$0xf] %vm718_vm1, %v870_v42  ;;  %724 = vst.msk [vmem:[%s1354_s6 + $0x14] sm:$0xf] %vm718_vm1, %v871_v43  ;;  %v1376_v25 = vadd.f32 %v1247_v13, %v314_v21  ;;  %v320_v26 = vmul.f32 %v952_v22, %v1239_v5  ;;  %v319_v40 = vmul.f32 %v949_v52, %v1239_v5  ;;  %v956_v41 = vunpack.c.l.bf16 %v1415_v27 }
  0x8c   : > { %719 = vst.msk [vmem:[%s1354_s6] sm:$0xf] %vm718_vm1, %v866_v44  ;;  %720 = vst.msk [vmem:[%s1354_s6 + $0x4] sm:$0xf] %vm718_vm1, %v867_v46  ;;  %v564_v53 = vsel %vm557_vm0, %v1273_v36, %v1083_v49  ;;  %v565_v55 = vsel %vm557_vm0, %v1276_v37, %v1084_v48  ;;  %v560_v56 = vsel %vm557_vm0, %v1281_v45, %v1073_v50 }
  0x8d   : > { %v561_v57 = vsel %vm557_vm0, %v1290_v54, %v1074_v24  ;;  %v872_v59 = vpack.c.bf16 %v564_v53, %v564_v53  ;;  %v873_v60 = vpack.c.bf16 %v565_v55, %v565_v55  ;;  %v868_v61 = vpack.c.bf16 %v560_v56, %v560_v56  ;;  %v1092_v0 = vpop.permute.xlu1 %1091  ;;  %v1087_v36 = vpop.permute.xlu0 %1086 }
  0x8e   : > { %v869_v63 = vpack.c.bf16 %v561_v57, %v561_v57  ;;  %v1094_v1 = vunpack.i.h.bf16 %v1092_v0  ;;  %v1093_v7 = vunpack.i.l.bf16 %v1092_v0  ;;  %v1089_v37 = vunpack.i.h.bf16 %v1087_v36 }
  0x8f   : > { %v1088_v9 = vunpack.i.l.bf16 %v1087_v36  ;;  %725 = vst.msk [vmem:[%s1354_s6 + $0x18] sm:$0xf] %vm718_vm1, %v872_v59  ;;  %726 = vst.msk [vmem:[%s1354_s6 + $0x1c] sm:$0xf] %vm718_vm1, %v873_v60  ;;  %v1401_v45 = vadd.f32 %v1247_v13, %v315_v33  ;;  %v321_v54 = vmul.f32 %v953_v34, %v1239_v5  ;;  %v957_v53 = vunpack.c.h.bf16 %v1415_v27 }
  0x90   : > { %721 = vst.msk [vmem:[%s1354_s6 + $0x8] sm:$0xf] %vm718_vm1, %v868_v61  ;;  %722 = vst.msk [vmem:[%s1354_s6 + $0xc] sm:$0xf] %vm718_vm1, %v869_v63  ;;  %v568_v17 = vsel %vm557_vm0, %v1298_v62, %v1093_v7  ;;  %v569_v18 = vsel %vm557_vm0, %v1303_v2, %v1094_v1  ;;  %v567_v22 = vsel %vm557_vm0, %v1309_v4, %v1089_v37 }
  0x91   : > { %v566_v21 = vsel %vm557_vm0, %v1306_v3, %v1088_v9  ;;  %v876_v28 = vpack.c.bf16 %v568_v17, %v568_v17  ;;  %v877_v29 = vpack.c.bf16 %v569_v18, %v569_v18  ;;  %v875_v33 = vpack.c.bf16 %v567_v22, %v567_v22  ;;  %v1102_v34 = vpop.permute.xlu1 %1101  ;;  %v1097_v62 = vpop.permute.xlu0 %1096 }
  0x92   : > { %v874_v30 = vpack.c.bf16 %v566_v21, %v566_v21  ;;  %v1104_v35 = vunpack.i.h.bf16 %v1102_v34  ;;  %v1103_v38 = vunpack.i.l.bf16 %v1102_v34  ;;  %v1099_v39 = vunpack.i.h.bf16 %v1097_v62 }
  0x93   : > { %v1098_v2 = vunpack.i.l.bf16 %v1097_v62  ;;  %729 = vst.msk [vmem:[%s1354_s6 + $0x28] sm:$0xf] %vm718_vm1, %v876_v28  ;;  %730 = vst.msk [vmem:[%s1354_s6 + $0x2c] sm:$0xf] %vm718_vm1, %v877_v29  ;;  %v1426_v3 = vadd.f32 %v1247_v13, %v320_v26  ;;  %v318_v4 = vmul.f32 %v948_v51, %v1239_v5  ;;  %v323_v9 = vmul.f32 %v957_v53, %v1239_v5 }
  0x94   : > { %727 = vst.msk [vmem:[%s1354_s6 + $0x20] sm:$0xf] %vm718_vm1, %v874_v30  ;;  %728 = vst.msk [vmem:[%s1354_s6 + $0x24] sm:$0xf] %vm718_vm1, %v875_v33  ;;  %v572_v42 = vsel %vm557_vm0, %v1312_v6, %v1103_v38  ;;  %v573_v43 = vsel %vm557_vm0, %v1318_v8, %v1104_v35  ;;  %v571_v46 = vsel %vm557_vm0, %v1326_v14, %v1099_v39 }
  0x95   : > { %v570_v44 = vsel %vm557_vm0, %v1323_v12, %v1098_v2  ;;  %v880_v47 = vpack.c.bf16 %v572_v42, %v572_v42  ;;  %v881_v23 = vpack.c.bf16 %v573_v43, %v573_v43  ;;  %v879_v49 = vpack.c.bf16 %v571_v46, %v571_v46  ;;  %v1112_v24 = vpop.permute.xlu1 %1111  ;;  %v1107_v50 = vpop.permute.xlu0 %1106 }
  0x96   : > { %v878_v48 = vpack.c.bf16 %v570_v44, %v570_v44  ;;  %v1114_v26 = vunpack.i.h.bf16 %v1112_v24  ;;  %v1113_v51 = vunpack.i.l.bf16 %v1112_v24  ;;  %v1109_v6 = vunpack.i.h.bf16 %v1107_v50 }
  0x97   : > { %v1108_v52 = vunpack.i.l.bf16 %v1107_v50  ;;  %733 = vst.msk [vmem:[%s1354_s6 + $0x38] sm:$0xf] %vm718_vm1, %v880_v47  ;;  %734 = vst.msk [vmem:[%s1354_s6 + $0x3c] sm:$0xf] %vm718_vm1, %v881_v23  ;;  %v360_v8 = vadd.f32 %v1247_v13, %v321_v54  ;;  %v324_v12 = vmul.f32 %v960_v10, %v1239_v5  ;;  %v325_v14 = vmul.f32 %v961_v11, %v1239_v5 }
  0x98   : > { %731 = vst.msk [vmem:[%s1354_s6 + $0x30] sm:$0xf] %vm718_vm1, %v878_v48  ;;  %732 = vst.msk [vmem:[%s1354_s6 + $0x34] sm:$0xf] %vm718_vm1, %v879_v49  ;;  %v576_v55 = vsel %vm557_vm0, %v1329_v15, %v1113_v51  ;;  %v577_v56 = vsel %vm557_vm0, %v1332_v16, %v1114_v26  ;;  %v575_v58 = vsel %vm557_vm0, %v1338_v20, %v1109_v6 }
  0x99   : > { %v574_v57 = vsel %vm557_vm0, %v1335_v19, %v1108_v52  ;;  %v884_v59 = vpack.c.bf16 %v576_v55, %v576_v55  ;;  %v885_v60 = vpack.c.bf16 %v577_v56, %v577_v56  ;;  %v883_v63 = vpack.c.bf16 %v575_v58, %v575_v58  ;;  %v1122_v0 = vpop.permute.xlu1 %1121  ;;  %v1117_v36 = vpop.permute.xlu0 %1116 }
  0x9a   : > { %v882_v61 = vpack.c.bf16 %v574_v57, %v574_v57  ;;  %v1124_v1 = vunpack.i.h.bf16 %v1122_v0  ;;  %v1123_v7 = vunpack.i.l.bf16 %v1122_v0  ;;  %v1119_v15 = vunpack.i.h.bf16 %v1117_v36 }
  0x9b   : > { %v1118_v37 = vunpack.i.l.bf16 %v1117_v36  ;;  %737 = vst.msk [vmem:[%s1354_s6 + $0x48] sm:$0xf] %vm718_vm1, %v884_v59  ;;  %738 = vst.msk [vmem:[%s1354_s6 + $0x4c] sm:$0xf] %vm718_vm1, %v885_v60  ;;  %v357_v16 = vadd.f32 %v1247_v13, %v318_v4  ;;  %v358_v19 = vadd.f32 %v1247_v13, %v319_v40  ;;  %v322_v20 = vmul.f32 %v956_v41, %v1239_v5 }
  0x9c   : > { %735 = vst.msk [vmem:[%s1354_s6 + $0x40] sm:$0xf] %vm718_vm1, %v882_v61  ;;  %736 = vst.msk [vmem:[%s1354_s6 + $0x44] sm:$0xf] %vm718_vm1, %v883_v63  ;;  %v580_v54 = vsel %vm557_vm0, %v1343_v31, %v1123_v7  ;;  %v581_v10 = vsel %vm557_vm0, %v1346_v32, %v1124_v1  ;;  %v579_v17 = vsel %vm557_vm0, %v1401_v45, %v1119_v15 }
  0x9d   : > { %v578_v11 = vsel %vm557_vm0, %v1376_v25, %v1118_v37  ;;  %v888_v18 = vpack.c.bf16 %v580_v54, %v580_v54  ;;  %v889_v21 = vpack.c.bf16 %v581_v10, %v581_v10  ;;  %v887_v27 = vpack.c.bf16 %v579_v17, %v579_v17  ;;  %v1132_v5 = vpop.permute.xlu1 %1131  ;;  %v1127_v28 = vpop.permute.xlu0 %1126 }
  0x9e   : > { %v886_v22 = vpack.c.bf16 %v578_v11, %v578_v11  ;;  %v1134_v29 = vunpack.i.h.bf16 %v1132_v5  ;;  %v1133_v30 = vunpack.i.l.bf16 %v1132_v5  ;;  %v1129_v31 = vunpack.i.h.bf16 %v1127_v28 }
  0x9f   : > { %v1128_v33 = vunpack.i.l.bf16 %v1127_v28  ;;  %741 = vst.msk [vmem:[%s1354_s6 + $0x58] sm:$0xf] %vm718_vm1, %v888_v18  ;;  %742 = vst.msk [vmem:[%s1354_s6 + $0x5c] sm:$0xf] %vm718_vm1, %v889_v21  ;;  %v363_v32 = vadd.f32 %v1247_v13, %v324_v12  ;;  %v364_v25 = vadd.f32 %v1247_v13, %v325_v14  ;;  %v361_v45 = vadd.f32 %v1247_v13, %v322_v20 }
  0xa0   : > { %739 = vst.msk [vmem:[%s1354_s6 + $0x50] sm:$0xf] %vm718_vm1, %v886_v22  ;;  %740 = vst.msk [vmem:[%s1354_s6 + $0x54] sm:$0xf] %vm718_vm1, %v887_v27  ;;  %v362_v34 = vadd.f32 %v1247_v13, %v323_v9  ;;  %v584_v62 = vsel %vm557_vm0, %v1426_v3, %v1133_v30  ;;  %v585_v35 = vsel %vm557_vm0, %v360_v8, %v1134_v29 }
  0xa1   : > { %v582_v38 = vsel %vm557_vm0, %v357_v16, %v1128_v33  ;;  %v583_v39 = vsel %vm557_vm0, %v358_v19, %v1129_v31  ;;  %v892_v2 = vpack.c.bf16 %v584_v62, %v584_v62  ;;  %v893_v4 = vpack.c.bf16 %v585_v35, %v585_v35  ;;  %v1142_v42 = vpop.permute.xlu1 %1141  ;;  %v1137_v43 = vpop.permute.xlu0 %1136 }
  0xa2   : > { %v890_v40 = vpack.c.bf16 %v582_v38, %v582_v38  ;;  %v891_v41 = vpack.c.bf16 %v583_v39, %v583_v39  ;;  %v1144_v44 = vunpack.i.h.bf16 %v1142_v42  ;;  %v1143_v13 = vunpack.i.l.bf16 %v1142_v42 }
  0xa3   : > { %v1139_v46 = vunpack.i.h.bf16 %v1137_v43  ;;  %v1138_v3 = vunpack.i.l.bf16 %v1137_v43  ;;  %745 = vst.msk [vmem:[%s1354_s6 + $0x68] sm:$0xf] %vm718_vm1, %v892_v2  ;;  %746 = vst.msk [vmem:[%s1354_s6 + $0x6c] sm:$0xf] %vm718_vm1, %v893_v4 }
  0xa4   : > { %743 = vst.msk [vmem:[%s1354_s6 + $0x60] sm:$0xf] %vm718_vm1, %v890_v40  ;;  %744 = vst.msk [vmem:[%s1354_s6 + $0x64] sm:$0xf] %vm718_vm1, %v891_v41  ;;  %v588_v47 = vsel %vm557_vm0, %v363_v32, %v1143_v13  ;;  %v589_v23 = vsel %vm557_vm0, %v364_v25, %v1144_v44 }
  0xa5   : > { %v586_v48 = vsel %vm557_vm0, %v361_v45, %v1138_v3  ;;  %v587_v49 = vsel %vm557_vm0, %v362_v34, %v1139_v46  ;;  %v896_v24 = vpack.c.bf16 %v588_v47, %v588_v47  ;;  %v897_v50 = vpack.c.bf16 %v589_v23, %v589_v23 }
  0xa6   : > { %v894_v26 = vpack.c.bf16 %v586_v48, %v586_v48  ;;  %v895_v51 = vpack.c.bf16 %v587_v49, %v587_v49 }
  0xa7   : > { %749 = vst.msk [vmem:[%s1354_s6 + $0x78] sm:$0xf] %vm718_vm1, %v896_v24  ;;  %750 = vst.msk [vmem:[%s1354_s6 + $0x7c] sm:$0xf] %vm718_vm1, %v897_v50 }
  0xa8   : > { %747 = vst.msk [vmem:[%s1354_s6 + $0x70] sm:$0xf] %vm718_vm1, %v894_v26  ;;  %748 = vst.msk [vmem:[%s1354_s6 + $0x74] sm:$0xf] %vm718_vm1, %v895_v51 }
  0xa9 PF: > { %s14_s15 = sadd.s32 1, %s1151_s15  }
  0xaa   : > { %p11_p4 = scmp.ge.s32.totalorder %s14_s15, 4  }
  0xac   :  { %13 = sbr.rel (!%p11_p4) target bundleno = 1 (0x1), region = 69 }

// kernel: _lambda_.71
= control target key start
LH: loop header
LB: loop body
LE: loop exit
PB: predicated region body
PF: predicated region fallthrough
CT: control target
= control target key end

     0   :  { %s1388_s12 = smov 0   ;;  %s1390_s13 = smov 0   ;;  %s1545_s0 = inlined_call_operand.vmem [shape: bf16[4,512,128], index: 0, kind: input, shape index: {}]   ;;  %s1546_s1 = inlined_call_operand.vmem [shape: bf16[4,128,128], index: 1, kind: input, shape index: {}]   ;;  %s1547_s2 = inlined_call_operand.vmem [shape: f32[1,128], index: 2, kind: input, shape index: {}]   ;;  %s1548_s3 = inlined_call_operand.vmem [shape: f32[4,512,128], index: 3, kind: output, shape index: {}]  }
   0x1   :  { %s1392_s14 = smov 0   ;;  %s1394_s15 = smov 0  }
   0x2   :  { %s1396_s16 = smov 0  }
   0x3 LB: > { %s35_s17 = sadd.s32 1, %s1358_s14  ;;  %s39_s18 = sadd.s32 1, %s1362_s15  ;;  %s1366_s16 = sphi %s1396_s16, %s13_s16   ;;  %s1362_s15 = sphi %s1394_s15, %s1552_s15   ;;  %s1358_s14 = sphi %s1392_s14, %s1551_s14   ;;  %s1354_s13 = sphi %s1390_s13, %s1550_s13   ;;  %s1350_s12 = sphi %s1388_s12, %s1549_s12  }
   0x4   : > { %p37_p0 = scmp.ge.s32.totalorder %s35_s17, 2  ;;  %p1075_p1 = scmp.ge.s32.totalorder %s1366_s16, 1 }
   0x5   : > { %p209_p2 = scmp.lt.s32.totalorder %s1366_s16, 9 }
   0x6   : > { %s1554_s17 = smov (%p37_p0, %s35_s17), 0  ;;  %s1556_s18 = smov (!%p37_p0, %s39_s18), %s1362_s15 }
   0x7   : > { %p210_p3 = pnand %p1075_p1, %p209_p2  ;;  %p41_p4 = scmp.ge.s32.totalorder %s1556_s18, 4 }
   0x8   : > { %s1076_s19 = sshll.u32 (!%p210_p3), %s1350_s12, 5  ;;  %p263_p5 = scmp.lt.s32.totalorder (!%p210_p3), %s1354_s13, 3 }
   0x9   : > { %s1558_s18 = smov (%p41_p4, %s1556_s18), 0  ;;  %213 = sbr.rel (%p210_p3) target bundleno = 291 (0x123), region = 32 }
   0xa   : > { %p265_p6 = scmp.lt.s32.totalorder (!%p210_p3), %s1076_s19, 63 }
   0xe   : > { %s1560_s13 = smov (!%p263_p5, %s1354_s13), 3  ;;  %s1562_s19 = smov (!%p265_p6, %s1076_s19), 63  ;;  %v1458_v24 = vld [vmem:[%s1547_s2] ss:$0 sm:$0xff] }
   0xf   : > { %s1077_s20 = sshll.u32 %s1560_s13, 6 }
  0x10   : > { %s1421_s23 = scalar_lea.vmem %s1546_s1, %s1077_s20  ;;  %s1423_s24 = sadd.s32 %s1077_s20, %s1562_s19 }
  0x11   : > { %v1240_v0 = vld [vmem:[%s1421_s23 + $0x38] sm:$0xff]   ;;  %v1241_v1 = vld [vmem:[%s1421_s23 + $0x30] sm:$0xff]   ;;  %s1078_s25 = sshll.u32 %s1423_s24, 2  ;;  %v1242_v2 = vld [vmem:[%s1421_s23 + $0x28] sm:$0xff]   ;;  %s1083_s4 = sshll.u32 %s1423_s24, 3 }
  0x12   : > { %1136 = vmatprep.subr.bf16.mxu0 %v1240_v0  ;;  %1184 = vmatprep.subr.bf16.mxu1 %v1240_v0  ;;  %s1432_s28 = scalar_lea.vmem %s1545_s0, %s1078_s25  ;;  %v1243_v3 = vld [vmem:[%s1421_s23 + $0x20] sm:$0xff]   ;;  %v1244_v6 = vld [vmem:[%s1421_s23 + $0x18] sm:$0xff]   ;;  %v1245_v7 = vld [vmem:[%s1421_s23 + $0x10] sm:$0xff]   ;;  %s1478_s7 = scalar_lea.vmem %s1548_s3, %s1083_s4 }
  0x13   : > { %1137 = vmatpush3.bf16.msra.mxu0 %v1240_v0  ;;  %1192 = vmatpush3.bf16.msra.mxu1 %v1240_v0  ;;  %v1248_v4 = vld [vmem:[%s1432_s28] sm:$0xff]   ;;  %v1246_v8 = vld [vmem:[%s1421_s23 + $0x8] sm:$0xff]   ;;  %v1252_v12 = vld [vmem:[%s1432_s28 + $0x10] sm:$0xff]  }
  0x14   : > { %1138 = vmatprep.subr.bf16.mxu0 %v1241_v1  ;;  %1185 = vmatprep.subr.bf16.mxu1 %v1241_v1  ;;  %v1249_v5 = vld [vmem:[%s1432_s28 + $0x40] sm:$0xff]   ;;  %v1250_v10 = vld [vmem:[%s1432_s28 + $0x8] sm:$0xff]   ;;  %v1253_v13 = vld [vmem:[%s1432_s28 + $0x50] sm:$0xff]  }
  0x15   : > { %1152 = vmatprep.mubr.bf16.mxu0 %v1248_v4  ;;  %1168 = vmatprep.mubr.bf16.mxu1 %v1249_v5  ;;  %v1247_v9 = vld [vmem:[%s1421_s23] sm:$0xff]   ;;  %v1251_v11 = vld [vmem:[%s1432_s28 + $0x48] sm:$0xff]   ;;  %v1254_v14 = vld [vmem:[%s1432_s28 + $0x18] sm:$0xff]  }
  0x16   : > { %v1255_v15 = vld [vmem:[%s1432_s28 + $0x58] sm:$0xff]   ;;  %v1256_v16 = vld [vmem:[%s1432_s28 + $0x20] sm:$0xff]   ;;  %v1258_v18 = vld [vmem:[%s1432_s28 + $0x28] sm:$0xff]  }
  0x17   : > { %1139 = vmatpush3.bf16.msra.mxu0 %v1241_v1  ;;  %1193 = vmatpush3.bf16.msra.mxu1 %v1241_v1  ;;  %v1257_v17 = vld [vmem:[%s1432_s28 + $0x60] sm:$0xff]   ;;  %v1259_v19 = vld [vmem:[%s1432_s28 + $0x68] sm:$0xff]   ;;  %v1260_v20 = vld [vmem:[%s1432_s28 + $0x30] sm:$0xff]  }
  0x18   : > { %1140 = vmatprep.subr.bf16.mxu0 %v1242_v2  ;;  %1186 = vmatprep.subr.bf16.mxu1 %v1242_v2  ;;  %v1261_v21 = vld [vmem:[%s1432_s28 + $0x70] sm:$0xff]   ;;  %v1262_v22 = vld [vmem:[%s1432_s28 + $0x38] sm:$0xff]  }
  0x19   : > { %v1263_v23 = vld [vmem:[%s1432_s28 + $0x78] sm:$0xff]  }
  0x1b   : > { %1141 = vmatpush3.bf16.msra.mxu0 %v1242_v2  ;;  %1194 = vmatpush3.bf16.msra.mxu1 %v1242_v2 }
  0x1c   : > { %1142 = vmatprep.subr.bf16.mxu0 %v1243_v3  ;;  %1187 = vmatprep.subr.bf16.mxu1 %v1243_v3 }
  0x1f   : > { %1143 = vmatpush3.bf16.msra.mxu0 %v1243_v3  ;;  %1195 = vmatpush3.bf16.msra.mxu1 %v1243_v3 }
  0x20   : > { %1144 = vmatprep.subr.bf16.mxu0 %v1244_v6  ;;  %1188 = vmatprep.subr.bf16.mxu1 %v1244_v6 }
  0x23   : > { %1145 = vmatpush3.bf16.msra.mxu0 %v1244_v6  ;;  %1196 = vmatpush3.bf16.msra.mxu1 %v1244_v6 }
  0x24   : > { %1146 = vmatprep.subr.bf16.mxu0 %v1245_v7  ;;  %1189 = vmatprep.subr.bf16.mxu1 %v1245_v7 }
  0x27   : > { %1147 = vmatpush3.bf16.msra.mxu0 %v1245_v7  ;;  %1197 = vmatpush3.bf16.msra.mxu1 %v1245_v7 }
  0x28   : > { %1148 = vmatprep.subr.bf16.mxu0 %v1246_v8  ;;  %1190 = vmatprep.subr.bf16.mxu1 %v1246_v8 }
  0x2b   : > { %1149 = vmatpush3.bf16.msra.mxu0 %v1246_v8  ;;  %1198 = vmatpush3.bf16.msra.mxu1 %v1246_v8 }
  0x2c   : > { %1150 = vmatprep.subr.bf16.mxu0 %v1247_v9  ;;  %1191 = vmatprep.subr.bf16.mxu1 %v1247_v9 }
  0x2f   : > { %1151 = vmatpush3.bf16.msra.mxu0 %v1247_v9  ;;  %1199 = vmatpush3.bf16.msra.mxu1 %v1247_v9 }
  0x32   : > { %1153 = vmatmul.mubr.bf16.vlgmr.msra.gmra.mxu0 %v1250_v10  ;;  %1169 = vmatmul.mubr.bf16.vlgmr.msra.gmra.mxu1 %v1251_v11 }
  0x33   : > { %1156 = vmatprep.mubr.bf16.mxu0 %v1252_v12  ;;  %1172 = vmatprep.mubr.bf16.mxu1 %v1253_v13 }
  0x3a   : > { %1157 = vmatmul.mubr.bf16.gmra.mxu0 %v1254_v14  ;;  %1173 = vmatmul.mubr.bf16.gmra.mxu1 %v1255_v15 }
  0x3b   : > { %1160 = vmatprep.mubr.bf16.mxu0 %v1256_v16  ;;  %1176 = vmatprep.mubr.bf16.mxu1 %v1257_v17 }
  0x42   : > { %1161 = vmatmul.mubr.bf16.gmra.mxu0 %v1258_v18  ;;  %1177 = vmatmul.mubr.bf16.gmra.mxu1 %v1259_v19 }
  0x43   : > { %1164 = vmatprep.mubr.bf16.mxu0 %v1260_v20  ;;  %1180 = vmatprep.mubr.bf16.mxu1 %v1261_v21 }
  0x4a   : > { %1165 = vmatmul.mubr.bf16.gmra.mxu0 %v1262_v22  ;;  %1181 = vmatmul.mubr.bf16.gmra.mxu1 %v1263_v23 }
  0xf2   : > { %v1154_v25 = vpop.f32.mrf.mxu0  ;;  %v1170_v26 = vpop.f32.mrf.mxu1 }
  0xf3   : > { %v834_v27 = vadd.f32 %v1154_v25, %v1458_v24  ;;  %v850_v28 = vadd.f32 %v1170_v26, %v1458_v24 }
  0xf4   : > { %v599_v29 = vpop.f32.mrf.mxu0  ;;  %v663_v30 = vpop.f32.mrf.mxu1 }
  0xf5   : > { %1264 = vtanh.f32 %v834_v27  ;;  %v832_v31 = vadd.f32 %v1458_v24, %v599_v29  ;;  %v848_v32 = vadd.f32 %v1458_v24, %v663_v30 }
  0xf6   : > { %1266 = vtanh.f32 %v850_v28  ;;  %v1155_v33 = vpop.f32.mrf.mxu0  ;;  %v1171_v34 = vpop.f32.mrf.mxu1 }
  0xf7   : > { %1268 = vtanh.f32 %v832_v31  ;;  %v835_v35 = vadd.f32 %v1155_v33, %v1458_v24  ;;  %v851_v36 = vadd.f32 %v1171_v34, %v1458_v24 }
  0xf8   : > { %1270 = vtanh.f32 %v848_v32  ;;  %v602_v37 = vpop.f32.mrf.mxu0  ;;  %v666_v38 = vpop.f32.mrf.mxu1 }
  0xf9   : > { %1272 = vtanh.f32 %v835_v35  ;;  %v833_v39 = vadd.f32 %v1458_v24, %v602_v37  ;;  %v849_v40 = vadd.f32 %v1458_v24, %v666_v38 }
  0xfa   : > { %1274 = vtanh.f32 %v851_v36  ;;  %v1158_v41 = vpop.f32.mrf.mxu0  ;;  %v1174_v42 = vpop.f32.mrf.mxu1 }
  0xfb   : > { %1276 = vtanh.f32 %v833_v39  ;;  %v838_v43 = vadd.f32 %v1158_v41, %v1458_v24  ;;  %v854_v44 = vadd.f32 %v1174_v42, %v1458_v24 }
  0xfc   : > { %1278 = vtanh.f32 %v849_v40  ;;  %v615_v45 = vpop.f32.mrf.mxu0  ;;  %v679_v46 = vpop.f32.mrf.mxu1 }
  0xfd   : > { %1280 = vtanh.f32 %v838_v43  ;;  %v836_v47 = vadd.f32 %v1458_v24, %v615_v45  ;;  %v852_v48 = vadd.f32 %v1458_v24, %v679_v46 }
  0xfe   : > { %1282 = vtanh.f32 %v854_v44  ;;  %v1159_v49 = vpop.f32.mrf.mxu0  ;;  %v1175_v50 = vpop.f32.mrf.mxu1 }
  0xff   : > { %1284 = vtanh.f32 %v836_v47  ;;  %v839_v51 = vadd.f32 %v1159_v49, %v1458_v24  ;;  %v855_v52 = vadd.f32 %v1175_v50, %v1458_v24 }
 0x100   : > { %1286 = vtanh.f32 %v852_v48  ;;  %v618_v53 = vpop.f32.mrf.mxu0  ;;  %v682_v54 = vpop.f32.mrf.mxu1 }
 0x101   : > { %1288 = vtanh.f32 %v839_v51  ;;  %v837_v55 = vadd.f32 %v1458_v24, %v618_v53  ;;  %v853_v56 = vadd.f32 %v1458_v24, %v682_v54 }
 0x102   : > { %v1265_v57 = vpop.eup %1264  ;;  %1290 = vtanh.f32 %v855_v52  ;;  %v1162_v58 = vpop.f32.mrf.mxu0 }
 0x103   : > { %v1178_v59 = vpop.f32.mrf.mxu1  ;;  %v1267_v60 = vpop.eup %1266  ;;  %898 = vst [vmem:[%s1478_s7 + $0x10] sm:$0xff] %v1265_v57  ;;  %1292 = vtanh.f32 %v837_v55  ;;  %v842_v61 = vadd.f32 %v1162_v58, %v1458_v24 }
 0x104   : > { %v858_v62 = vadd.f32 %v1178_v59, %v1458_v24  ;;  %v1269_v63 = vpop.eup %1268  ;;  %914 = vst [vmem:[%s1478_s7 + $0x90] sm:$0xff] %v1267_v60  ;;  %1294 = vtanh.f32 %v853_v56  ;;  %v631_v0 = vpop.f32.mrf.mxu0 }
 0x105   : > { %v695_v1 = vpop.f32.mrf.mxu1  ;;  %v1271_v2 = vpop.eup %1270  ;;  %896 = vst [vmem:[%s1478_s7] sm:$0xff] %v1269_v63  ;;  %1296 = vtanh.f32 %v842_v61  ;;  %v840_v3 = vadd.f32 %v1458_v24, %v631_v0 }
 0x106   : > { %v856_v4 = vadd.f32 %v1458_v24, %v695_v1  ;;  %v1273_v5 = vpop.eup %1272  ;;  %912 = vst [vmem:[%s1478_s7 + $0x80] sm:$0xff] %v1271_v2  ;;  %1298 = vtanh.f32 %v858_v62  ;;  %v1163_v6 = vpop.f32.mrf.mxu0 }
 0x107   : > { %v1179_v7 = vpop.f32.mrf.mxu1  ;;  %v1275_v8 = vpop.eup %1274  ;;  %899 = vst [vmem:[%s1478_s7 + $0x18] sm:$0xff] %v1273_v5  ;;  %1300 = vtanh.f32 %v840_v3  ;;  %v843_v9 = vadd.f32 %v1163_v6, %v1458_v24 }
 0x108   : > { %v859_v10 = vadd.f32 %v1179_v7, %v1458_v24  ;;  %v1277_v11 = vpop.eup %1276  ;;  %915 = vst [vmem:[%s1478_s7 + $0x98] sm:$0xff] %v1275_v8  ;;  %1302 = vtanh.f32 %v856_v4  ;;  %v634_v12 = vpop.f32.mrf.mxu0 }
 0x109   : > { %v698_v13 = vpop.f32.mrf.mxu1  ;;  %v1279_v14 = vpop.eup %1278  ;;  %897 = vst [vmem:[%s1478_s7 + $0x8] sm:$0xff] %v1277_v11  ;;  %1304 = vtanh.f32 %v843_v9  ;;  %v841_v15 = vadd.f32 %v1458_v24, %v634_v12 }
 0x10a   : > { %v857_v16 = vadd.f32 %v1458_v24, %v698_v13  ;;  %v1281_v17 = vpop.eup %1280  ;;  %913 = vst [vmem:[%s1478_s7 + $0x88] sm:$0xff] %v1279_v14  ;;  %1306 = vtanh.f32 %v859_v10  ;;  %v1166_v18 = vpop.f32.mrf.mxu0 }
 0x10b   : > { %v1182_v19 = vpop.f32.mrf.mxu1  ;;  %v1283_v20 = vpop.eup %1282  ;;  %902 = vst [vmem:[%s1478_s7 + $0x30] sm:$0xff] %v1281_v17  ;;  %1308 = vtanh.f32 %v841_v15  ;;  %v846_v21 = vadd.f32 %v1166_v18, %v1458_v24 }
 0x10c   : > { %v862_v22 = vadd.f32 %v1182_v19, %v1458_v24  ;;  %v1285_v23 = vpop.eup %1284  ;;  %918 = vst [vmem:[%s1478_s7 + $0xb0] sm:$0xff] %v1283_v20  ;;  %1310 = vtanh.f32 %v857_v16  ;;  %v647_v25 = vpop.f32.mrf.mxu0 }
 0x10d   : > { %v711_v26 = vpop.f32.mrf.mxu1  ;;  %v1287_v27 = vpop.eup %1286  ;;  %900 = vst [vmem:[%s1478_s7 + $0x20] sm:$0xff] %v1285_v23  ;;  %1312 = vtanh.f32 %v846_v21  ;;  %v844_v28 = vadd.f32 %v1458_v24, %v647_v25 }
 0x10e   : > { %v860_v29 = vadd.f32 %v1458_v24, %v711_v26  ;;  %v1289_v30 = vpop.eup %1288  ;;  %916 = vst [vmem:[%s1478_s7 + $0xa0] sm:$0xff] %v1287_v27  ;;  %1314 = vtanh.f32 %v862_v22  ;;  %v1167_v31 = vpop.f32.mrf.mxu0 }
 0x10f   : > { %v1183_v32 = vpop.f32.mrf.mxu1  ;;  %v1291_v33 = vpop.eup %1290  ;;  %903 = vst [vmem:[%s1478_s7 + $0x38] sm:$0xff] %v1289_v30  ;;  %1316 = vtanh.f32 %v844_v28  ;;  %v847_v34 = vadd.f32 %v1167_v31, %v1458_v24 }
 0x110   : > { %v863_v35 = vadd.f32 %v1183_v32, %v1458_v24  ;;  %v1293_v36 = vpop.eup %1292  ;;  %919 = vst [vmem:[%s1478_s7 + $0xb8] sm:$0xff] %v1291_v33  ;;  %1318 = vtanh.f32 %v860_v29  ;;  %v650_v37 = vpop.f32.mrf.mxu0 }
 0x111   : > { %v714_v38 = vpop.f32.mrf.mxu1  ;;  %v1295_v39 = vpop.eup %1294  ;;  %901 = vst [vmem:[%s1478_s7 + $0x28] sm:$0xff] %v1293_v36  ;;  %1320 = vtanh.f32 %v847_v34  ;;  %v845_v40 = vadd.f32 %v1458_v24, %v650_v37 }
 0x112   : > { %v861_v41 = vadd.f32 %v1458_v24, %v714_v38  ;;  %v1297_v42 = vpop.eup %1296  ;;  %917 = vst [vmem:[%s1478_s7 + $0xa8] sm:$0xff] %v1295_v39  ;;  %1322 = vtanh.f32 %v863_v35 }
 0x113   : > { %v1299_v43 = vpop.eup %1298  ;;  %906 = vst [vmem:[%s1478_s7 + $0x50] sm:$0xff] %v1297_v42  ;;  %1324 = vtanh.f32 %v845_v40 }
 0x114   : > { %v1301_v44 = vpop.eup %1300  ;;  %922 = vst [vmem:[%s1478_s7 + $0xd0] sm:$0xff] %v1299_v43  ;;  %1326 = vtanh.f32 %v861_v41 }
 0x115   : > { %v1303_v45 = vpop.eup %1302  ;;  %904 = vst [vmem:[%s1478_s7 + $0x40] sm:$0xff] %v1301_v44 }
 0x116   : > { %v1305_v46 = vpop.eup %1304  ;;  %920 = vst [vmem:[%s1478_s7 + $0xc0] sm:$0xff] %v1303_v45 }
 0x117   : > { %v1307_v24 = vpop.eup %1306  ;;  %907 = vst [vmem:[%s1478_s7 + $0x58] sm:$0xff] %v1305_v46 }
 0x118   : > { %v1309_v47 = vpop.eup %1308  ;;  %923 = vst [vmem:[%s1478_s7 + $0xd8] sm:$0xff] %v1307_v24 }
 0x119   : > { %v1311_v48 = vpop.eup %1310  ;;  %905 = vst [vmem:[%s1478_s7 + $0x48] sm:$0xff] %v1309_v47 }
 0x11a   : > { %v1313_v49 = vpop.eup %1312  ;;  %921 = vst [vmem:[%s1478_s7 + $0xc8] sm:$0xff] %v1311_v48 }
 0x11b   : > { %v1315_v50 = vpop.eup %1314  ;;  %910 = vst [vmem:[%s1478_s7 + $0x70] sm:$0xff] %v1313_v49 }
 0x11c   : > { %v1317_v51 = vpop.eup %1316  ;;  %926 = vst [vmem:[%s1478_s7 + $0xf0] sm:$0xff] %v1315_v50 }
 0x11d   : > { %v1319_v52 = vpop.eup %1318  ;;  %908 = vst [vmem:[%s1478_s7 + $0x60] sm:$0xff] %v1317_v51 }
 0x11e   : > { %v1321_v53 = vpop.eup %1320  ;;  %924 = vst [vmem:[%s1478_s7 + $0xe0] sm:$0xff] %v1319_v52 }
 0x11f   : > { %v1323_v54 = vpop.eup %1322  ;;  %911 = vst [vmem:[%s1478_s7 + $0x78] sm:$0xff] %v1321_v53 }
 0x120   : > { %v1325_v55 = vpop.eup %1324  ;;  %927 = vst [vmem:[%s1478_s7 + $0xf8] sm:$0xff] %v1323_v54 }
 0x121   : > { %v1327_v56 = vpop.eup %1326  ;;  %909 = vst [vmem:[%s1478_s7 + $0x68] sm:$0xff] %v1325_v55 }
 0x122   : > { %925 = vst [vmem:[%s1478_s7 + $0xe8] sm:$0xff] %v1327_v56 }
 0x123 PF: > { %s13_s16 = sadd.s32 1, %s1366_s16   ;;  %s1549_s12 = smov %s1358_s14 }
 0x124   : > { %p10_p7 = scmp.ge.s32.totalorder %s13_s16, 10   ;;  %s1550_s13 = smov %s1362_s15 }
 0x125   : > { %s1551_s14 = smov %s1554_s17  ;;  %s1552_s15 = smov %s1558_s18 }
 0x126   :  { %12 = sbr.rel (!%p10_p7) target bundleno = 3 (0x3), region = 76 }

</bundles_post_ra>
